<compile_context>
chip_gen: v7x
topology: tpu7x:2x2x1
jax: 0.10.0
libtpu: 0.0.40
codegen_flags: <defaults>
</compile_context>

<pallas_src>
import math

import jax
import jax.numpy as jnp
from jax import lax
from jax.experimental import pallas as pl
from jax.experimental.pallas import tpu as pltpu

# ----------------------------- small ViT config -----------------------------
IMAGE_SIZE = 16
IN_CHANNELS = 3
PATCH_SIZE = 4
NUM_LAYERS = 2
EMBED_DIM = 32
NUM_HEADS = 4
HEAD_DIM = EMBED_DIM // NUM_HEADS
MLP_SIZE = PATCH_SIZE          # reproduces `mlp_size=patch_size` quirk in the PyTorch ViT
NUM_CLASSES = 10
NUM_PATCHES = (IMAGE_SIZE // PATCH_SIZE) ** 2
SEQ = NUM_PATCHES + 1          # +1 class token
PATCH_DIM = IN_CHANNELS * PATCH_SIZE * PATCH_SIZE
LN_EPS = 1e-5
HEAD_PAD = 128                 # lane-dense padded classifier width (sliced to NUM_CLASSES outside)
MAX_BATCH_BLOCK = 128          # images per grid step (review suggests 64-256)


# ------------------------------ in-kernel math -------------------------------
def _layernorm(x, g, b):
    # Single-pass LayerNorm: var = E[x^2] - mean^2 (one pass over x instead of two).
    mean = jnp.mean(x, axis=-1, keepdims=True)
    msq = jnp.mean(x * x, axis=-1, keepdims=True)
    var = jnp.maximum(msq - mean * mean, 0.0)
    return (x - mean) * lax.rsqrt(var + LN_EPS) * g + b


def _erf(z):
    # Abramowitz & Stegun 7.1.26 (max abs error ~1.5e-7 == f32 noise level).
    p = 0.3275911
    a1, a2, a3, a4, a5 = (0.254829592, -0.284496736, 1.421413741,
                          -1.453152027, 1.061405429)
    sgn = jnp.where(z >= 0.0, 1.0, -1.0)
    x = jnp.abs(z)
    t = 1.0 / (1.0 + p * x)
    poly = ((((a5 * t + a4) * t + a3) * t + a2) * t + a1) * t
    return sgn * (1.0 - poly * jnp.exp(-x * x))


def _gelu_exact(x):
    return 0.5 * x * (1.0 + _erf(x * (1.0 / math.sqrt(2.0))))


# ------------------------------ fused ViT kernel ------------------------------
def _vit_fused_kernel(
    patches_ref,                        # (Bb, S, CPP)  bf16; row 0 of every image is zero (cls slot)
    patch_w_ref,                        # (CPP, D)      bf16
    add_ref,                            # (Bb*S, D)     f32   pos + [cls ; conv_bias], pre-tiled
    attn_w_ref,                         # (L, D, 4D)    bf16  [Wq^T*scale | Wk^T | Wv^T | Wo^T]
    attn_b_ref,                         # (L, 1, 4D)    f32   [bq*scale | bk | bv | bo]
    ln_gb_ref,                          # (L, 4, D)     f32   [ln1_g; ln1_b; ln2_g; ln2_b]
    mlp_w1_ref,                         # (L, D, M)     bf16
    mlp_w2_ref,                         # (L, M, D)     bf16
    mlp_b_ref,                          # (L, 2, D)     f32   [b1 (padded to D); b2]
    head_ln_ref,                        # (2, D)        f32
    head_w_ref,                         # (D, HEAD_PAD) bf16
    head_b_ref,                         # (1, HEAD_PAD) f32
    out_ref,                            # (Bb, HEAD_PAD) f32
):
    Bb, S, CPP = patches_ref.shape
    D, Dh, M = EMBED_DIM, HEAD_DIM, MLP_SIZE
    BS = Bb * S
    bf16 = jnp.bfloat16

    # Patch embedding (Conv2d(k=s=P) == per-patch linear) as ONE fat matmul over Bb*S rows.
    patches = patches_ref[...].reshape(BS, CPP)
    x = jnp.dot(patches, patch_w_ref[...], preferred_element_type=jnp.float32)
    x = x + add_ref[...]                              # folds cls token / pos emb / conv bias
    # TODO(synk): embedding/attention/MLP Dropout layers are identity (eval semantics).

    for l in range(NUM_LAYERS):
        lngb = ln_gb_ref[l]                           # (4, D)
        aw = attn_w_ref[l]                            # (D, 4D) bf16
        ab = attn_b_ref[l]                            # (1, 4D) f32

        # ------------- multi-head self-attention block (pre-LN) -------------
        h = _layernorm(x, lngb[0:1, :], lngb[1:2, :])                               # (BS, D)
        qkv = jnp.dot(h.astype(bf16), aw[:, :3 * D],
                      preferred_element_type=jnp.float32) + ab[:, :3 * D]           # (BS, 3D)
        qkv3 = qkv.reshape(Bb, S, 3 * D)              # per-image view for attention
        attn = ab[:, 3 * D:]                          # out_proj bias, broadcasts over BS rows
        for hh in range(NUM_HEADS):
            lo = hh * Dh
            q = qkv3[:, :, lo:lo + Dh].astype(bf16)            # 1/sqrt(Dh) already folded in Wq/bq
            k = qkv3[:, :, D + lo:D + lo + Dh].astype(bf16)
            v = qkv3[:, :, 2 * D + lo:2 * D + lo + Dh].astype(bf16)
            s = jnp.einsum('bqd,bkd->bqk', q, k,
                           preferred_element_type=jnp.float32)                      # (Bb, S, S)
            m = jnp.max(s, axis=-1, keepdims=True)
            p = jnp.exp(s - m)
            denom = jnp.sum(p, axis=-1, keepdims=True)
            # Deferred softmax normalization: divide the (S, Dh) output, not the (S, S) probs.
            o = jnp.einsum('bqk,bkd->bqd', p.astype(bf16), v,
                           preferred_element_type=jnp.float32) / denom              # (Bb, S, Dh)
            # Head-concat + out_proj folded into fat-M rank-Dh partial matmuls (same math;
            # avoids an unaligned lane-dim concatenate).
            attn = attn + jnp.dot(o.reshape(BS, Dh).astype(bf16),
                                  aw[lo:lo + Dh, 3 * D:],
                                  preferred_element_type=jnp.float32)
        x = attn + x                                  # residual

        # ------------------------- MLP block (pre-LN) ------------------------
        mb = mlp_b_ref[l]                             # (2, D)
        h = _layernorm(x, lngb[2:3, :], lngb[3:4, :])
        h = jnp.dot(h.astype(bf16), mlp_w1_ref[l],
                    preferred_element_type=jnp.float32) + mb[0:1, :M]
        h = _gelu_exact(h)                            # (BS, M) stays in VMEM
        h = jnp.dot(h.astype(bf16), mlp_w2_ref[l],
                    preferred_element_type=jnp.float32) + mb[1:2, :]
        x = h + x                                     # residual

    # -------------------- classifier head on the class tokens --------------------
    hln = head_ln_ref[...]
    cls_tok = x.reshape(Bb, S, D)[:, 0, :]            # (Bb, D)
    hc = _layernorm(cls_tok, hln[0:1, :], hln[1:2, :])
    out_ref[...] = jnp.dot(hc.astype(bf16), head_w_ref[...],
                           preferred_element_type=jnp.float32) + head_b_ref[...]


# ------------------------------ model wrapper -------------------------------
def vit_forward(x, params):
    B, C, H, W = x.shape
    P, D = PATCH_SIZE, EMBED_DIM
    Hp, Wp = H // P, W // P
    N = Hp * Wp
    S = N + 1
    CPP = C * P * P

    # --- XLA-side layout glue (tiny, once per call) ---
    # NCHW -> (B, N, C*P*P) patch extraction; prepend an all-zero row per image so the
    # in-kernel patch matmul directly produces S rows (row 0 becomes cls + pos[0]).
    patches = (x.reshape(B, C, Hp, P, Wp, P)
                .transpose(0, 2, 4, 1, 3, 5)
                .reshape(B, N, CPP))
    patches_ext = jnp.concatenate([jnp.zeros((B, 1, CPP), x.dtype), patches], axis=1)

    # Batch blocking: Bb images per grid step; grid length >= 2 whenever B >= 2 so the
    # "parallel" grid axis can shard across both v7x TensorCores.
    nb = 1 if B == 1 else max(2, -(-B // MAX_BATCH_BLOCK))
    Bb = -(-B // nb)
    nb = -(-B // Bb)
    Bpad = nb * Bb
    if Bpad != B:
        patches_ext = jnp.concatenate(
            [patches_ext, jnp.zeros((Bpad - B, S, CPP), patches_ext.dtype)], axis=0)
    patches_bf16 = patches_ext.astype(jnp.bfloat16)   # bf16 MXU operand, halves input DMA bytes

    # Additive term folding class token, conv bias and position embedding, pre-tiled to
    # the (Bb*S, D) flat layout used inside the kernel:
    #   row i*S      : cls + pos[0]
    #   rows i*S+1.. : conv_bias + pos[1..]
    add = params["pos"] + jnp.concatenate(
        [params["cls"], jnp.broadcast_to(params["patch_b"], (N, D))], axis=0)       # (S, D)
    add_flat = jnp.tile(add, (Bb, 1))                                                # (Bb*S, D)

    weights = (params["patch_w"], add_flat,
               params["attn_w"], params["attn_b"], params["ln_gb"],
               params["mlp_w1"], params["mlp_w2"], params["mlp_b"],
               params["head_ln"], params["head_w_pad"], params["head_b_pad"])

    def _wspec(a):
        # Full-array blocks, constant index map: weights loaded once, stay VMEM-resident.
        if a.ndim == 2:
            return pl.BlockSpec(a.shape, lambda b: (0, 0))
        return pl.BlockSpec(a.shape, lambda b: (0, 0, 0))

    in_specs = [pl.BlockSpec((Bb, S, CPP), lambda b: (b, 0, 0))]
    in_specs += [_wspec(w) for w in weights]

    logits_pad = pl.pallas_call(
        _vit_fused_kernel,
        out_shape=jax.ShapeDtypeStruct((nb, Bb, HEAD_PAD), jnp.float32),
        grid=(nb,),                                   # one batch block per grid step
        in_specs=in_specs,
        out_specs=pl.BlockSpec((None, Bb, HEAD_PAD), lambda b: (b, 0, 0)),
        compiler_params=pltpu.CompilerParams(dimension_semantics=("parallel",)),
    )(patches_bf16, *weights)

    return logits_pad.reshape(Bpad, HEAD_PAD)[:B, :NUM_CLASSES]


# ------------------------------ parameter init ------------------------------
def init_params(key):
    def nrm(k, shape, scale=0.02):
        return scale * jax.random.normal(k, shape, dtype=jnp.float32)

    D, L, Dh, M = EMBED_DIM, NUM_LAYERS, HEAD_DIM, MLP_SIZE
    q_scale = 1.0 / math.sqrt(Dh)
    ks = iter(jax.random.split(key, 64))
    params = {}

    # torch.randn-style embeddings
    params["cls"] = jax.random.normal(next(ks), (1, D), jnp.float32)
    params["pos"] = jax.random.normal(next(ks), (SEQ, D), jnp.float32)
    # Conv2d weight (D, C, P, P) -> per-patch matmul weight (C*P*P, D); bf16 MXU operand.
    w_conv = nrm(next(ks), (D, IN_CHANNELS, PATCH_SIZE, PATCH_SIZE))
    params["patch_w"] = w_conv.reshape(D, -1).T.astype(jnp.bfloat16)
    params["patch_b"] = nrm(next(ks), (1, D))

    attn_w, attn_b, ln_gb, mlp_w1, mlp_w2, mlp_b = [], [], [], [], [], []
    for _ in range(L):
        # PyTorch nn.MultiheadAttention parameters.
        in_proj_w = nrm(next(ks), (3 * D, D))          # in_proj_weight
        in_proj_b = nrm(next(ks), (3 * D,))            # in_proj_bias
        out_proj_w = nrm(next(ks), (D, D))             # out_proj.weight
        out_proj_b = nrm(next(ks), (D,))               # out_proj.bias
        w_q, w_k, w_v = in_proj_w[:D], in_proj_w[D:2 * D], in_proj_w[2 * D:]
        b_q, b_k, b_v = in_proj_b[:D], in_proj_b[D:2 * D], in_proj_b[2 * D:]
        # 1/sqrt(head_dim) folded into the q projection (free at packing time).
        attn_w.append(jnp.concatenate(
            [w_q.T * q_scale, w_k.T, w_v.T, out_proj_w.T], axis=1))       # (D, 4D)
        attn_b.append(jnp.concatenate(
            [b_q * q_scale, b_k, b_v, out_proj_b]).reshape(1, 4 * D))     # (1, 4D)
        ln_gb.append(jnp.stack([jnp.ones(D), jnp.zeros(D),
                                jnp.ones(D), jnp.zeros(D)]))              # (4, D)
        w1 = nrm(next(ks), (M, D)); b1 = nrm(next(ks), (M,))              # Linear(D -> M)
        w2 = nrm(next(ks), (D, M)); b2 = nrm(next(ks), (D,))              # Linear(M -> D)
        mlp_w1.append(w1.T); mlp_w2.append(w2.T)
        mlp_b.append(jnp.stack([jnp.pad(b1, (0, D - M)), b2]))            # (2, D)

    params["attn_w"] = jnp.stack(attn_w).astype(jnp.bfloat16)
    params["attn_b"] = jnp.stack(attn_b)
    params["ln_gb"] = jnp.stack(ln_gb)
    params["mlp_w1"] = jnp.stack(mlp_w1).astype(jnp.bfloat16)
    params["mlp_w2"] = jnp.stack(mlp_w2).astype(jnp.bfloat16)
    params["mlp_b"] = jnp.stack(mlp_b)

    params["head_ln"] = jnp.stack([jnp.ones(D), jnp.zeros(D)])            # (2, D)
    head_w = nrm(next(ks), (NUM_CLASSES, D)).T                            # (D, NUM_CLASSES)
    head_b = nrm(next(ks), (NUM_CLASSES,))
    # Pad the classifier to 128 lanes so the kernel's only HBM store is lane-dense.
    params["head_w_pad"] = (jnp.zeros((D, HEAD_PAD), jnp.float32)
                            .at[:, :NUM_CLASSES].set(head_w).astype(jnp.bfloat16))
    params["head_b_pad"] = jnp.zeros((1, HEAD_PAD), jnp.float32).at[0, :NUM_CLASSES].set(head_b)
    return params


# ----------------------------------- main ------------------------------------
if __name__ == "__main__":
    key = jax.random.PRNGKey(0)
    pkey, xkey = jax.random.split(key)
    params = init_params(pkey)
    x = jax.random.normal(xkey, (2, IN_CHANNELS, IMAGE_SIZE, IMAGE_SIZE), jnp.float32)

    logits = jax.jit(vit_forward)(x, params)
    logits = jax.block_until_ready(logits)
    assert logits.shape == (2, NUM_CLASSES), logits.shape
    assert bool(jnp.all(jnp.isfinite(logits)))
    print("KERNEL_OK")
</pallas_src>

<mosaic_0001>
module attributes {stable_mosaic.version = 11 : i64} {
  func.func @_vit_fused_kernel(%arg0: i32, %arg1: memref<1x17x48xbf16, #tpu.memory_space<vmem>>, %arg2: memref<48x32xbf16, #tpu.memory_space<vmem>>, %arg3: memref<17x32xf32, #tpu.memory_space<vmem>>, %arg4: memref<2x32x128xbf16, #tpu.memory_space<vmem>>, %arg5: memref<2x1x128xf32, #tpu.memory_space<vmem>>, %arg6: memref<2x4x32xf32, #tpu.memory_space<vmem>>, %arg7: memref<2x32x4xbf16, #tpu.memory_space<vmem>>, %arg8: memref<2x4x32xbf16, #tpu.memory_space<vmem>>, %arg9: memref<2x2x32xf32, #tpu.memory_space<vmem>>, %arg10: memref<2x32xf32, #tpu.memory_space<vmem>>, %arg11: memref<32x128xbf16, #tpu.memory_space<vmem>>, %arg12: memref<1x128xf32, #tpu.memory_space<vmem>>, %arg13: memref<1x1x128xf32, #tpu.memory_space<vmem>>) attributes {dimension_semantics = [#tpu.dimension_semantics<parallel>], iteration_bounds = array<i64: 2>, scalar_prefetch = 0 : i64, scratch_operands = 0 : i64, tpu.core_type = #tpu.core_type<tc>, window_params = [{transform_indices = @transform_0, window_bounds = array<i64: 1, 17, 48>}, {pipeline_mode = #tpu.pipeline_mode<synchronous>, transform_indices = @transform_1, window_bounds = array<i64: 48, 32>}, {pipeline_mode = #tpu.pipeline_mode<synchronous>, transform_indices = @transform_2, window_bounds = array<i64: 17, 32>}, {pipeline_mode = #tpu.pipeline_mode<synchronous>, transform_indices = @transform_3, window_bounds = array<i64: 2, 32, 128>}, {pipeline_mode = #tpu.pipeline_mode<synchronous>, transform_indices = @transform_4, window_bounds = array<i64: 2, 1, 128>}, {pipeline_mode = #tpu.pipeline_mode<synchronous>, transform_indices = @transform_5, window_bounds = array<i64: 2, 4, 32>}, {pipeline_mode = #tpu.pipeline_mode<synchronous>, transform_indices = @transform_6, window_bounds = array<i64: 2, 32, 4>}, {pipeline_mode = #tpu.pipeline_mode<synchronous>, transform_indices = @transform_7, window_bounds = array<i64: 2, 4, 32>}, {pipeline_mode = #tpu.pipeline_mode<synchronous>, transform_indices = @transform_8, window_bounds = array<i64: 2, 2, 32>}, {pipeline_mode = #tpu.pipeline_mode<synchronous>, transform_indices = @transform_9, window_bounds = array<i64: 2, 32>}, {pipeline_mode = #tpu.pipeline_mode<synchronous>, transform_indices = @transform_10, window_bounds = array<i64: 32, 128>}, {pipeline_mode = #tpu.pipeline_mode<synchronous>, transform_indices = @transform_11, window_bounds = array<i64: 1, 128>}, {transform_indices = @transform_12, window_bounds = array<i64: 1, 1, 128>}]} {
    %c0 = arith.constant 0 : index
    %c0_0 = arith.constant 0 : index
    %c0_1 = arith.constant 0 : index
    %0 = vector.load %arg1[%c0, %c0_0, %c0_1] : memref<1x17x48xbf16, #tpu.memory_space<vmem>>, vector<1x17x48xbf16>
    %1 = vector.shape_cast %0 : vector<1x17x48xbf16> to vector<17x48xbf16>
    %c0_2 = arith.constant 0 : index
    %c0_3 = arith.constant 0 : index
    %2 = vector.load %arg2[%c0_2, %c0_3] : memref<48x32xbf16, #tpu.memory_space<vmem>>, vector<48x32xbf16>
    %cst = arith.constant dense<0.000000e+00> : vector<17x32xf32>
    %3 = tpu.matmul %1, %2, %cst {dimension_numbers = #tpu.dot_dimension_numbers<[1], [0], [0], [1], [0, 0, 1, 1], [], []>} : vector<17x48xbf16>, vector<48x32xbf16>, vector<17x32xf32> -> vector<17x32xf32>
    %c0_4 = arith.constant 0 : index
    %c0_5 = arith.constant 0 : index
    %4 = vector.load %arg3[%c0_4, %c0_5] : memref<17x32xf32, #tpu.memory_space<vmem>>, vector<17x32xf32>
    %5 = arith.addf %3, %4 : vector<17x32xf32>
    %c0_6 = arith.constant 0 : index
    %c0_7 = arith.constant 0 : index
    %c0_8 = arith.constant 0 : index
    %6 = vector.load %arg6[%c0_6, %c0_7, %c0_8] : memref<2x4x32xf32, #tpu.memory_space<vmem>>, vector<1x4x32xf32>
    %7 = vector.shape_cast %6 : vector<1x4x32xf32> to vector<4x32xf32>
    %c0_9 = arith.constant 0 : index
    %c0_10 = arith.constant 0 : index
    %c0_11 = arith.constant 0 : index
    %8 = vector.load %arg4[%c0_9, %c0_10, %c0_11] : memref<2x32x128xbf16, #tpu.memory_space<vmem>>, vector<1x32x128xbf16>
    %9 = vector.shape_cast %8 : vector<1x32x128xbf16> to vector<32x128xbf16>
    %c0_12 = arith.constant 0 : index
    %c0_13 = arith.constant 0 : index
    %c0_14 = arith.constant 0 : index
    %10 = vector.load %arg5[%c0_12, %c0_13, %c0_14] : memref<2x1x128xf32, #tpu.memory_space<vmem>>, vector<1x1x128xf32>
    %11 = vector.shape_cast %10 : vector<1x1x128xf32> to vector<1x128xf32>
    %12 = vector.extract_strided_slice %7 {offsets = [0, 0], sizes = [1, 32], strides = [1, 1]} : vector<4x32xf32> to vector<1x32xf32>
    %13 = vector.extract_strided_slice %7 {offsets = [1, 0], sizes = [1, 32], strides = [1, 1]} : vector<4x32xf32> to vector<1x32xf32>
    %cst_15 = arith.constant dense<0.000000e+00> : vector<17xf32>
    %14 = vector.multi_reduction <add>, %5, %cst_15 [1] : vector<17x32xf32> to vector<17xf32>
    %15 = vector.shape_cast %14 : vector<17xf32> to vector<17x1xf32>
    %cst_16 = arith.constant 3.200000e+01 : f32
    %16 = vector.broadcast %cst_16 : f32 to vector<17x1xf32>
    %17 = arith.divf %15, %16 : vector<17x1xf32>
    %18 = arith.mulf %5, %5 : vector<17x32xf32>
    %cst_17 = arith.constant dense<0.000000e+00> : vector<17xf32>
    %19 = vector.multi_reduction <add>, %18, %cst_17 [1] : vector<17x32xf32> to vector<17xf32>
    %20 = vector.shape_cast %19 : vector<17xf32> to vector<17x1xf32>
    %cst_18 = arith.constant 3.200000e+01 : f32
    %21 = vector.broadcast %cst_18 : f32 to vector<17x1xf32>
    %22 = arith.divf %20, %21 : vector<17x1xf32>
    %23 = arith.mulf %17, %17 : vector<17x1xf32>
    %24 = arith.subf %22, %23 : vector<17x1xf32>
    %cst_19 = arith.constant 0.000000e+00 : f32
    %25 = vector.broadcast %cst_19 : f32 to vector<17x1xf32>
    %26 = arith.maximumf %24, %25 : vector<17x1xf32>
    %27 = vector.broadcast %17 : vector<17x1xf32> to vector<17x32xf32>
    %28 = arith.subf %5, %27 : vector<17x32xf32>
    %cst_20 = arith.constant 9.99999974E-6 : f32
    %29 = vector.broadcast %cst_20 : f32 to vector<17x1xf32>
    %30 = arith.addf %26, %29 : vector<17x1xf32>
    %31 = math.rsqrt %30 : vector<17x1xf32>
    %32 = vector.broadcast %31 : vector<17x1xf32> to vector<17x32xf32>
    %33 = arith.mulf %28, %32 : vector<17x32xf32>
    %34 = vector.broadcast %12 : vector<1x32xf32> to vector<17x32xf32>
    %35 = arith.mulf %33, %34 : vector<17x32xf32>
    %36 = vector.broadcast %13 : vector<1x32xf32> to vector<17x32xf32>
    %37 = arith.addf %35, %36 : vector<17x32xf32>
    %38 = arith.truncf %37 : vector<17x32xf32> to vector<17x32xbf16>
    %39 = vector.extract_strided_slice %9 {offsets = [0, 0], sizes = [32, 96], strides = [1, 1]} : vector<32x128xbf16> to vector<32x96xbf16>
    %cst_21 = arith.constant dense<0.000000e+00> : vector<17x96xf32>
    %40 = tpu.matmul %38, %39, %cst_21 {dimension_numbers = #tpu.dot_dimension_numbers<[1], [0], [0], [1], [0, 0, 1, 1], [], []>} : vector<17x32xbf16>, vector<32x96xbf16>, vector<17x96xf32> -> vector<17x96xf32>
    %41 = vector.extract_strided_slice %11 {offsets = [0, 0], sizes = [1, 96], strides = [1, 1]} : vector<1x128xf32> to vector<1x96xf32>
    %42 = vector.broadcast %41 : vector<1x96xf32> to vector<17x96xf32>
    %43 = arith.addf %40, %42 : vector<17x96xf32>
    %44 = vector.shape_cast %43 : vector<17x96xf32> to vector<1x17x96xf32>
    %45 = vector.extract_strided_slice %11 {offsets = [0, 96], sizes = [1, 32], strides = [1, 1]} : vector<1x128xf32> to vector<1x32xf32>
    %46 = vector.extract_strided_slice %44 {offsets = [0, 0, 0], sizes = [1, 17, 8], strides = [1, 1, 1]} : vector<1x17x96xf32> to vector<1x17x8xf32>
    %47 = arith.truncf %46 : vector<1x17x8xf32> to vector<1x17x8xbf16>
    %48 = vector.extract_strided_slice %44 {offsets = [0, 0, 32], sizes = [1, 17, 8], strides = [1, 1, 1]} : vector<1x17x96xf32> to vector<1x17x8xf32>
    %49 = arith.truncf %48 : vector<1x17x8xf32> to vector<1x17x8xbf16>
    %50 = vector.extract_strided_slice %44 {offsets = [0, 0, 64], sizes = [1, 17, 8], strides = [1, 1, 1]} : vector<1x17x96xf32> to vector<1x17x8xf32>
    %51 = arith.truncf %50 : vector<1x17x8xf32> to vector<1x17x8xbf16>
    "tpu.trace_start"() <{level = 10 : i32, message = "bqd,bkd->bqk"}> : () -> ()
    %cst_22 = arith.constant dense<0.000000e+00> : vector<1x17x17xf32>
    %52 = tpu.matmul %47, %49, %cst_22 {dimension_numbers = #tpu.dot_dimension_numbers<[2], [2], [1], [1], [0, 0, 0, 1, 1, 1], [0], [0]>} : vector<1x17x8xbf16>, vector<1x17x8xbf16>, vector<1x17x17xf32> -> vector<1x17x17xf32>
    "tpu.trace_stop"() : () -> ()
    %cst_23 = arith.constant dense<0xFF800000> : vector<1x17xf32>
    %53 = vector.multi_reduction <maximumf>, %52, %cst_23 [2] : vector<1x17x17xf32> to vector<1x17xf32>
    %54 = vector.shape_cast %53 : vector<1x17xf32> to vector<1x17x1xf32>
    %55 = vector.broadcast %54 : vector<1x17x1xf32> to vector<1x17x17xf32>
    %56 = arith.subf %52, %55 : vector<1x17x17xf32>
    %57 = math.exp %56 : vector<1x17x17xf32>
    %cst_24 = arith.constant dense<0.000000e+00> : vector<1x17xf32>
    %58 = vector.multi_reduction <add>, %57, %cst_24 [2] : vector<1x17x17xf32> to vector<1x17xf32>
    %59 = vector.shape_cast %58 : vector<1x17xf32> to vector<1x17x1xf32>
    %60 = arith.truncf %57 : vector<1x17x17xf32> to vector<1x17x17xbf16>
    "tpu.trace_start"() <{level = 10 : i32, message = "bqk,bkd->bqd"}> : () -> ()
    %cst_25 = arith.constant dense<0.000000e+00> : vector<1x17x8xf32>
    %61 = tpu.matmul %60, %51, %cst_25 {dimension_numbers = #tpu.dot_dimension_numbers<[2], [1], [1], [2], [0, 0, 0, 1, 1, 2], [0], [0]>} : vector<1x17x17xbf16>, vector<1x17x8xbf16>, vector<1x17x8xf32> -> vector<1x17x8xf32>
    "tpu.trace_stop"() : () -> ()
    %62 = vector.broadcast %59 : vector<1x17x1xf32> to vector<1x17x8xf32>
    %63 = arith.divf %61, %62 : vector<1x17x8xf32>
    %64 = vector.shape_cast %63 : vector<1x17x8xf32> to vector<17x8xf32>
    %65 = arith.truncf %64 : vector<17x8xf32> to vector<17x8xbf16>
    %66 = vector.extract_strided_slice %9 {offsets = [0, 96], sizes = [8, 32], strides = [1, 1]} : vector<32x128xbf16> to vector<8x32xbf16>
    %cst_26 = arith.constant dense<0.000000e+00> : vector<17x32xf32>
    %67 = tpu.matmul %65, %66, %cst_26 {dimension_numbers = #tpu.dot_dimension_numbers<[1], [0], [0], [1], [0, 0, 1, 1], [], []>} : vector<17x8xbf16>, vector<8x32xbf16>, vector<17x32xf32> -> vector<17x32xf32>
    %68 = vector.broadcast %45 : vector<1x32xf32> to vector<17x32xf32>
    %69 = arith.addf %68, %67 : vector<17x32xf32>
    %70 = vector.extract_strided_slice %44 {offsets = [0, 0, 8], sizes = [1, 17, 8], strides = [1, 1, 1]} : vector<1x17x96xf32> to vector<1x17x8xf32>
    %71 = arith.truncf %70 : vector<1x17x8xf32> to vector<1x17x8xbf16>
    %72 = vector.extract_strided_slice %44 {offsets = [0, 0, 40], sizes = [1, 17, 8], strides = [1, 1, 1]} : vector<1x17x96xf32> to vector<1x17x8xf32>
    %73 = arith.truncf %72 : vector<1x17x8xf32> to vector<1x17x8xbf16>
    %74 = vector.extract_strided_slice %44 {offsets = [0, 0, 72], sizes = [1, 17, 8], strides = [1, 1, 1]} : vector<1x17x96xf32> to vector<1x17x8xf32>
    %75 = arith.truncf %74 : vector<1x17x8xf32> to vector<1x17x8xbf16>
    "tpu.trace_start"() <{level = 10 : i32, message = "bqd,bkd->bqk"}> : () -> ()
    %cst_27 = arith.constant dense<0.000000e+00> : vector<1x17x17xf32>
    %76 = tpu.matmul %71, %73, %cst_27 {dimension_numbers = #tpu.dot_dimension_numbers<[2], [2], [1], [1], [0, 0, 0, 1, 1, 1], [0], [0]>} : vector<1x17x8xbf16>, vector<1x17x8xbf16>, vector<1x17x17xf32> -> vector<1x17x17xf32>
    "tpu.trace_stop"() : () -> ()
    %cst_28 = arith.constant dense<0xFF800000> : vector<1x17xf32>
    %77 = vector.multi_reduction <maximumf>, %76, %cst_28 [2] : vector<1x17x17xf32> to vector<1x17xf32>
    %78 = vector.shape_cast %77 : vector<1x17xf32> to vector<1x17x1xf32>
    %79 = vector.broadcast %78 : vector<1x17x1xf32> to vector<1x17x17xf32>
    %80 = arith.subf %76, %79 : vector<1x17x17xf32>
    %81 = math.exp %80 : vector<1x17x17xf32>
    %cst_29 = arith.constant dense<0.000000e+00> : vector<1x17xf32>
    %82 = vector.multi_reduction <add>, %81, %cst_29 [2] : vector<1x17x17xf32> to vector<1x17xf32>
    %83 = vector.shape_cast %82 : vector<1x17xf32> to vector<1x17x1xf32>
    %84 = arith.truncf %81 : vector<1x17x17xf32> to vector<1x17x17xbf16>
    "tpu.trace_start"() <{level = 10 : i32, message = "bqk,bkd->bqd"}> : () -> ()
    %cst_30 = arith.constant dense<0.000000e+00> : vector<1x17x8xf32>
    %85 = tpu.matmul %84, %75, %cst_30 {dimension_numbers = #tpu.dot_dimension_numbers<[2], [1], [1], [2], [0, 0, 0, 1, 1, 2], [0], [0]>} : vector<1x17x17xbf16>, vector<1x17x8xbf16>, vector<1x17x8xf32> -> vector<1x17x8xf32>
    "tpu.trace_stop"() : () -> ()
    %86 = vector.broadcast %83 : vector<1x17x1xf32> to vector<1x17x8xf32>
    %87 = arith.divf %85, %86 : vector<1x17x8xf32>
    %88 = vector.shape_cast %87 : vector<1x17x8xf32> to vector<17x8xf32>
    %89 = arith.truncf %88 : vector<17x8xf32> to vector<17x8xbf16>
    %90 = vector.extract_strided_slice %9 {offsets = [8, 96], sizes = [8, 32], strides = [1, 1]} : vector<32x128xbf16> to vector<8x32xbf16>
    %cst_31 = arith.constant dense<0.000000e+00> : vector<17x32xf32>
    %91 = tpu.matmul %89, %90, %cst_31 {dimension_numbers = #tpu.dot_dimension_numbers<[1], [0], [0], [1], [0, 0, 1, 1], [], []>} : vector<17x8xbf16>, vector<8x32xbf16>, vector<17x32xf32> -> vector<17x32xf32>
    %92 = arith.addf %69, %91 : vector<17x32xf32>
    %93 = vector.extract_strided_slice %44 {offsets = [0, 0, 16], sizes = [1, 17, 8], strides = [1, 1, 1]} : vector<1x17x96xf32> to vector<1x17x8xf32>
    %94 = arith.truncf %93 : vector<1x17x8xf32> to vector<1x17x8xbf16>
    %95 = vector.extract_strided_slice %44 {offsets = [0, 0, 48], sizes = [1, 17, 8], strides = [1, 1, 1]} : vector<1x17x96xf32> to vector<1x17x8xf32>
    %96 = arith.truncf %95 : vector<1x17x8xf32> to vector<1x17x8xbf16>
    %97 = vector.extract_strided_slice %44 {offsets = [0, 0, 80], sizes = [1, 17, 8], strides = [1, 1, 1]} : vector<1x17x96xf32> to vector<1x17x8xf32>
    %98 = arith.truncf %97 : vector<1x17x8xf32> to vector<1x17x8xbf16>
    "tpu.trace_start"() <{level = 10 : i32, message = "bqd,bkd->bqk"}> : () -> ()
    %cst_32 = arith.constant dense<0.000000e+00> : vector<1x17x17xf32>
    %99 = tpu.matmul %94, %96, %cst_32 {dimension_numbers = #tpu.dot_dimension_numbers<[2], [2], [1], [1], [0, 0, 0, 1, 1, 1], [0], [0]>} : vector<1x17x8xbf16>, vector<1x17x8xbf16>, vector<1x17x17xf32> -> vector<1x17x17xf32>
    "tpu.trace_stop"() : () -> ()
    %cst_33 = arith.constant dense<0xFF800000> : vector<1x17xf32>
    %100 = vector.multi_reduction <maximumf>, %99, %cst_33 [2] : vector<1x17x17xf32> to vector<1x17xf32>
    %101 = vector.shape_cast %100 : vector<1x17xf32> to vector<1x17x1xf32>
    %102 = vector.broadcast %101 : vector<1x17x1xf32> to vector<1x17x17xf32>
    %103 = arith.subf %99, %102 : vector<1x17x17xf32>
    %104 = math.exp %103 : vector<1x17x17xf32>
    %cst_34 = arith.constant dense<0.000000e+00> : vector<1x17xf32>
    %105 = vector.multi_reduction <add>, %104, %cst_34 [2] : vector<1x17x17xf32> to vector<1x17xf32>
    %106 = vector.shape_cast %105 : vector<1x17xf32> to vector<1x17x1xf32>
    %107 = arith.truncf %104 : vector<1x17x17xf32> to vector<1x17x17xbf16>
    "tpu.trace_start"() <{level = 10 : i32, message = "bqk,bkd->bqd"}> : () -> ()
    %cst_35 = arith.constant dense<0.000000e+00> : vector<1x17x8xf32>
    %108 = tpu.matmul %107, %98, %cst_35 {dimension_numbers = #tpu.dot_dimension_numbers<[2], [1], [1], [2], [0, 0, 0, 1, 1, 2], [0], [0]>} : vector<1x17x17xbf16>, vector<1x17x8xbf16>, vector<1x17x8xf32> -> vector<1x17x8xf32>
    "tpu.trace_stop"() : () -> ()
    %109 = vector.broadcast %106 : vector<1x17x1xf32> to vector<1x17x8xf32>
    %110 = arith.divf %108, %109 : vector<1x17x8xf32>
    %111 = vector.shape_cast %110 : vector<1x17x8xf32> to vector<17x8xf32>
    %112 = arith.truncf %111 : vector<17x8xf32> to vector<17x8xbf16>
    %113 = vector.extract_strided_slice %9 {offsets = [16, 96], sizes = [8, 32], strides = [1, 1]} : vector<32x128xbf16> to vector<8x32xbf16>
    %cst_36 = arith.constant dense<0.000000e+00> : vector<17x32xf32>
    %114 = tpu.matmul %112, %113, %cst_36 {dimension_numbers = #tpu.dot_dimension_numbers<[1], [0], [0], [1], [0, 0, 1, 1], [], []>} : vector<17x8xbf16>, vector<8x32xbf16>, vector<17x32xf32> -> vector<17x32xf32>
    %115 = arith.addf %92, %114 : vector<17x32xf32>
    %116 = vector.extract_strided_slice %44 {offsets = [0, 0, 24], sizes = [1, 17, 8], strides = [1, 1, 1]} : vector<1x17x96xf32> to vector<1x17x8xf32>
    %117 = arith.truncf %116 : vector<1x17x8xf32> to vector<1x17x8xbf16>
    %118 = vector.extract_strided_slice %44 {offsets = [0, 0, 56], sizes = [1, 17, 8], strides = [1, 1, 1]} : vector<1x17x96xf32> to vector<1x17x8xf32>
    %119 = arith.truncf %118 : vector<1x17x8xf32> to vector<1x17x8xbf16>
    %120 = vector.extract_strided_slice %44 {offsets = [0, 0, 88], sizes = [1, 17, 8], strides = [1, 1, 1]} : vector<1x17x96xf32> to vector<1x17x8xf32>
    %121 = arith.truncf %120 : vector<1x17x8xf32> to vector<1x17x8xbf16>
    "tpu.trace_start"() <{level = 10 : i32, message = "bqd,bkd->bqk"}> : () -> ()
    %cst_37 = arith.constant dense<0.000000e+00> : vector<1x17x17xf32>
    %122 = tpu.matmul %117, %119, %cst_37 {dimension_numbers = #tpu.dot_dimension_numbers<[2], [2], [1], [1], [0, 0, 0, 1, 1, 1], [0], [0]>} : vector<1x17x8xbf16>, vector<1x17x8xbf16>, vector<1x17x17xf32> -> vector<1x17x17xf32>
    "tpu.trace_stop"() : () -> ()
    %cst_38 = arith.constant dense<0xFF800000> : vector<1x17xf32>
    %123 = vector.multi_reduction <maximumf>, %122, %cst_38 [2] : vector<1x17x17xf32> to vector<1x17xf32>
    %124 = vector.shape_cast %123 : vector<1x17xf32> to vector<1x17x1xf32>
    %125 = vector.broadcast %124 : vector<1x17x1xf32> to vector<1x17x17xf32>
    %126 = arith.subf %122, %125 : vector<1x17x17xf32>
    %127 = math.exp %126 : vector<1x17x17xf32>
    %cst_39 = arith.constant dense<0.000000e+00> : vector<1x17xf32>
    %128 = vector.multi_reduction <add>, %127, %cst_39 [2] : vector<1x17x17xf32> to vector<1x17xf32>
    %129 = vector.shape_cast %128 : vector<1x17xf32> to vector<1x17x1xf32>
    %130 = arith.truncf %127 : vector<1x17x17xf32> to vector<1x17x17xbf16>
    "tpu.trace_start"() <{level = 10 : i32, message = "bqk,bkd->bqd"}> : () -> ()
    %cst_40 = arith.constant dense<0.000000e+00> : vector<1x17x8xf32>
    %131 = tpu.matmul %130, %121, %cst_40 {dimension_numbers = #tpu.dot_dimension_numbers<[2], [1], [1], [2], [0, 0, 0, 1, 1, 2], [0], [0]>} : vector<1x17x17xbf16>, vector<1x17x8xbf16>, vector<1x17x8xf32> -> vector<1x17x8xf32>
    "tpu.trace_stop"() : () -> ()
    %132 = vector.broadcast %129 : vector<1x17x1xf32> to vector<1x17x8xf32>
    %133 = arith.divf %131, %132 : vector<1x17x8xf32>
    %134 = vector.shape_cast %133 : vector<1x17x8xf32> to vector<17x8xf32>
    %135 = arith.truncf %134 : vector<17x8xf32> to vector<17x8xbf16>
    %136 = vector.extract_strided_slice %9 {offsets = [24, 96], sizes = [8, 32], strides = [1, 1]} : vector<32x128xbf16> to vector<8x32xbf16>
    %cst_41 = arith.constant dense<0.000000e+00> : vector<17x32xf32>
    %137 = tpu.matmul %135, %136, %cst_41 {dimension_numbers = #tpu.dot_dimension_numbers<[1], [0], [0], [1], [0, 0, 1, 1], [], []>} : vector<17x8xbf16>, vector<8x32xbf16>, vector<17x32xf32> -> vector<17x32xf32>
    %138 = arith.addf %115, %137 : vector<17x32xf32>
    %139 = arith.addf %138, %5 : vector<17x32xf32>
    %c0_42 = arith.constant 0 : index
    %c0_43 = arith.constant 0 : index
    %c0_44 = arith.constant 0 : index
    %140 = vector.load %arg9[%c0_42, %c0_43, %c0_44] : memref<2x2x32xf32, #tpu.memory_space<vmem>>, vector<1x2x32xf32>
    %141 = vector.shape_cast %140 : vector<1x2x32xf32> to vector<2x32xf32>
    %142 = vector.extract_strided_slice %7 {offsets = [2, 0], sizes = [1, 32], strides = [1, 1]} : vector<4x32xf32> to vector<1x32xf32>
    %143 = vector.extract_strided_slice %7 {offsets = [3, 0], sizes = [1, 32], strides = [1, 1]} : vector<4x32xf32> to vector<1x32xf32>
    %cst_45 = arith.constant dense<0.000000e+00> : vector<17xf32>
    %144 = vector.multi_reduction <add>, %139, %cst_45 [1] : vector<17x32xf32> to vector<17xf32>
    %145 = vector.shape_cast %144 : vector<17xf32> to vector<17x1xf32>
    %cst_46 = arith.constant 3.200000e+01 : f32
    %146 = vector.broadcast %cst_46 : f32 to vector<17x1xf32>
    %147 = arith.divf %145, %146 : vector<17x1xf32>
    %148 = arith.mulf %139, %139 : vector<17x32xf32>
    %cst_47 = arith.constant dense<0.000000e+00> : vector<17xf32>
    %149 = vector.multi_reduction <add>, %148, %cst_47 [1] : vector<17x32xf32> to vector<17xf32>
    %150 = vector.shape_cast %149 : vector<17xf32> to vector<17x1xf32>
    %cst_48 = arith.constant 3.200000e+01 : f32
    %151 = vector.broadcast %cst_48 : f32 to vector<17x1xf32>
    %152 = arith.divf %150, %151 : vector<17x1xf32>
    %153 = arith.mulf %147, %147 : vector<17x1xf32>
    %154 = arith.subf %152, %153 : vector<17x1xf32>
    %cst_49 = arith.constant 0.000000e+00 : f32
    %155 = vector.broadcast %cst_49 : f32 to vector<17x1xf32>
    %156 = arith.maximumf %154, %155 : vector<17x1xf32>
    %157 = vector.broadcast %147 : vector<17x1xf32> to vector<17x32xf32>
    %158 = arith.subf %139, %157 : vector<17x32xf32>
    %cst_50 = arith.constant 9.99999974E-6 : f32
    %159 = vector.broadcast %cst_50 : f32 to vector<17x1xf32>
    %160 = arith.addf %156, %159 : vector<17x1xf32>
    %161 = math.rsqrt %160 : vector<17x1xf32>
    %162 = vector.broadcast %161 : vector<17x1xf32> to vector<17x32xf32>
    %163 = arith.mulf %158, %162 : vector<17x32xf32>
    %164 = vector.broadcast %142 : vector<1x32xf32> to vector<17x32xf32>
    %165 = arith.mulf %163, %164 : vector<17x32xf32>
    %166 = vector.broadcast %143 : vector<1x32xf32> to vector<17x32xf32>
    %167 = arith.addf %165, %166 : vector<17x32xf32>
    %168 = arith.truncf %167 : vector<17x32xf32> to vector<17x32xbf16>
    %c0_51 = arith.constant 0 : index
    %c0_52 = arith.constant 0 : index
    %c0_53 = arith.constant 0 : index
    %169 = vector.load %arg7[%c0_51, %c0_52, %c0_53] : memref<2x32x4xbf16, #tpu.memory_space<vmem>>, vector<1x32x4xbf16>
    %170 = vector.shape_cast %169 : vector<1x32x4xbf16> to vector<32x4xbf16>
    %cst_54 = arith.constant dense<0.000000e+00> : vector<17x4xf32>
    %171 = tpu.matmul %168, %170, %cst_54 {dimension_numbers = #tpu.dot_dimension_numbers<[1], [0], [0], [1], [0, 0, 1, 1], [], []>} : vector<17x32xbf16>, vector<32x4xbf16>, vector<17x4xf32> -> vector<17x4xf32>
    %172 = vector.extract_strided_slice %141 {offsets = [0, 0], sizes = [1, 4], strides = [1, 1]} : vector<2x32xf32> to vector<1x4xf32>
    %173 = vector.broadcast %172 : vector<1x4xf32> to vector<17x4xf32>
    %174 = arith.addf %171, %173 : vector<17x4xf32>
    %cst_55 = arith.constant 5.000000e-01 : f32
    %175 = vector.broadcast %cst_55 : f32 to vector<17x4xf32>
    %176 = arith.mulf %175, %174 : vector<17x4xf32>
    %cst_56 = arith.constant 0.707106769 : f32
    %177 = vector.broadcast %cst_56 : f32 to vector<17x4xf32>
    %178 = arith.mulf %174, %177 : vector<17x4xf32>
    %cst_57 = arith.constant 0.000000e+00 : f32
    %179 = vector.broadcast %cst_57 : f32 to vector<17x4xf32>
    %180 = arith.cmpf oge, %178, %179 : vector<17x4xf32>
    %cst_58 = arith.constant 1.000000e+00 : f32
    %cst_59 = arith.constant -1.000000e+00 : f32
    %181 = vector.broadcast %cst_58 : f32 to vector<17x4xf32>
    %182 = vector.broadcast %cst_59 : f32 to vector<17x4xf32>
    %183 = arith.select %180, %181, %182 : vector<17x4xi1>, vector<17x4xf32>
    %184 = math.absf %178 : vector<17x4xf32>
    %cst_60 = arith.constant 0.327591091 : f32
    %185 = vector.broadcast %cst_60 : f32 to vector<17x4xf32>
    %186 = arith.mulf %185, %184 : vector<17x4xf32>
    %cst_61 = arith.constant 1.000000e+00 : f32
    %187 = vector.broadcast %cst_61 : f32 to vector<17x4xf32>
    %188 = arith.addf %187, %186 : vector<17x4xf32>
    %cst_62 = arith.constant 1.000000e+00 : f32
    %189 = vector.broadcast %cst_62 : f32 to vector<17x4xf32>
    %190 = arith.divf %189, %188 : vector<17x4xf32>
    %cst_63 = arith.constant 1.06140542 : f32
    %191 = vector.broadcast %cst_63 : f32 to vector<17x4xf32>
    %192 = arith.mulf %191, %190 : vector<17x4xf32>
    %cst_64 = arith.constant -1.45315206 : f32
    %193 = vector.broadcast %cst_64 : f32 to vector<17x4xf32>
    %194 = arith.addf %192, %193 : vector<17x4xf32>
    %195 = arith.mulf %194, %190 : vector<17x4xf32>
    %cst_65 = arith.constant 1.42141378 : f32
    %196 = vector.broadcast %cst_65 : f32 to vector<17x4xf32>
    %197 = arith.addf %195, %196 : vector<17x4xf32>
    %198 = arith.mulf %197, %190 : vector<17x4xf32>
    %cst_66 = arith.constant -0.284496725 : f32
    %199 = vector.broadcast %cst_66 : f32 to vector<17x4xf32>
    %200 = arith.addf %198, %199 : vector<17x4xf32>
    %201 = arith.mulf %200, %190 : vector<17x4xf32>
    %cst_67 = arith.constant 0.254829586 : f32
    %202 = vector.broadcast %cst_67 : f32 to vector<17x4xf32>
    %203 = arith.addf %201, %202 : vector<17x4xf32>
    %204 = arith.mulf %203, %190 : vector<17x4xf32>
    %cst_68 = arith.constant 0.000000e+00 : f32
    %205 = vector.broadcast %cst_68 : f32 to vector<17x4xf32>
    %206 = arith.subf %205, %184 : vector<17x4xf32>
    %207 = arith.mulf %206, %184 : vector<17x4xf32>
    %208 = math.exp %207 : vector<17x4xf32>
    %209 = arith.mulf %204, %208 : vector<17x4xf32>
    %cst_69 = arith.constant 1.000000e+00 : f32
    %210 = vector.broadcast %cst_69 : f32 to vector<17x4xf32>
    %211 = arith.subf %210, %209 : vector<17x4xf32>
    %212 = arith.mulf %183, %211 : vector<17x4xf32>
    %cst_70 = arith.constant 1.000000e+00 : f32
    %213 = vector.broadcast %cst_70 : f32 to vector<17x4xf32>
    %214 = arith.addf %213, %212 : vector<17x4xf32>
    %215 = arith.mulf %176, %214 : vector<17x4xf32>
    %216 = arith.truncf %215 : vector<17x4xf32> to vector<17x4xbf16>
    %c0_71 = arith.constant 0 : index
    %c0_72 = arith.constant 0 : index
    %c0_73 = arith.constant 0 : index
    %217 = vector.load %arg8[%c0_71, %c0_72, %c0_73] : memref<2x4x32xbf16, #tpu.memory_space<vmem>>, vector<1x4x32xbf16>
    %218 = vector.shape_cast %217 : vector<1x4x32xbf16> to vector<4x32xbf16>
    %cst_74 = arith.constant dense<0.000000e+00> : vector<17x32xf32>
    %219 = tpu.matmul %216, %218, %cst_74 {dimension_numbers = #tpu.dot_dimension_numbers<[1], [0], [0], [1], [0, 0, 1, 1], [], []>} : vector<17x4xbf16>, vector<4x32xbf16>, vector<17x32xf32> -> vector<17x32xf32>
    %220 = vector.extract_strided_slice %141 {offsets = [1, 0], sizes = [1, 32], strides = [1, 1]} : vector<2x32xf32> to vector<1x32xf32>
    %221 = vector.broadcast %220 : vector<1x32xf32> to vector<17x32xf32>
    %222 = arith.addf %219, %221 : vector<17x32xf32>
    %223 = arith.addf %222, %139 : vector<17x32xf32>
    %c1 = arith.constant 1 : index
    %c0_75 = arith.constant 0 : index
    %c0_76 = arith.constant 0 : index
    %224 = vector.load %arg6[%c1, %c0_75, %c0_76] : memref<2x4x32xf32, #tpu.memory_space<vmem>>, vector<1x4x32xf32>
    %225 = vector.shape_cast %224 : vector<1x4x32xf32> to vector<4x32xf32>
    %c1_77 = arith.constant 1 : index
    %c0_78 = arith.constant 0 : index
    %c0_79 = arith.constant 0 : index
    %226 = vector.load %arg4[%c1_77, %c0_78, %c0_79] : memref<2x32x128xbf16, #tpu.memory_space<vmem>>, vector<1x32x128xbf16>
    %227 = vector.shape_cast %226 : vector<1x32x128xbf16> to vector<32x128xbf16>
    %c1_80 = arith.constant 1 : index
    %c0_81 = arith.constant 0 : index
    %c0_82 = arith.constant 0 : index
    %228 = vector.load %arg5[%c1_80, %c0_81, %c0_82] : memref<2x1x128xf32, #tpu.memory_space<vmem>>, vector<1x1x128xf32>
    %229 = vector.shape_cast %228 : vector<1x1x128xf32> to vector<1x128xf32>
    %230 = vector.extract_strided_slice %225 {offsets = [0, 0], sizes = [1, 32], strides = [1, 1]} : vector<4x32xf32> to vector<1x32xf32>
    %231 = vector.extract_strided_slice %225 {offsets = [1, 0], sizes = [1, 32], strides = [1, 1]} : vector<4x32xf32> to vector<1x32xf32>
    %cst_83 = arith.constant dense<0.000000e+00> : vector<17xf32>
    %232 = vector.multi_reduction <add>, %223, %cst_83 [1] : vector<17x32xf32> to vector<17xf32>
    %233 = vector.shape_cast %232 : vector<17xf32> to vector<17x1xf32>
    %cst_84 = arith.constant 3.200000e+01 : f32
    %234 = vector.broadcast %cst_84 : f32 to vector<17x1xf32>
    %235 = arith.divf %233, %234 : vector<17x1xf32>
    %236 = arith.mulf %223, %223 : vector<17x32xf32>
    %cst_85 = arith.constant dense<0.000000e+00> : vector<17xf32>
    %237 = vector.multi_reduction <add>, %236, %cst_85 [1] : vector<17x32xf32> to vector<17xf32>
    %238 = vector.shape_cast %237 : vector<17xf32> to vector<17x1xf32>
    %cst_86 = arith.constant 3.200000e+01 : f32
    %239 = vector.broadcast %cst_86 : f32 to vector<17x1xf32>
    %240 = arith.divf %238, %239 : vector<17x1xf32>
    %241 = arith.mulf %235, %235 : vector<17x1xf32>
    %242 = arith.subf %240, %241 : vector<17x1xf32>
    %cst_87 = arith.constant 0.000000e+00 : f32
    %243 = vector.broadcast %cst_87 : f32 to vector<17x1xf32>
    %244 = arith.maximumf %242, %243 : vector<17x1xf32>
    %245 = vector.broadcast %235 : vector<17x1xf32> to vector<17x32xf32>
    %246 = arith.subf %223, %245 : vector<17x32xf32>
    %cst_88 = arith.constant 9.99999974E-6 : f32
    %247 = vector.broadcast %cst_88 : f32 to vector<17x1xf32>
    %248 = arith.addf %244, %247 : vector<17x1xf32>
    %249 = math.rsqrt %248 : vector<17x1xf32>
    %250 = vector.broadcast %249 : vector<17x1xf32> to vector<17x32xf32>
    %251 = arith.mulf %246, %250 : vector<17x32xf32>
    %252 = vector.broadcast %230 : vector<1x32xf32> to vector<17x32xf32>
    %253 = arith.mulf %251, %252 : vector<17x32xf32>
    %254 = vector.broadcast %231 : vector<1x32xf32> to vector<17x32xf32>
    %255 = arith.addf %253, %254 : vector<17x32xf32>
    %256 = arith.truncf %255 : vector<17x32xf32> to vector<17x32xbf16>
    %257 = vector.extract_strided_slice %227 {offsets = [0, 0], sizes = [32, 96], strides = [1, 1]} : vector<32x128xbf16> to vector<32x96xbf16>
    %cst_89 = arith.constant dense<0.000000e+00> : vector<17x96xf32>
    %258 = tpu.matmul %256, %257, %cst_89 {dimension_numbers = #tpu.dot_dimension_numbers<[1], [0], [0], [1], [0, 0, 1, 1], [], []>} : vector<17x32xbf16>, vector<32x96xbf16>, vector<17x96xf32> -> vector<17x96xf32>
    %259 = vector.extract_strided_slice %229 {offsets = [0, 0], sizes = [1, 96], strides = [1, 1]} : vector<1x128xf32> to vector<1x96xf32>
    %260 = vector.broadcast %259 : vector<1x96xf32> to vector<17x96xf32>
    %261 = arith.addf %258, %260 : vector<17x96xf32>
    %262 = vector.shape_cast %261 : vector<17x96xf32> to vector<1x17x96xf32>
    %263 = vector.extract_strided_slice %229 {offsets = [0, 96], sizes = [1, 32], strides = [1, 1]} : vector<1x128xf32> to vector<1x32xf32>
    %264 = vector.extract_strided_slice %262 {offsets = [0, 0, 0], sizes = [1, 17, 8], strides = [1, 1, 1]} : vector<1x17x96xf32> to vector<1x17x8xf32>
    %265 = arith.truncf %264 : vector<1x17x8xf32> to vector<1x17x8xbf16>
    %266 = vector.extract_strided_slice %262 {offsets = [0, 0, 32], sizes = [1, 17, 8], strides = [1, 1, 1]} : vector<1x17x96xf32> to vector<1x17x8xf32>
    %267 = arith.truncf %266 : vector<1x17x8xf32> to vector<1x17x8xbf16>
    %268 = vector.extract_strided_slice %262 {offsets = [0, 0, 64], sizes = [1, 17, 8], strides = [1, 1, 1]} : vector<1x17x96xf32> to vector<1x17x8xf32>
    %269 = arith.truncf %268 : vector<1x17x8xf32> to vector<1x17x8xbf16>
    "tpu.trace_start"() <{level = 10 : i32, message = "bqd,bkd->bqk"}> : () -> ()
    %cst_90 = arith.constant dense<0.000000e+00> : vector<1x17x17xf32>
    %270 = tpu.matmul %265, %267, %cst_90 {dimension_numbers = #tpu.dot_dimension_numbers<[2], [2], [1], [1], [0, 0, 0, 1, 1, 1], [0], [0]>} : vector<1x17x8xbf16>, vector<1x17x8xbf16>, vector<1x17x17xf32> -> vector<1x17x17xf32>
    "tpu.trace_stop"() : () -> ()
    %cst_91 = arith.constant dense<0xFF800000> : vector<1x17xf32>
    %271 = vector.multi_reduction <maximumf>, %270, %cst_91 [2] : vector<1x17x17xf32> to vector<1x17xf32>
    %272 = vector.shape_cast %271 : vector<1x17xf32> to vector<1x17x1xf32>
    %273 = vector.broadcast %272 : vector<1x17x1xf32> to vector<1x17x17xf32>
    %274 = arith.subf %270, %273 : vector<1x17x17xf32>
    %275 = math.exp %274 : vector<1x17x17xf32>
    %cst_92 = arith.constant dense<0.000000e+00> : vector<1x17xf32>
    %276 = vector.multi_reduction <add>, %275, %cst_92 [2] : vector<1x17x17xf32> to vector<1x17xf32>
    %277 = vector.shape_cast %276 : vector<1x17xf32> to vector<1x17x1xf32>
    %278 = arith.truncf %275 : vector<1x17x17xf32> to vector<1x17x17xbf16>
    "tpu.trace_start"() <{level = 10 : i32, message = "bqk,bkd->bqd"}> : () -> ()
    %cst_93 = arith.constant dense<0.000000e+00> : vector<1x17x8xf32>
    %279 = tpu.matmul %278, %269, %cst_93 {dimension_numbers = #tpu.dot_dimension_numbers<[2], [1], [1], [2], [0, 0, 0, 1, 1, 2], [0], [0]>} : vector<1x17x17xbf16>, vector<1x17x8xbf16>, vector<1x17x8xf32> -> vector<1x17x8xf32>
    "tpu.trace_stop"() : () -> ()
    %280 = vector.broadcast %277 : vector<1x17x1xf32> to vector<1x17x8xf32>
    %281 = arith.divf %279, %280 : vector<1x17x8xf32>
    %282 = vector.shape_cast %281 : vector<1x17x8xf32> to vector<17x8xf32>
    %283 = arith.truncf %282 : vector<17x8xf32> to vector<17x8xbf16>
    %284 = vector.extract_strided_slice %227 {offsets = [0, 96], sizes = [8, 32], strides = [1, 1]} : vector<32x128xbf16> to vector<8x32xbf16>
    %cst_94 = arith.constant dense<0.000000e+00> : vector<17x32xf32>
    %285 = tpu.matmul %283, %284, %cst_94 {dimension_numbers = #tpu.dot_dimension_numbers<[1], [0], [0], [1], [0, 0, 1, 1], [], []>} : vector<17x8xbf16>, vector<8x32xbf16>, vector<17x32xf32> -> vector<17x32xf32>
    %286 = vector.broadcast %263 : vector<1x32xf32> to vector<17x32xf32>
    %287 = arith.addf %286, %285 : vector<17x32xf32>
    %288 = vector.extract_strided_slice %262 {offsets = [0, 0, 8], sizes = [1, 17, 8], strides = [1, 1, 1]} : vector<1x17x96xf32> to vector<1x17x8xf32>
    %289 = arith.truncf %288 : vector<1x17x8xf32> to vector<1x17x8xbf16>
    %290 = vector.extract_strided_slice %262 {offsets = [0, 0, 40], sizes = [1, 17, 8], strides = [1, 1, 1]} : vector<1x17x96xf32> to vector<1x17x8xf32>
    %291 = arith.truncf %290 : vector<1x17x8xf32> to vector<1x17x8xbf16>
    %292 = vector.extract_strided_slice %262 {offsets = [0, 0, 72], sizes = [1, 17, 8], strides = [1, 1, 1]} : vector<1x17x96xf32> to vector<1x17x8xf32>
    %293 = arith.truncf %292 : vector<1x17x8xf32> to vector<1x17x8xbf16>
    "tpu.trace_start"() <{level = 10 : i32, message = "bqd,bkd->bqk"}> : () -> ()
    %cst_95 = arith.constant dense<0.000000e+00> : vector<1x17x17xf32>
    %294 = tpu.matmul %289, %291, %cst_95 {dimension_numbers = #tpu.dot_dimension_numbers<[2], [2], [1], [1], [0, 0, 0, 1, 1, 1], [0], [0]>} : vector<1x17x8xbf16>, vector<1x17x8xbf16>, vector<1x17x17xf32> -> vector<1x17x17xf32>
    "tpu.trace_stop"() : () -> ()
    %cst_96 = arith.constant dense<0xFF800000> : vector<1x17xf32>
    %295 = vector.multi_reduction <maximumf>, %294, %cst_96 [2] : vector<1x17x17xf32> to vector<1x17xf32>
    %296 = vector.shape_cast %295 : vector<1x17xf32> to vector<1x17x1xf32>
    %297 = vector.broadcast %296 : vector<1x17x1xf32> to vector<1x17x17xf32>
    %298 = arith.subf %294, %297 : vector<1x17x17xf32>
    %299 = math.exp %298 : vector<1x17x17xf32>
    %cst_97 = arith.constant dense<0.000000e+00> : vector<1x17xf32>
    %300 = vector.multi_reduction <add>, %299, %cst_97 [2] : vector<1x17x17xf32> to vector<1x17xf32>
    %301 = vector.shape_cast %300 : vector<1x17xf32> to vector<1x17x1xf32>
    %302 = arith.truncf %299 : vector<1x17x17xf32> to vector<1x17x17xbf16>
    "tpu.trace_start"() <{level = 10 : i32, message = "bqk,bkd->bqd"}> : () -> ()
    %cst_98 = arith.constant dense<0.000000e+00> : vector<1x17x8xf32>
    %303 = tpu.matmul %302, %293, %cst_98 {dimension_numbers = #tpu.dot_dimension_numbers<[2], [1], [1], [2], [0, 0, 0, 1, 1, 2], [0], [0]>} : vector<1x17x17xbf16>, vector<1x17x8xbf16>, vector<1x17x8xf32> -> vector<1x17x8xf32>
    "tpu.trace_stop"() : () -> ()
    %304 = vector.broadcast %301 : vector<1x17x1xf32> to vector<1x17x8xf32>
    %305 = arith.divf %303, %304 : vector<1x17x8xf32>
    %306 = vector.shape_cast %305 : vector<1x17x8xf32> to vector<17x8xf32>
    %307 = arith.truncf %306 : vector<17x8xf32> to vector<17x8xbf16>
    %308 = vector.extract_strided_slice %227 {offsets = [8, 96], sizes = [8, 32], strides = [1, 1]} : vector<32x128xbf16> to vector<8x32xbf16>
    %cst_99 = arith.constant dense<0.000000e+00> : vector<17x32xf32>
    %309 = tpu.matmul %307, %308, %cst_99 {dimension_numbers = #tpu.dot_dimension_numbers<[1], [0], [0], [1], [0, 0, 1, 1], [], []>} : vector<17x8xbf16>, vector<8x32xbf16>, vector<17x32xf32> -> vector<17x32xf32>
    %310 = arith.addf %287, %309 : vector<17x32xf32>
    %311 = vector.extract_strided_slice %262 {offsets = [0, 0, 16], sizes = [1, 17, 8], strides = [1, 1, 1]} : vector<1x17x96xf32> to vector<1x17x8xf32>
    %312 = arith.truncf %311 : vector<1x17x8xf32> to vector<1x17x8xbf16>
    %313 = vector.extract_strided_slice %262 {offsets = [0, 0, 48], sizes = [1, 17, 8], strides = [1, 1, 1]} : vector<1x17x96xf32> to vector<1x17x8xf32>
    %314 = arith.truncf %313 : vector<1x17x8xf32> to vector<1x17x8xbf16>
    %315 = vector.extract_strided_slice %262 {offsets = [0, 0, 80], sizes = [1, 17, 8], strides = [1, 1, 1]} : vector<1x17x96xf32> to vector<1x17x8xf32>
    %316 = arith.truncf %315 : vector<1x17x8xf32> to vector<1x17x8xbf16>
    "tpu.trace_start"() <{level = 10 : i32, message = "bqd,bkd->bqk"}> : () -> ()
    %cst_100 = arith.constant dense<0.000000e+00> : vector<1x17x17xf32>
    %317 = tpu.matmul %312, %314, %cst_100 {dimension_numbers = #tpu.dot_dimension_numbers<[2], [2], [1], [1], [0, 0, 0, 1, 1, 1], [0], [0]>} : vector<1x17x8xbf16>, vector<1x17x8xbf16>, vector<1x17x17xf32> -> vector<1x17x17xf32>
    "tpu.trace_stop"() : () -> ()
    %cst_101 = arith.constant dense<0xFF800000> : vector<1x17xf32>
    %318 = vector.multi_reduction <maximumf>, %317, %cst_101 [2] : vector<1x17x17xf32> to vector<1x17xf32>
    %319 = vector.shape_cast %318 : vector<1x17xf32> to vector<1x17x1xf32>
    %320 = vector.broadcast %319 : vector<1x17x1xf32> to vector<1x17x17xf32>
    %321 = arith.subf %317, %320 : vector<1x17x17xf32>
    %322 = math.exp %321 : vector<1x17x17xf32>
    %cst_102 = arith.constant dense<0.000000e+00> : vector<1x17xf32>
    %323 = vector.multi_reduction <add>, %322, %cst_102 [2] : vector<1x17x17xf32> to vector<1x17xf32>
    %324 = vector.shape_cast %323 : vector<1x17xf32> to vector<1x17x1xf32>
    %325 = arith.truncf %322 : vector<1x17x17xf32> to vector<1x17x17xbf16>
    "tpu.trace_start"() <{level = 10 : i32, message = "bqk,bkd->bqd"}> : () -> ()
    %cst_103 = arith.constant dense<0.000000e+00> : vector<1x17x8xf32>
    %326 = tpu.matmul %325, %316, %cst_103 {dimension_numbers = #tpu.dot_dimension_numbers<[2], [1], [1], [2], [0, 0, 0, 1, 1, 2], [0], [0]>} : vector<1x17x17xbf16>, vector<1x17x8xbf16>, vector<1x17x8xf32> -> vector<1x17x8xf32>
    "tpu.trace_stop"() : () -> ()
    %327 = vector.broadcast %324 : vector<1x17x1xf32> to vector<1x17x8xf32>
    %328 = arith.divf %326, %327 : vector<1x17x8xf32>
    %329 = vector.shape_cast %328 : vector<1x17x8xf32> to vector<17x8xf32>
    %330 = arith.truncf %329 : vector<17x8xf32> to vector<17x8xbf16>
    %331 = vector.extract_strided_slice %227 {offsets = [16, 96], sizes = [8, 32], strides = [1, 1]} : vector<32x128xbf16> to vector<8x32xbf16>
    %cst_104 = arith.constant dense<0.000000e+00> : vector<17x32xf32>
    %332 = tpu.matmul %330, %331, %cst_104 {dimension_numbers = #tpu.dot_dimension_numbers<[1], [0], [0], [1], [0, 0, 1, 1], [], []>} : vector<17x8xbf16>, vector<8x32xbf16>, vector<17x32xf32> -> vector<17x32xf32>
    %333 = arith.addf %310, %332 : vector<17x32xf32>
    %334 = vector.extract_strided_slice %262 {offsets = [0, 0, 24], sizes = [1, 17, 8], strides = [1, 1, 1]} : vector<1x17x96xf32> to vector<1x17x8xf32>
    %335 = arith.truncf %334 : vector<1x17x8xf32> to vector<1x17x8xbf16>
    %336 = vector.extract_strided_slice %262 {offsets = [0, 0, 56], sizes = [1, 17, 8], strides = [1, 1, 1]} : vector<1x17x96xf32> to vector<1x17x8xf32>
    %337 = arith.truncf %336 : vector<1x17x8xf32> to vector<1x17x8xbf16>
    %338 = vector.extract_strided_slice %262 {offsets = [0, 0, 88], sizes = [1, 17, 8], strides = [1, 1, 1]} : vector<1x17x96xf32> to vector<1x17x8xf32>
    %339 = arith.truncf %338 : vector<1x17x8xf32> to vector<1x17x8xbf16>
    "tpu.trace_start"() <{level = 10 : i32, message = "bqd,bkd->bqk"}> : () -> ()
    %cst_105 = arith.constant dense<0.000000e+00> : vector<1x17x17xf32>
    %340 = tpu.matmul %335, %337, %cst_105 {dimension_numbers = #tpu.dot_dimension_numbers<[2], [2], [1], [1], [0, 0, 0, 1, 1, 1], [0], [0]>} : vector<1x17x8xbf16>, vector<1x17x8xbf16>, vector<1x17x17xf32> -> vector<1x17x17xf32>
    "tpu.trace_stop"() : () -> ()
    %cst_106 = arith.constant dense<0xFF800000> : vector<1x17xf32>
    %341 = vector.multi_reduction <maximumf>, %340, %cst_106 [2] : vector<1x17x17xf32> to vector<1x17xf32>
    %342 = vector.shape_cast %341 : vector<1x17xf32> to vector<1x17x1xf32>
    %343 = vector.broadcast %342 : vector<1x17x1xf32> to vector<1x17x17xf32>
    %344 = arith.subf %340, %343 : vector<1x17x17xf32>
    %345 = math.exp %344 : vector<1x17x17xf32>
    %cst_107 = arith.constant dense<0.000000e+00> : vector<1x17xf32>
    %346 = vector.multi_reduction <add>, %345, %cst_107 [2] : vector<1x17x17xf32> to vector<1x17xf32>
    %347 = vector.shape_cast %346 : vector<1x17xf32> to vector<1x17x1xf32>
    %348 = arith.truncf %345 : vector<1x17x17xf32> to vector<1x17x17xbf16>
    "tpu.trace_start"() <{level = 10 : i32, message = "bqk,bkd->bqd"}> : () -> ()
    %cst_108 = arith.constant dense<0.000000e+00> : vector<1x17x8xf32>
    %349 = tpu.matmul %348, %339, %cst_108 {dimension_numbers = #tpu.dot_dimension_numbers<[2], [1], [1], [2], [0, 0, 0, 1, 1, 2], [0], [0]>} : vector<1x17x17xbf16>, vector<1x17x8xbf16>, vector<1x17x8xf32> -> vector<1x17x8xf32>
    "tpu.trace_stop"() : () -> ()
    %350 = vector.broadcast %347 : vector<1x17x1xf32> to vector<1x17x8xf32>
    %351 = arith.divf %349, %350 : vector<1x17x8xf32>
    %352 = vector.shape_cast %351 : vector<1x17x8xf32> to vector<17x8xf32>
    %353 = arith.truncf %352 : vector<17x8xf32> to vector<17x8xbf16>
    %354 = vector.extract_strided_slice %227 {offsets = [24, 96], sizes = [8, 32], strides = [1, 1]} : vector<32x128xbf16> to vector<8x32xbf16>
    %cst_109 = arith.constant dense<0.000000e+00> : vector<17x32xf32>
    %355 = tpu.matmul %353, %354, %cst_109 {dimension_numbers = #tpu.dot_dimension_numbers<[1], [0], [0], [1], [0, 0, 1, 1], [], []>} : vector<17x8xbf16>, vector<8x32xbf16>, vector<17x32xf32> -> vector<17x32xf32>
    %356 = arith.addf %333, %355 : vector<17x32xf32>
    %357 = arith.addf %356, %223 : vector<17x32xf32>
    %c1_110 = arith.constant 1 : index
    %c0_111 = arith.constant 0 : index
    %c0_112 = arith.constant 0 : index
    %358 = vector.load %arg9[%c1_110, %c0_111, %c0_112] : memref<2x2x32xf32, #tpu.memory_space<vmem>>, vector<1x2x32xf32>
    %359 = vector.shape_cast %358 : vector<1x2x32xf32> to vector<2x32xf32>
    %360 = vector.extract_strided_slice %225 {offsets = [2, 0], sizes = [1, 32], strides = [1, 1]} : vector<4x32xf32> to vector<1x32xf32>
    %361 = vector.extract_strided_slice %225 {offsets = [3, 0], sizes = [1, 32], strides = [1, 1]} : vector<4x32xf32> to vector<1x32xf32>
    %cst_113 = arith.constant dense<0.000000e+00> : vector<17xf32>
    %362 = vector.multi_reduction <add>, %357, %cst_113 [1] : vector<17x32xf32> to vector<17xf32>
    %363 = vector.shape_cast %362 : vector<17xf32> to vector<17x1xf32>
    %cst_114 = arith.constant 3.200000e+01 : f32
    %364 = vector.broadcast %cst_114 : f32 to vector<17x1xf32>
    %365 = arith.divf %363, %364 : vector<17x1xf32>
    %366 = arith.mulf %357, %357 : vector<17x32xf32>
    %cst_115 = arith.constant dense<0.000000e+00> : vector<17xf32>
    %367 = vector.multi_reduction <add>, %366, %cst_115 [1] : vector<17x32xf32> to vector<17xf32>
    %368 = vector.shape_cast %367 : vector<17xf32> to vector<17x1xf32>
    %cst_116 = arith.constant 3.200000e+01 : f32
    %369 = vector.broadcast %cst_116 : f32 to vector<17x1xf32>
    %370 = arith.divf %368, %369 : vector<17x1xf32>
    %371 = arith.mulf %365, %365 : vector<17x1xf32>
    %372 = arith.subf %370, %371 : vector<17x1xf32>
    %cst_117 = arith.constant 0.000000e+00 : f32
    %373 = vector.broadcast %cst_117 : f32 to vector<17x1xf32>
    %374 = arith.maximumf %372, %373 : vector<17x1xf32>
    %375 = vector.broadcast %365 : vector<17x1xf32> to vector<17x32xf32>
    %376 = arith.subf %357, %375 : vector<17x32xf32>
    %cst_118 = arith.constant 9.99999974E-6 : f32
    %377 = vector.broadcast %cst_118 : f32 to vector<17x1xf32>
    %378 = arith.addf %374, %377 : vector<17x1xf32>
    %379 = math.rsqrt %378 : vector<17x1xf32>
    %380 = vector.broadcast %379 : vector<17x1xf32> to vector<17x32xf32>
    %381 = arith.mulf %376, %380 : vector<17x32xf32>
    %382 = vector.broadcast %360 : vector<1x32xf32> to vector<17x32xf32>
    %383 = arith.mulf %381, %382 : vector<17x32xf32>
    %384 = vector.broadcast %361 : vector<1x32xf32> to vector<17x32xf32>
    %385 = arith.addf %383, %384 : vector<17x32xf32>
    %386 = arith.truncf %385 : vector<17x32xf32> to vector<17x32xbf16>
    %c1_119 = arith.constant 1 : index
    %c0_120 = arith.constant 0 : index
    %c0_121 = arith.constant 0 : index
    %387 = vector.load %arg7[%c1_119, %c0_120, %c0_121] : memref<2x32x4xbf16, #tpu.memory_space<vmem>>, vector<1x32x4xbf16>
    %388 = vector.shape_cast %387 : vector<1x32x4xbf16> to vector<32x4xbf16>
    %cst_122 = arith.constant dense<0.000000e+00> : vector<17x4xf32>
    %389 = tpu.matmul %386, %388, %cst_122 {dimension_numbers = #tpu.dot_dimension_numbers<[1], [0], [0], [1], [0, 0, 1, 1], [], []>} : vector<17x32xbf16>, vector<32x4xbf16>, vector<17x4xf32> -> vector<17x4xf32>
    %390 = vector.extract_strided_slice %359 {offsets = [0, 0], sizes = [1, 4], strides = [1, 1]} : vector<2x32xf32> to vector<1x4xf32>
    %391 = vector.broadcast %390 : vector<1x4xf32> to vector<17x4xf32>
    %392 = arith.addf %389, %391 : vector<17x4xf32>
    %cst_123 = arith.constant 5.000000e-01 : f32
    %393 = vector.broadcast %cst_123 : f32 to vector<17x4xf32>
    %394 = arith.mulf %393, %392 : vector<17x4xf32>
    %cst_124 = arith.constant 0.707106769 : f32
    %395 = vector.broadcast %cst_124 : f32 to vector<17x4xf32>
    %396 = arith.mulf %392, %395 : vector<17x4xf32>
    %cst_125 = arith.constant 0.000000e+00 : f32
    %397 = vector.broadcast %cst_125 : f32 to vector<17x4xf32>
    %398 = arith.cmpf oge, %396, %397 : vector<17x4xf32>
    %cst_126 = arith.constant 1.000000e+00 : f32
    %cst_127 = arith.constant -1.000000e+00 : f32
    %399 = vector.broadcast %cst_126 : f32 to vector<17x4xf32>
    %400 = vector.broadcast %cst_127 : f32 to vector<17x4xf32>
    %401 = arith.select %398, %399, %400 : vector<17x4xi1>, vector<17x4xf32>
    %402 = math.absf %396 : vector<17x4xf32>
    %cst_128 = arith.constant 0.327591091 : f32
    %403 = vector.broadcast %cst_128 : f32 to vector<17x4xf32>
    %404 = arith.mulf %403, %402 : vector<17x4xf32>
    %cst_129 = arith.constant 1.000000e+00 : f32
    %405 = vector.broadcast %cst_129 : f32 to vector<17x4xf32>
    %406 = arith.addf %405, %404 : vector<17x4xf32>
    %cst_130 = arith.constant 1.000000e+00 : f32
    %407 = vector.broadcast %cst_130 : f32 to vector<17x4xf32>
    %408 = arith.divf %407, %406 : vector<17x4xf32>
    %cst_131 = arith.constant 1.06140542 : f32
    %409 = vector.broadcast %cst_131 : f32 to vector<17x4xf32>
    %410 = arith.mulf %409, %408 : vector<17x4xf32>
    %cst_132 = arith.constant -1.45315206 : f32
    %411 = vector.broadcast %cst_132 : f32 to vector<17x4xf32>
    %412 = arith.addf %410, %411 : vector<17x4xf32>
    %413 = arith.mulf %412, %408 : vector<17x4xf32>
    %cst_133 = arith.constant 1.42141378 : f32
    %414 = vector.broadcast %cst_133 : f32 to vector<17x4xf32>
    %415 = arith.addf %413, %414 : vector<17x4xf32>
    %416 = arith.mulf %415, %408 : vector<17x4xf32>
    %cst_134 = arith.constant -0.284496725 : f32
    %417 = vector.broadcast %cst_134 : f32 to vector<17x4xf32>
    %418 = arith.addf %416, %417 : vector<17x4xf32>
    %419 = arith.mulf %418, %408 : vector<17x4xf32>
    %cst_135 = arith.constant 0.254829586 : f32
    %420 = vector.broadcast %cst_135 : f32 to vector<17x4xf32>
    %421 = arith.addf %419, %420 : vector<17x4xf32>
    %422 = arith.mulf %421, %408 : vector<17x4xf32>
    %cst_136 = arith.constant 0.000000e+00 : f32
    %423 = vector.broadcast %cst_136 : f32 to vector<17x4xf32>
    %424 = arith.subf %423, %402 : vector<17x4xf32>
    %425 = arith.mulf %424, %402 : vector<17x4xf32>
    %426 = math.exp %425 : vector<17x4xf32>
    %427 = arith.mulf %422, %426 : vector<17x4xf32>
    %cst_137 = arith.constant 1.000000e+00 : f32
    %428 = vector.broadcast %cst_137 : f32 to vector<17x4xf32>
    %429 = arith.subf %428, %427 : vector<17x4xf32>
    %430 = arith.mulf %401, %429 : vector<17x4xf32>
    %cst_138 = arith.constant 1.000000e+00 : f32
    %431 = vector.broadcast %cst_138 : f32 to vector<17x4xf32>
    %432 = arith.addf %431, %430 : vector<17x4xf32>
    %433 = arith.mulf %394, %432 : vector<17x4xf32>
    %434 = arith.truncf %433 : vector<17x4xf32> to vector<17x4xbf16>
    %c1_139 = arith.constant 1 : index
    %c0_140 = arith.constant 0 : index
    %c0_141 = arith.constant 0 : index
    %435 = vector.load %arg8[%c1_139, %c0_140, %c0_141] : memref<2x4x32xbf16, #tpu.memory_space<vmem>>, vector<1x4x32xbf16>
    %436 = vector.shape_cast %435 : vector<1x4x32xbf16> to vector<4x32xbf16>
    %cst_142 = arith.constant dense<0.000000e+00> : vector<17x32xf32>
    %437 = tpu.matmul %434, %436, %cst_142 {dimension_numbers = #tpu.dot_dimension_numbers<[1], [0], [0], [1], [0, 0, 1, 1], [], []>} : vector<17x4xbf16>, vector<4x32xbf16>, vector<17x32xf32> -> vector<17x32xf32>
    %438 = vector.extract_strided_slice %359 {offsets = [1, 0], sizes = [1, 32], strides = [1, 1]} : vector<2x32xf32> to vector<1x32xf32>
    %439 = vector.broadcast %438 : vector<1x32xf32> to vector<17x32xf32>
    %440 = arith.addf %437, %439 : vector<17x32xf32>
    %441 = arith.addf %440, %357 : vector<17x32xf32>
    %c0_143 = arith.constant 0 : index
    %c0_144 = arith.constant 0 : index
    %442 = vector.load %arg10[%c0_143, %c0_144] : memref<2x32xf32, #tpu.memory_space<vmem>>, vector<2x32xf32>
    %443 = vector.shape_cast %441 : vector<17x32xf32> to vector<1x17x32xf32>
    %444 = vector.extract_strided_slice %443 {offsets = [0, 0, 0], sizes = [1, 1, 32], strides = [1, 1, 1]} : vector<1x17x32xf32> to vector<1x1x32xf32>
    %445 = vector.shape_cast %444 : vector<1x1x32xf32> to vector<1x32xf32>
    %446 = vector.extract_strided_slice %442 {offsets = [0, 0], sizes = [1, 32], strides = [1, 1]} : vector<2x32xf32> to vector<1x32xf32>
    %447 = vector.extract_strided_slice %442 {offsets = [1, 0], sizes = [1, 32], strides = [1, 1]} : vector<2x32xf32> to vector<1x32xf32>
    %cst_145 = arith.constant dense<0.000000e+00> : vector<1xf32>
    %448 = vector.multi_reduction <add>, %445, %cst_145 [1] : vector<1x32xf32> to vector<1xf32>
    %449 = vector.shape_cast %448 : vector<1xf32> to vector<1x1xf32>
    %cst_146 = arith.constant 3.200000e+01 : f32
    %450 = vector.broadcast %cst_146 : f32 to vector<1x1xf32>
    %451 = arith.divf %449, %450 : vector<1x1xf32>
    %452 = arith.mulf %445, %445 : vector<1x32xf32>
    %cst_147 = arith.constant dense<0.000000e+00> : vector<1xf32>
    %453 = vector.multi_reduction <add>, %452, %cst_147 [1] : vector<1x32xf32> to vector<1xf32>
    %454 = vector.shape_cast %453 : vector<1xf32> to vector<1x1xf32>
    %cst_148 = arith.constant 3.200000e+01 : f32
    %455 = vector.broadcast %cst_148 : f32 to vector<1x1xf32>
    %456 = arith.divf %454, %455 : vector<1x1xf32>
    %457 = arith.mulf %451, %451 : vector<1x1xf32>
    %458 = arith.subf %456, %457 : vector<1x1xf32>
    %cst_149 = arith.constant 0.000000e+00 : f32
    %459 = vector.broadcast %cst_149 : f32 to vector<1x1xf32>
    %460 = arith.maximumf %458, %459 : vector<1x1xf32>
    %461 = vector.broadcast %451 : vector<1x1xf32> to vector<1x32xf32>
    %462 = arith.subf %445, %461 : vector<1x32xf32>
    %cst_150 = arith.constant 9.99999974E-6 : f32
    %463 = vector.broadcast %cst_150 : f32 to vector<1x1xf32>
    %464 = arith.addf %460, %463 : vector<1x1xf32>
    %465 = math.rsqrt %464 : vector<1x1xf32>
    %466 = vector.broadcast %465 : vector<1x1xf32> to vector<1x32xf32>
    %467 = arith.mulf %462, %466 : vector<1x32xf32>
    %468 = arith.mulf %467, %446 : vector<1x32xf32>
    %469 = arith.addf %468, %447 : vector<1x32xf32>
    %470 = arith.truncf %469 : vector<1x32xf32> to vector<1x32xbf16>
    %c0_151 = arith.constant 0 : index
    %c0_152 = arith.constant 0 : index
    %471 = vector.load %arg11[%c0_151, %c0_152] : memref<32x128xbf16, #tpu.memory_space<vmem>>, vector<32x128xbf16>
    %cst_153 = arith.constant dense<0.000000e+00> : vector<1x128xf32>
    %472 = tpu.matmul %470, %471, %cst_153 {dimension_numbers = #tpu.dot_dimension_numbers<[1], [0], [0], [1], [0, 0, 1, 1], [], []>} : vector<1x32xbf16>, vector<32x128xbf16>, vector<1x128xf32> -> vector<1x128xf32>
    %c0_154 = arith.constant 0 : index
    %c0_155 = arith.constant 0 : index
    %473 = vector.load %arg12[%c0_154, %c0_155] : memref<1x128xf32, #tpu.memory_space<vmem>>, vector<1x128xf32>
    %474 = arith.addf %472, %473 : vector<1x128xf32>
    %c0_156 = arith.constant 0 : index
    %c0_157 = arith.constant 0 : index
    %c0_158 = arith.constant 0 : index
    %475 = vector.load %arg13[%c0_156, %c0_157, %c0_158] : memref<1x1x128xf32, #tpu.memory_space<vmem>>, vector<1x1x128xf32>
    %476 = vector.shape_cast %475 : vector<1x1x128xf32> to vector<1x128xf32>
    %477 = vector.shape_cast %474 : vector<1x128xf32> to vector<1x1x128xf32>
    tpu.vector_store %arg13[%c0_156, %c0_157, %c0_158], %477 {strides = array<i32>} : memref<1x1x128xf32, #tpu.memory_space<vmem>>, vector<1x1x128xf32>,
    return
  }
  func.func @transform_0(%arg0: i32) -> (i32, i32, i32) {
    %c0_i32 = arith.constant 0 : i32
    %c0_i32_0 = arith.constant 0 : i32
    %c0_i32_1 = arith.constant 0 : i32
    return %arg0, %c0_i32, %c0_i32_0 : i32, i32, i32
  }
  func.func @transform_1(%arg0: i32) -> (i32, i32) {
    %c0_i32 = arith.constant 0 : i32
    %c0_i32_0 = arith.constant 0 : i32
    %c0_i32_1 = arith.constant 0 : i32
    return %c0_i32, %c0_i32_0 : i32, i32
  }
  func.func @transform_2(%arg0: i32) -> (i32, i32) {
    %c0_i32 = arith.constant 0 : i32
    %c0_i32_0 = arith.constant 0 : i32
    %c0_i32_1 = arith.constant 0 : i32
    return %c0_i32, %c0_i32_0 : i32, i32
  }
  func.func @transform_3(%arg0: i32) -> (i32, i32, i32) {
    %c0_i32 = arith.constant 0 : i32
    %c0_i32_0 = arith.constant 0 : i32
    %c0_i32_1 = arith.constant 0 : i32
    %c0_i32_2 = arith.constant 0 : i32
    return %c0_i32, %c0_i32_0, %c0_i32_1 : i32, i32, i32
  }
  func.func @transform_4(%arg0: i32) -> (i32, i32, i32) {
    %c0_i32 = arith.constant 0 : i32
    %c0_i32_0 = arith.constant 0 : i32
    %c0_i32_1 = arith.constant 0 : i32
    %c0_i32_2 = arith.constant 0 : i32
    return %c0_i32, %c0_i32_0, %c0_i32_1 : i32, i32, i32
  }
  func.func @transform_5(%arg0: i32) -> (i32, i32, i32) {
    %c0_i32 = arith.constant 0 : i32
    %c0_i32_0 = arith.constant 0 : i32
    %c0_i32_1 = arith.constant 0 : i32
    %c0_i32_2 = arith.constant 0 : i32
    return %c0_i32, %c0_i32_0, %c0_i32_1 : i32, i32, i32
  }
  func.func @transform_6(%arg0: i32) -> (i32, i32, i32) {
    %c0_i32 = arith.constant 0 : i32
    %c0_i32_0 = arith.constant 0 : i32
    %c0_i32_1 = arith.constant 0 : i32
    %c0_i32_2 = arith.constant 0 : i32
    return %c0_i32, %c0_i32_0, %c0_i32_1 : i32, i32, i32
  }
  func.func @transform_7(%arg0: i32) -> (i32, i32, i32) {
    %c0_i32 = arith.constant 0 : i32
    %c0_i32_0 = arith.constant 0 : i32
    %c0_i32_1 = arith.constant 0 : i32
    %c0_i32_2 = arith.constant 0 : i32
    return %c0_i32, %c0_i32_0, %c0_i32_1 : i32, i32, i32
  }
  func.func @transform_8(%arg0: i32) -> (i32, i32, i32) {
    %c0_i32 = arith.constant 0 : i32
    %c0_i32_0 = arith.constant 0 : i32
    %c0_i32_1 = arith.constant 0 : i32
    %c0_i32_2 = arith.constant 0 : i32
    return %c0_i32, %c0_i32_0, %c0_i32_1 : i32, i32, i32
  }
  func.func @transform_9(%arg0: i32) -> (i32, i32) {
    %c0_i32 = arith.constant 0 : i32
    %c0_i32_0 = arith.constant 0 : i32
    %c0_i32_1 = arith.constant 0 : i32
    return %c0_i32, %c0_i32_0 : i32, i32
  }
  func.func @transform_10(%arg0: i32) -> (i32, i32) {
    %c0_i32 = arith.constant 0 : i32
    %c0_i32_0 = arith.constant 0 : i32
    %c0_i32_1 = arith.constant 0 : i32
    return %c0_i32, %c0_i32_0 : i32, i32
  }
  func.func @transform_11(%arg0: i32) -> (i32, i32) {
    %c0_i32 = arith.constant 0 : i32
    %c0_i32_0 = arith.constant 0 : i32
    %c0_i32_1 = arith.constant 0 : i32
    return %c0_i32, %c0_i32_0 : i32, i32
  }
  func.func @transform_12(%arg0: i32) -> (i32, i32, i32) {
    %c0_i32 = arith.constant 0 : i32
    %c0_i32_0 = arith.constant 0 : i32
    %c0_i32_1 = arith.constant 0 : i32
    return %arg0, %c0_i32, %c0_i32_0 : i32, i32, i32
  }
}

</mosaic_0001>

<bundles_post_ra>
// kernel: vit_forward.1
= control target key start
LH: loop header
LB: loop body
LE: loop exit
PB: predicated region body
PF: predicated region fallthrough
CT: control target
= control target key end

     0   :  { %17 = vsyncpa [#allocation3], 0  ;;  %s5275_s0 = inlined_call_operand.vmem [shape: bf16[2,17,48], index: 0, kind: input, shape index: {}]   ;;  %s5276_s1 = inlined_call_operand.vmem [shape: bf16[48,32], index: 1, kind: input, shape index: {}]   ;;  %s5277_s2 = inlined_call_operand.vmem [shape: f32[17,32], index: 2, kind: input, shape index: {}]   ;;  %s5278_s3 = inlined_call_operand.vmem [shape: bf16[2,32,128], index: 3, kind: input, shape index: {}]   ;;  %s5279_s4 = inlined_call_operand.vmem [shape: f32[2,1,128], index: 4, kind: input, shape index: {}]   ;;  %s5280_s5 = inlined_call_operand.vmem [shape: f32[2,4,32], index: 5, kind: input, shape index: {}]   ;;  %s5281_s6 = inlined_call_operand.vmem [shape: bf16[2,32,4], index: 6, kind: input, shape index: {}]   ;;  %s5282_s7 = inlined_call_operand.vmem [shape: bf16[2,4,32], index: 7, kind: input, shape index: {}]   ;;  %s5283_s8 = inlined_call_operand.vmem [shape: f32[2,2,32], index: 8, kind: input, shape index: {}]   ;;  %s5284_s9 = inlined_call_operand.vmem [shape: f32[2,32], index: 9, kind: input, shape index: {}]   ;;  %s5285_s10 = inlined_call_operand.vmem [shape: bf16[32,128], index: 10, kind: input, shape index: {}]   ;;  %s5286_s11 = inlined_call_operand.vmem [shape: f32[1,128], index: 11, kind: input, shape index: {}]   ;;  %s5287_s12 = inlined_call_operand.hbm [shape: f32[2,1,128], index: 12, kind: output, shape index: {}]  }
   0x1   :  { %19 = vsyncpa [#allocation3 + $0x1], 0  ;;  %s4432_s21 = smov 0   ;;  %s4434_s22 = smov 0  }
   0x2   :  { %s4436_s23 = smov 0   ;;  %s4438_s24 = smov 0  }
   0x3 LB: > { %5307 = sst [smem:[#allocation5_spill]] %s4344_s23  ;;  %s4453_s25 = sadd.s32 4294967295, %s4348_s24   ;;  %s4348_s24 = sphi %s4438_s24, %s5324_s24   ;;  %s4344_s23 = sphi %s4436_s23, %s5321_s23   ;;  %s4340_s22 = sphi %s4434_s22, %s5323_s22   ;;  %s4336_s21 = sphi %s4432_s21, %s5322_s21  }
   0x4   : > { %s3571_s26 = sadd.s32 4294967294, %s4348_s24   ;;  %s4457_s27 = sadd.s32 1, %s4348_s24  }
   0x5   : > { %s289_s28 = sadd.s32 1, %s4344_s23  ;;  %s286_s29 = ssub.s32 %s4348_s24, %s4457_s27 }
   0x6   : > { %p299_p0 = scmp.ne.s32.totalorder %s4344_s23, %s4340_s22  ;;  %p287_p1 = scmp.eq.s32.totalorder %s286_s29, 0 }
   0x7   : > { %p300_p2 = scmp.eq.s32.totalorder %s4453_s25, 1  ;;  %p305_p3 = scmp.ne.s32.totalorder %s4340_s22, %s4336_s21 }
   0x8   : > { %p306_p4 = scmp.eq.s32.totalorder %s3571_s26, 1  ;;  %p3574_p7 = scmp.ge.s32.totalorder %s4348_s24, 1 }
   0x9   : > { %s4468_s30 = scalar_select %p287_p1, %s4344_s23, %s289_s28  }
   0xa   : > { %p4470_p5 = por %p300_p2, %p299_p0  ;;  %p4474_p6 = por %p306_p4, %p305_p3 }
   0xb   : > { %5308 = sst [smem:[#allocation6_spill]] %s4468_s30  ;;  %p365_p8 = scmp.lt.s32.totalorder %s4348_s24, 3 }
   0xd   : > { %p366_p9 = pnand %p3574_p7, %p365_p8 }
   0xe   : > { %v4117_v0 = vld [vmem:[%s5276_s1] sm:$0xff] (!%p366_p9)   ;;  %p406_p10 = scmp.lt.s32.totalorder (!%p366_p9), %s4453_s25, 1  ;;  %v4118_v1 = vld [vmem:[%s5276_s1 + $0x8] sm:$0xff] (!%p366_p9)   ;;  %vm450_vm0 = vcmask (!%p366_p9), 392192   ;;  %v4119_v2 = vld [vmem:[%s5276_s1 + $0x10] sm:$0xff] (!%p366_p9)   ;;  %vm518_vm1 = vcmask (!%p366_p9), 253952   ;;  %v562_v51 = vlaneseq (!%p366_p9) }
   0xf   : > { %369 = sbr.rel (%p366_p9) target bundleno = 6735 (0x1a4f), region = 68  ;;  %3797 = vmatprep.subr.bf16.mxu0 (!%p366_p9), %v4117_v0  ;;  %v423_v5 = vld [vmem:[%s5277_s2 + $0x10] sm:$0x1] (!%p366_p9)  ;;  %v421_v6 = vld [vmem:[%s5277_s2] sm:$0xff] (!%p366_p9)  ;;  %v422_v10 = vld [vmem:[%s5277_s2 + $0x8] sm:$0xff] (!%p366_p9)  ;;  %vm511_vm2 = vcmask (!%p366_p9), 261120  }
  0x10   : > { %3798 = vmatpush3.bf16.msra.mxu0 (!%p366_p9), %v4117_v0  ;;  %v4527_v24 = vld [vmem:[%s5278_s3] sm:$0xf] (!%p366_p9)  ;;  %v4532_v25 = vld [vmem:[%s5278_s3 + $0x4] sm:$0xf] (!%p366_p9)  ;;  %v4537_v26 = vld [vmem:[%s5278_s3 + $0x8] sm:$0xf] (!%p366_p9) }
  0x11   : > { %3799 = vmatprep.subr.bf16.mxu0 (!%p366_p9), %v4118_v1  ;;  %v3584_v27 = vcombine.low (!%p366_p9), %v4527_v24, %v4532_v25  ;;  %v4544_v28 = vld [vmem:[%s5278_s3 + $0xc] sm:$0xf] (!%p366_p9)  ;;  %v4548_v55 = vshrl.u32 (!%p366_p9), %v562_v51, 7  ;;  %v4556_v57 = vld [vmem:[%s5280_s5] sm:$0xf] (!%p366_p9)  ;;  %s4350_s30 = smov (!%p366_p9), 96  }
  0x12   : > { %v3585_v29 = vcombine.low (!%p366_p9), %v4537_v26, %v4544_v28  ;;  %vm658_vm3 = vcmask (!%p366_p9), 64512   ;;  %s4351_s26 = smov (!%p366_p9), 88   ;;  %vm726_vm4 = vcmask (!%p366_p9), 131072   ;;  %vm719_vm5 = vcmask (!%p366_p9), 138240   ;;  %s5305_s29 = smov (!%p366_p9), 64  }
  0x13   : > { %3807 = vmatprep.subr.bf16.mxu1 (!%p366_p9), %v3584_v27  ;;  %v4551_v56 = vsub.s32 (!%p366_p9), 0, %v4548_v55  ;;  %v4562_v62 = vsub.s32 (!%p366_p9), 1, %v4548_v55  ;;  %s5303_s15 = smov (!%p366_p9), 80   ;;  %s5299_s17 = smov (!%p366_p9), 32   ;;  %vm761_vm6 = vcmask (!%p366_p9), 1040384   ;;  %vm832_vm7 = vcmask (!%p366_p9), 1043456  }
  0x14   : > { %3800 = vmatpush3.bf16.msra.mxu0 (!%p366_p9), %v4118_v1  ;;  %3808 = vmatpush3.bf16.msra.mxu1 (!%p366_p9), %v3584_v27  ;;  %s5297_s18 = smov (!%p366_p9), 56   ;;  %s5293_s20 = smov (!%p366_p9), 104   ;;  %vm1912_vm8 = vcmask (!%p366_p9), 1041408   ;;  %vm1905_vm12 = vcmask (!%p366_p9), 31744  }
  0x15   : > { %3801 = vmatprep.subr.bf16.mxu0 (!%p366_p9), %v4119_v2  ;;  %3809 = vmatprep.subr.bf16.mxu1 (!%p366_p9), %v3585_v29  ;;  %v565_v61 = vrot.slane (!%p366_p9), %v4556_v57, %v4551_v56  ;;  %s5289_s23 = smov (!%p366_p9), 48  }
  0x16   : > { %s407_s19 = scalar_select %p406_p10, %s4453_s25, 1 }
  0x18   : > { %s4061_s28 = smul.u32 12, %s407_s19  ;;  %3802 = vmatpush3.bf16.msra.mxu0 %v4119_v2  ;;  %3810 = vmatpush3.bf16.msra.mxu1 %v3585_v29  ;;  %s5295_s19 = smov 72  }
  0x1a   : > { %s410_s16 = scalar_lea.vmem %s5275_s0, %s4061_s28  ;;  %s4352_s28 = smov 120  }
  0x1b   : > { %v4120_v3 = vld [vmem:[%s410_s16] sm:$0xff]   ;;  %v4121_v4 = vld [vmem:[%s410_s16 + $0x8] ss:$0 sps:$4 sm:$0x11]   ;;  %s5301_s16 = smov 112  }
  0x1c   : > { %3803 = vmatprep.mubr.msk.bf16.mxu0 %vm450_vm0, %v4120_v3 }
  0x1d   : > { %3804 = vmatmul.mubr.msk.bf16.vlgmr.msra.gmra.mrb[0].mxu0 %vm450_vm0, %v4121_v4  ;;  %vm4365_vm0 = vmmov 0  }
  0xf0   : > { %v3805_v7 = vpop.f32.mrb[0].mxu0 }
  0xf1   : > { %v4500_v8 = vadd.f32 %v3805_v7, %v423_v5  ;;  %v491_v9 = vpop.f32.mrb[1].mxu0 }
  0xf2   : > { %v4505_v11 = vadd.f32 %v491_v9, %v421_v6  ;;  %v3806_v12 = vpop.f32.mrb[2].mxu0  ;;  %v572_v6 = vrot.slane %v4556_v57, %v4562_v62 }
  0xf3   : > { %v494_v13 = vpop.f32.mrb[3].mxu0  ;;  %v519_v14 = vsel %vm518_vm1, %v4500_v8, 0.0  ;;  %v528_v19 = vmul.f32 %v4500_v8, %v4500_v8 }
  0xf4   : > { %v4509_v15 = vadd.f32 %v494_v13, %v422_v10  ;;  %520 = vadd.xlane.f32.xlu1 %v519_v14  ;;  %v512_v16 = vsel %vm511_vm2, %v4505_v11, 0.0  ;;  %v526_v17 = vmul.f32 %v4505_v11, %v4505_v11 }
  0xf5   : > { %513 = vadd.xlane.f32.xlu0 %v512_v16  ;;  %v535_v22 = vsel %vm518_vm1, %v528_v19, 0.0 }
  0xf6   : > { %v529_v18 = vsel %vm511_vm2, %v526_v17, 0.0  ;;  %v515_v20 = vsel %vm511_vm2, %v4509_v15, 0.0  ;;  %v527_v21 = vmul.f32 %v4509_v15, %v4509_v15  ;;  %v4573_v17 = vld [vmem:[%s5279_s4] ss:$0 sm:$0xff] }
  0xf8   : > { %530 = vadd.xlane.f32.xlu1 %v529_v18  ;;  %v532_v23 = vsel %vm511_vm2, %v527_v21, 0.0 }
  0xf9   : > { %516 = vadd.xlane.f32.xlu0 %v515_v20 }
  0xfc   : > { %536 = vadd.xlane.f32.xlu1 %v535_v22 }
  0xfd   : > { %533 = vadd.xlane.f32.xlu0 %v532_v23 }
 0x181   : > { %v521_v30 = vpop.xlane.xlu1 %520 }
 0x182   : > { %v514_v31 = vpop.xlane.xlu0 %513  ;;  %v525_v35 = vmul.f32 0.03125, %v521_v30 }
 0x183   : > { %v523_v32 = vmul.f32 0.03125, %v514_v31 }
 0x184   : > { %v543_v41 = vmul.f32 %v525_v35, %v525_v35  ;;  %v552_v63 = vsub.f32 %v4500_v8, %v525_v35 }
 0x185   : > { %v541_v33 = vmul.f32 %v523_v32, %v523_v32  ;;  %v531_v34 = vpop.xlane.xlu1 %530  ;;  %v550_v59 = vsub.f32 %v4505_v11, %v523_v32 }
 0x186   : > { %v538_v36 = vmul.f32 0.03125, %v531_v34  ;;  %v517_v37 = vpop.xlane.xlu0 %516 }
 0x187   : > { %v524_v38 = vmul.f32 0.03125, %v517_v37 }
 0x188   : > { %v544_v39 = vsub.f32 %v538_v36, %v541_v33 }
 0x189   : > { %v537_v40 = vpop.xlane.xlu1 %536  ;;  %v542_v45 = vmul.f32 %v524_v38, %v524_v38  ;;  %v551_v1 = vsub.f32 %v4509_v15, %v524_v38 }
 0x18a   : > { %v547_v42 = vmax.f32 %v544_v39, 0.0  ;;  %v540_v43 = vmul.f32 0.03125, %v537_v40  ;;  %v534_v44 = vpop.xlane.xlu0 %533 }
 0x18b   : > { %v539_v46 = vmul.f32 0.03125, %v534_v44 }
 0x18c   : > { %v553_v47 = vadd.f32 1e-05, %v547_v42  ;;  %v546_v48 = vsub.f32 %v540_v43, %v543_v41 }
 0x18d   : > { %v545_v49 = vsub.f32 %v539_v46, %v542_v45 }
 0x18e   : > { %4140 = vrsqrt.f32 %v553_v47  ;;  %v549_v50 = vmax.f32 %v546_v48, 0.0 }
 0x18f   : > { %v548_v52 = vmax.f32 %v545_v49, 0.0 }
 0x190   : > { %v555_v53 = vadd.f32 1e-05, %v549_v50 }
 0x191   : > { %v554_v54 = vadd.f32 1e-05, %v548_v52  ;;  %v3592_v52 = vcombine.low %v4527_v24, %v4527_v24 }
 0x192   : > { %4142 = vrsqrt.f32 %v555_v53 }
 0x193   : > { %4144 = vrsqrt.f32 %v554_v54 }
 0x198   : > { %v4141_v58 = vpop.eup %4140 }
 0x199   : > { %v559_v60 = vmul.f32 %v4141_v58, %v550_v59 }
 0x19b   : > { %v566_v5 = vmul.f32 %v565_v61, %v559_v60 }
 0x19c   : > { %v4143_v0 = vpop.eup %4142 }
 0x19d   : > { %v4145_v2 = vpop.eup %4144  ;;  %v561_v3 = vmul.f32 %v4143_v0, %v552_v63  ;;  %v573_v12 = vadd.f32 %v572_v6, %v566_v5 }
 0x19e   : > { %v560_v4 = vmul.f32 %v4145_v2, %v551_v1  ;;  %v4357_v2 = vmov 0  }
 0x19f   : > { %v568_v7 = vmul.f32 %v565_v61, %v561_v3  ;;  %v4638_v3 = vsel %vm761_vm6, 65535, %v4357_v2 }
 0x1a0   : > { %v567_v9 = vmul.f32 %v565_v61, %v560_v4 }
 0x1a1   : > { %v575_v10 = vadd.f32 %v572_v6, %v568_v7 }
 0x1a2   : > { %v574_v13 = vadd.f32 %v572_v6, %v567_v9 }
 0x1a3   : > { %v577_v16 = vpack.c.bf16 %v575_v10, %v575_v10 }
 0x1a4   : > { %v576_v14 = vpack.c.bf16 %v574_v13, %v573_v12 }
 0x1a6   : > { %3811 = vmatprep.mubr.msk.bf16.mxu1 %vm511_vm2, %v576_v14 }
 0x1a7   : > { %3812 = vmatmul.mubr.msk.bf16.vlgmr.msra.gmra.mrb[0].mxu1 %vm511_vm2, %v577_v16 }
 0x27a   : > { %v3813_v18 = vpop.f32.mrb[0].mxu1 }
 0x27b   : > { %v645_v19 = vadd.f32 %v3813_v18, %v4573_v17  ;;  %v636_v20 = vpop.f32.mrb[1].mxu1 }
 0x27c   : > { %v3814_v21 = vpop.f32.mrb[2].mxu1  ;;  %v637_v27 = vadd.f32 %v4573_v17, %v636_v20 }
 0x27d   : > { %v4576_v22 = vpack.c.bf16 %v645_v19, %v645_v19  ;;  %v639_v23 = vpop.f32.mrb[3].mxu1 }
 0x27e   : > { %v640_v29 = vadd.f32 %v4573_v17, %v639_v23 }
 0x27f   : > { %656 = vrot.lane.b32.xlu1 %v4576_v22, %s4350_s30 }
 0x280   : > { %v4582_v30 = vpack.c.bf16 %v640_v29, %v637_v27 }
 0x282   : > { %654 = vrot.lane.b32.xlu0 %v4582_v30, %s4350_s30  ;;  %3819 = vmatprep.mubr.msk.bf16.mxu1 %vm658_vm3, %v4582_v30 }
 0x283   : > { %903 = vrot.lane.b32.xlu1 %v4582_v30, %s4351_s26 }
 0x286   : > { %899 = vrot.lane.b32.xlu0 %v4582_v30, %s4352_s28 }
 0x287   : > { %905 = vrot.lane.b32.xlu1 %v4576_v22, %s4351_s26 }
 0x28b   : > { %901 = vrot.lane.b32.xlu1 %v4576_v22, %s4352_s28 }
 0x2f1   : > { %v657_v33 = vpop.permute.xlu1 %656 }
 0x2f2   : > { %v669_v34 = vsel %vm658_vm3, %v657_v33, 0 }
 0x2f4   : > { %v655_v31 = vpop.permute.xlu0 %654 }
 0x2f5   : > { %4035 = vmatprep.subr.msk.bf16.mxu1 %vm658_vm3, %v655_v31  ;;  %v666_v32 = vsel %vm658_vm3, %v655_v31, 0  ;;  %v904_v35 = vpop.permute.xlu1 %903 }
 0x2f6   : > { %3816 = vmatpush3.bf16.xpose.msra.mxu1 %v666_v32  ;;  %v914_v37 = vsel %vm658_vm3, %v904_v35, 0 }
 0x2f7   : > { %4036 = vmatprep.subr.msk.bf16.mxu1 %vm658_vm3, %v657_v33 }
 0x2f8   : > { %v900_v36 = vpop.permute.xlu0 %899 }
 0x2f9   : > { %v906_v38 = vpop.permute.xlu1 %905 }
 0x2fa   : > { %v917_v39 = vsel %vm658_vm3, %v906_v38, 0 }
 0x2fd   : > { %v902_v40 = vpop.permute.xlu1 %901 }
 0x2fe   : > { %3818 = vmatpush3.bf16.xpose.msra.mxu1 %v669_v34 }
 0x2ff   : > { %4038 = vmatprep.subr.msk.bf16.mxu1 %vm658_vm3, %v904_v35 }
 0x305   : > { %3820 = vmatmul.mubr.msk.bf16.vlgmr.msra.gmra.mrb[4].mxu1 %vm658_vm3, %v4576_v22 }
 0x306   : > { %3838 = vmatpush3.bf16.xpose.msra.mxu1 %v914_v37  ;;  %3841 = vmatprep.mubr.msk.bf16.mxu1 %vm658_vm3, %v900_v36 }
 0x307   : > { %4039 = vmatprep.subr.msk.bf16.mxu1 %vm658_vm3, %v906_v38 }
 0x30e   : > { %3840 = vmatpush3.bf16.xpose.msra.mxu1 %v917_v39 }
 0x315   : > { %3842 = vmatmul.mubr.msk.bf16.vlgmr.msra.gmra.mrb[8].mxu1 %vm658_vm3, %v902_v40 }
 0x3d8   : > { %v3821_v41 = vpop.f32.mrb[4].mxu1 }
 0x3d9   : > { %v705_v42 = vpop.f32.mrb[5].mxu1  ;;  %v727_v43 = vsel %vm726_vm4, %v3821_v41, -inf }
 0x3da   : > { %728 = vmax.xlane.f32.xlu0 %v727_v43  ;;  %v3822_v44 = vpop.f32.mrb[6].mxu1  ;;  %v720_v47 = vsel %vm719_vm5, %v705_v42, -inf }
 0x3db   : > { %v708_v45 = vpop.f32.mrb[7].mxu1 }
 0x3dc   : > { %v723_v46 = vsel %vm719_vm5, %v708_v45, -inf }
 0x3dd   : > { %724 = vmax.xlane.f32.xlu1 %v723_v46 }
 0x3de   : > { %721 = vmax.xlane.f32.xlu0 %v720_v47 }
 0x3e8   : > { %v4611_v48 = vpop.f32.mrb[8].mxu1 }
 0x3e9   : > { %v4613_v49 = vpop.f32.mrb[9].mxu1  ;;  %v973_v53 = vsel %vm726_vm4, %v4611_v48, -inf }
 0x3ea   : > { %v3844_v50 = vpop.f32.mrb[10].mxu1  ;;  %v967_v54 = vsel %vm719_vm5, %v4613_v49, -inf }
 0x3eb   : > { %v4615_v51 = vpop.f32.mrb[11].mxu1 }
 0x3ec   : > { %v970_v24 = vsel %vm719_vm5, %v4615_v51, -inf }
 0x3ee   : > { %752 = vrot.lane.b32.xlu1 %v4576_v22, %s5305_s29 }
 0x3f2   : > { %1145 = vrot.lane.b32.xlu1 %v4582_v30, %s5303_s15 }
 0x3f4   : > { %750 = vrot.lane.b32.xlu0 %v4582_v30, %s5305_s29  ;;  %s5317_s29 = smov 104  }
 0x3f6   : > { %1141 = vrot.lane.b32.xlu1 %v4582_v30, %s5301_s16 }
 0x3f8   : > { %1147 = vrot.lane.b32.xlu0 %v4576_v22, %s5303_s15  ;;  %s5318_s15 = smov 48  }
 0x3fa   : > { %824 = vrot.lane.b32.xlu1 %v3592_v52, %s5299_s17 }
 0x3fc   : > { %1143 = vrot.lane.b32.xlu0 %v4576_v22, %s5301_s16  ;;  %s5319_s16 = smov 40  }
 0x41b   : > { %974 = vmax.xlane.f32.xlu0 %v973_v53 }
 0x41e   : > { %971 = vmax.xlane.f32.xlu1 %v970_v24 }
 0x41f   : > { %968 = vmax.xlane.f32.xlu0 %v967_v54 }
 0x467   : > { %v729_v58 = vpop.xlane.xlu0 %728 }
 0x468   : > { %v732_v59 = vsub.f32 %v3821_v41, %v729_v58 }
 0x46a   : > { %v737_v60 = vmul.f32 1.442695, %v732_v59  ;;  %v725_v61 = vpop.xlane.xlu1 %724 }
 0x46b   : > { %v731_v63 = vsub.f32 %v708_v45, %v725_v61  ;;  %v722_v0 = vpop.xlane.xlu0 %721 }
 0x46c   : > { %4146 = vpow2.f32 %v737_v60  ;;  %v730_v1 = vsub.f32 %v705_v42, %v722_v0 }
 0x46d   : > { %v735_v4 = vmul.f32 1.442695, %v731_v63 }
 0x46e   : > { %v733_v5 = vmul.f32 1.442695, %v730_v1  ;;  %v753_v6 = vpop.permute.xlu1 %752 }
 0x46f   : > { %4148 = vpow2.f32 %v735_v4  ;;  %v765_v7 = vand.u32 %v4638_v3, %v753_v6  ;;  %v751_v9 = vpop.permute.xlu0 %750 }
 0x470   : > { %4150 = vpow2.f32 %v733_v5  ;;  %3823 = vmatprep.subr.bf16.mxu0 %v751_v9 }
 0x471   : > { %3824 = vmatpush3.bf16.msra.mxu0 %v751_v9 }
 0x472   : > { %3825 = vmatprep.subr.bf16.mxu0 %v765_v7  ;;  %v1146_v10 = vpop.permute.xlu1 %1145 }
 0x473   : > { %v1148_v12 = vpop.permute.xlu0 %1147  ;;  %4041 = vmatprep.subr.msk.bf16.mxu1 %vm658_vm3, %v1146_v10  ;;  %v1156_v13 = vsel %vm658_vm3, %v1146_v10, 0 }
 0x474   : > { %3860 = vmatpush3.bf16.xpose.msra.mxu1 %v1156_v13  ;;  %v1159_v29 = vsel %vm658_vm3, %v1148_v12, 0 }
 0x475   : > { %3826 = vmatpush3.bf16.msra.mxu0 %v765_v7  ;;  %4042 = vmatprep.subr.msk.bf16.mxu1 %vm658_vm3, %v1148_v12 }
 0x476   : > { %v4147_v14 = vpop.eup %4146  ;;  %v1142_v16 = vpop.permute.xlu1 %1141 }
 0x477   : > { %3863 = vmatprep.mubr.msk.bf16.mxu1 %vm658_vm3, %v1142_v16  ;;  %v745_v18 = vsel %vm726_vm4, %v4147_v14, 0.0  ;;  %v749_v31 = vpack.c.bf16 %v4147_v14, %v4147_v14  ;;  %v1144_v32 = vpop.permute.xlu0 %1143 }
 0x478   : > { %746 = vadd.xlane.f32.xlu0 %v745_v18 }
 0x479   : > { %v4149_v19 = vpop.eup %4148 }
 0x47a   : > { %v4151_v20 = vpop.eup %4150  ;;  %v742_v21 = vsel %vm719_vm5, %v4149_v19, 0.0  ;;  %v825_v33 = vpop.permute.xlu1 %824 }
 0x47b   : > { %v739_v23 = vsel %vm719_vm5, %v4151_v20, 0.0  ;;  %v748_v27 = vpack.c.bf16 %v4149_v19, %v4151_v20  ;;  %4037 = vmatprep.subr.msk.bf16.mxu0 %vm832_vm7, %v825_v33  ;;  %v834_v34 = vsel %vm832_vm7, %v825_v33, 0 }
 0x47c   : > { %740 = vadd.xlane.f32.xlu1 %v739_v23  ;;  %743 = vadd.xlane.f32.xlu0 %v742_v21 }
 0x47d   : > { %3862 = vmatpush3.bf16.xpose.msra.mxu1 %v1159_v29  ;;  %3827 = vmatprep.mubr.msk.bf16.mxu0 %vm719_vm5, %v748_v27 }
 0x47e   : > { %3828 = vmatmul.mubr.msk.bf16.vlgmr.msra.gmra.mrb[4].mxu0 %vm719_vm5, %v749_v31 }
 0x47f   : > { %3832 = vmatpush3.bf16.msra.mxu0 %v834_v34 }
 0x484   : > { %3864 = vmatmul.mubr.msk.bf16.vlgmr.msra.gmra.mrb[12].mxu1 %vm658_vm3, %v1144_v32  ;;  %v3599_v32 = vcombine.low %v4532_v25, %v4532_v25 }
 0x48d   : > { %998 = vrot.lane.b32.xlu1 %v4576_v22, %s5297_s18 }
 0x491   : > { %1387 = vrot.lane.b32.xlu1 %v4582_v30, %s5295_s19 }
 0x492   : > { %996 = vrot.lane.b32.xlu0 %v4582_v30, %s5297_s18  ;;  %s5313_s18 = smov 112  }
 0x495   : > { %1389 = vrot.lane.b32.xlu1 %v4576_v22, %s5295_s19  ;;  %s5314_s19 = smov 56  }
 0x496   : > { %1383 = vrot.lane.b32.xlu0 %v4582_v30, %s5293_s20 }
 0x499   : > { %1385 = vrot.lane.b32.xlu1 %v4576_v22, %s5293_s20  ;;  %s5315_s20 = smov 72  }
 0x4a8   : > { %v975_v35 = vpop.xlane.xlu0 %974 }
 0x4a9   : > { %v978_v59 = vsub.f32 %v4611_v48, %v975_v35 }
 0x4ab   : > { %v972_v36 = vpop.xlane.xlu1 %971  ;;  %v983_v60 = vmul.f32 1.442695, %v978_v59 }
 0x4ac   : > { %v977_v37 = vsub.f32 %v4615_v51, %v972_v36  ;;  %v969_v38 = vpop.xlane.xlu0 %968 }
 0x4ad   : > { %v976_v39 = vsub.f32 %v4613_v49, %v969_v38 }
 0x4ae   : > { %v981_v40 = vmul.f32 1.442695, %v977_v37 }
 0x4af   : > { %v979_v41 = vmul.f32 1.442695, %v976_v39 }
 0x4b0   : > { %4152 = vpow2.f32 %v981_v40 }
 0x4b1   : > { %4154 = vpow2.f32 %v979_v41 }
 0x4ba   : > { %v4668_v42 = vpop.eup %4152 }
 0x4bb   : > { %v4155_v43 = vpop.eup %4154  ;;  %v988_v33 = vsel %vm719_vm5, %v4668_v42, 0.0 }
 0x4bc   : > { %v994_v44 = vpack.c.bf16 %v4668_v42, %v4155_v43  ;;  %v985_v31 = vsel %vm719_vm5, %v4155_v43, 0.0 }
 0x505   : > { %v747_v45 = vpop.xlane.xlu0 %746 }
 0x506   : > { %4156 = vrcp.f32 %v747_v45 }
 0x509   : > { %v744_v46 = vpop.xlane.xlu0 %743  ;;  %v741_v47 = vpop.xlane.xlu1 %740 }
 0x50a   : > { %4158 = vrcp.f32 %v744_v46 }
 0x50b   : > { %4160 = vrcp.f32 %v741_v47 }
 0x50c   : > { %4162 = vpow2.f32 %v983_v60 }
 0x50d   : > { %v997_v50 = vpop.permute.xlu0 %996  ;;  %v999_v52 = vpop.permute.xlu1 %998 }
 0x50e   : > { %3845 = vmatprep.subr.bf16.mxu0 %v997_v50  ;;  %v1008_v19 = vand.u32 %v999_v52, %v4638_v3 }
 0x510   : > { %v4157_v63 = vpop.eup %4156 }
 0x511   : > { %v1384_v53 = vpop.permute.xlu0 %1383  ;;  %v1388_v51 = vpop.permute.xlu1 %1387 }
 0x512   : > { %4044 = vmatprep.subr.msk.bf16.mxu1 %vm658_vm3, %v1388_v51  ;;  %3885 = vmatprep.mubr.msk.bf16.mxu1 %vm658_vm3, %v1384_v53  ;;  %v1398_v49 = vsel %vm658_vm3, %v1388_v51, 0 }
 0x513   : > { %3882 = vmatpush3.bf16.xpose.msra.mxu1 %v1398_v49 }
 0x514   : > { %v4159_v1 = vpop.eup %4158 }
 0x515   : > { %v1390_v24 = vpop.permute.xlu1 %1389  ;;  %v4161_v4 = vpop.eup %4160 }
 0x516   : > { %4045 = vmatprep.subr.msk.bf16.mxu1 %vm658_vm3, %v1390_v24  ;;  %v1401_v54 = vsel %vm658_vm3, %v1390_v24, 0  ;;  %v4163_v21 = vpop.eup %4162 }
 0x517   : > { %v995_v27 = vpack.c.bf16 %v4163_v21, %v4163_v21  ;;  %v991_v29 = vsel %vm726_vm4, %v4163_v21, 0.0 }
 0x519   : > { %v1386_v58 = vpop.permute.xlu1 %1385 }
 0x51b   : > { %3884 = vmatpush3.bf16.xpose.msra.mxu1 %v1401_v54 }
 0x522   : > { %3886 = vmatmul.mubr.msk.bf16.vlgmr.msra.gmra.mrb[16].mxu1 %vm658_vm3, %v1386_v58 }
 0x551   : > { %v3829_v61 = vpop.f32.mrb[4].mxu0 }
 0x552   : > { %v801_v0 = vpop.f32.mrb[5].mxu0  ;;  %v820_v5 = vmul.f32 %v4157_v63, %v3829_v61 }
 0x553   : > { %v3830_v2 = vpop.f32.mrb[6].mxu0  ;;  %v816_v7 = vmul.f32 %v4161_v4, %v801_v0  ;;  %v3606_v0 = vcombine.low %v4537_v26, %v4537_v26 }
 0x554   : > { %v804_v6 = vpop.f32.mrb[7].mxu0  ;;  %v822_v13 = vpack.c.bf16 %v820_v5, %v820_v5 }
 0x555   : > { %v818_v9 = vmul.f32 %v4159_v1, %v804_v6 }
 0x557   : > { %v821_v10 = vpack.c.bf16 %v818_v9, %v816_v7  ;;  %v3865_v12 = vpop.f32.mrb[12].mxu1 }
 0x558   : > { %v1195_v14 = vpop.f32.mrb[13].mxu1  ;;  %v1215_v16 = vsel %vm726_vm4, %v3865_v12, -inf }
 0x559   : > { %1216 = vmax.xlane.f32.xlu1 %v1215_v16  ;;  %v3866_v48 = vpop.f32.mrb[14].mxu1  ;;  %v1209_v18 = vsel %vm719_vm5, %v1195_v14, -inf  ;;  %3833 = vmatprep.mubr.msk.bf16.mxu0 %vm658_vm3, %v821_v10 }
 0x55a   : > { %1210 = vmax.xlane.f32.xlu0 %v1209_v18  ;;  %v1198_v20 = vpop.f32.mrb[15].mxu1  ;;  %3834 = vmatmul.mubr.msk.bf16.vlgmr.msra.gmra.mrb[8].mxu0 %vm658_vm3, %v822_v13 }
 0x55b   : > { %3846 = vmatpush3.bf16.msra.mxu0 %v997_v50  ;;  %3849 = vmatprep.mubr.msk.bf16.mxu0 %vm719_vm5, %v994_v44  ;;  %v1212_v23 = vsel %vm719_vm5, %v1198_v20, -inf }
 0x55c   : > { %3847 = vmatprep.subr.bf16.mxu0 %v1008_v19 }
 0x55e   : > { %1213 = vmax.xlane.f32.xlu0 %v1212_v23 }
 0x55f   : > { %3848 = vmatpush3.bf16.msra.mxu0 %v1008_v19 }
 0x562   : > { %992 = vadd.xlane.f32.xlu0 %v991_v29  ;;  %3850 = vmatmul.mubr.msk.bf16.vlgmr.msra.gmra.mrb[12].mxu0 %vm719_vm5, %v995_v27 }
 0x566   : > { %986 = vadd.xlane.f32.xlu0 %v985_v31 }
 0x56a   : > { %1238 = vrot.lane.b32.xlu1 %v4582_v30, %s5289_s23 }
 0x57c   : > { %1067 = vrot.lane.b32.xlu0 %v3599_v32, %s5299_s17 }
 0x58e   : > { %989 = vadd.xlane.f32.xlu1 %v988_v33 }
 0x59f   : > { %1240 = vrot.lane.b32.xlu1 %v4576_v22, %s5289_s23  ;;  %s5291_s23 = smov 40  }
 0x5e6   : > { %v1217_v34 = vpop.xlane.xlu1 %1216 }
 0x5e7   : > { %v1211_v35 = vpop.xlane.xlu0 %1210  ;;  %v1220_v37 = vsub.f32 %v3865_v12, %v1217_v34 }
 0x5e8   : > { %v1218_v36 = vsub.f32 %v1195_v14, %v1211_v35 }
 0x5e9   : > { %v1225_v41 = vmul.f32 1.442695, %v1220_v37 }
 0x5ea   : > { %v1221_v38 = vmul.f32 1.442695, %v1218_v36  ;;  %v1239_v49 = vpop.permute.xlu1 %1238 }
 0x5eb   : > { %v1214_v39 = vpop.xlane.xlu0 %1213 }
 0x5ec   : > { %v1219_v40 = vsub.f32 %v1198_v20, %v1214_v39  ;;  %4164 = vpow2.f32 %v1221_v38 }
 0x5ee   : > { %v1223_v43 = vmul.f32 1.442695, %v1219_v40 }
 0x5ef   : > { %v993_v25 = vpop.xlane.xlu0 %992 }
 0x5f0   : > { %4166 = vpow2.f32 %v1223_v43 }
 0x5f1   : > { %4168 = vpow2.f32 %v1225_v41 }
 0x5f2   : > { %4170 = vrcp.f32 %v993_v25 }
 0x5f3   : > { %v987_v44 = vpop.xlane.xlu0 %986 }
 0x5f4   : > { %4172 = vrcp.f32 %v987_v44 }
 0x5f5   : > { %v4697_v45 = vpop.f32.mrb[16].mxu1 }
 0x5f6   : > { %v4699_v42 = vpop.f32.mrb[17].mxu1  ;;  %v4165_v51 = vpop.eup %4164  ;;  %v1457_v58 = vsel %vm726_vm4, %v4697_v45, -inf }
 0x5f7   : > { %v1068_v46 = vpop.permute.xlu0 %1067  ;;  %v3888_v47 = vpop.f32.mrb[18].mxu1  ;;  %v1451_v50 = vsel %vm719_vm5, %v4699_v42, -inf  ;;  %v1227_v5 = vsel %vm719_vm5, %v4165_v51, 0.0 }
 0x5f8   : > { %4040 = vmatprep.subr.msk.bf16.mxu0 %vm832_vm7, %v1068_v46  ;;  %v1076_v52 = vsel %vm832_vm7, %v1068_v46, 0  ;;  %1452 = vmax.xlane.f32.xlu0 %v1451_v50  ;;  %v1440_v53 = vpop.f32.mrb[19].mxu1 }
 0x5f9   : > { %3854 = vmatpush3.bf16.msra.mxu0 %v1076_v52  ;;  %v1454_v24 = vsel %vm719_vm5, %v1440_v53, -inf  ;;  %v3613_v52 = vcombine.low %v4544_v28, %v4544_v28 }
 0x5fa   : > { %v4167_v54 = vpop.eup %4166  ;;  %3867 = vmatprep.subr.bf16.mxu0 %v1239_v49  ;;  %1455 = vmax.xlane.f32.xlu1 %v1454_v24 }
 0x5fb   : > { %v1236_v59 = vpack.c.bf16 %v4167_v54, %v4165_v51  ;;  %v4169_v60 = vpop.eup %4168  ;;  %v1230_v63 = vsel %vm719_vm5, %v4167_v54, 0.0 }
 0x5fc   : > { %1458 = vmax.xlane.f32.xlu0 %v1457_v58  ;;  %v1233_v61 = vsel %vm726_vm4, %v4169_v60, 0.0  ;;  %v4171_v10 = vpop.eup %4170  ;;  %v1237_v27 = vpack.c.bf16 %v4169_v60, %v4169_v60 }
 0x5fe   : > { %v4173_v12 = vpop.eup %4172 }
 0x600   : > { %1234 = vadd.xlane.f32.xlu0 %v1233_v61 }
 0x604   : > { %1231 = vadd.xlane.f32.xlu0 %v1230_v63 }
 0x60b   : > { %1309 = vrot.lane.b32.xlu1 %v3606_v0, %s5299_s17 }
 0x61a   : > { %1480 = vrot.lane.b32.xlu0 %v4582_v30, %s5291_s23 }
 0x61b   : > { %v990_v1 = vpop.xlane.xlu1 %989 }
 0x61c   : > { %4174 = vrcp.f32 %v990_v1 }
 0x61f   : > { %v1241_v19 = vpop.permute.xlu1 %1240 }
 0x620   : > { %v1250_v23 = vand.u32 %v1241_v19, %v4638_v3 }
 0x626   : > { %v4175_v14 = vpop.eup %4174 }
 0x62d   : > { %v3835_v2 = vpop.f32.mrb[8].mxu0 }
 0x62e   : > { %v870_v4 = vpop.f32.mrb[9].mxu0 }
 0x62f   : > { %v3836_v6 = vpop.f32.mrb[10].mxu0  ;;  %1228 = vadd.xlane.f32.xlu1 %v1227_v5 }
 0x630   : > { %v873_v7 = vpop.f32.mrb[11].mxu0 }
 0x635   : > { %v3851_v9 = vpop.f32.mrb[12].mxu0 }
 0x636   : > { %v1044_v26 = vpop.f32.mrb[13].mxu0  ;;  %v1063_v16 = vmul.f32 %v4171_v10, %v3851_v9 }
 0x637   : > { %v3852_v13 = vpop.f32.mrb[14].mxu0  ;;  %v1059_v30 = vmul.f32 %v4173_v12, %v1044_v26 }
 0x638   : > { %v1047_v48 = vpop.f32.mrb[15].mxu0  ;;  %v1065_v21 = vpack.c.bf16 %v1063_v16, %v1063_v16 }
 0x639   : > { %v1061_v18 = vmul.f32 %v4175_v14, %v1047_v48 }
 0x63b   : > { %v1064_v20 = vpack.c.bf16 %v1061_v18, %v1059_v30 }
 0x63d   : > { %3855 = vmatprep.mubr.msk.bf16.mxu0 %vm658_vm3, %v1064_v20 }
 0x63e   : > { %3856 = vmatmul.mubr.msk.bf16.vlgmr.msra.gmra.mrb[16].mxu0 %vm658_vm3, %v1065_v21 }
 0x63f   : > { %3868 = vmatpush3.bf16.msra.mxu0 %v1239_v49  ;;  %3871 = vmatprep.mubr.msk.bf16.mxu0 %vm719_vm5, %v1236_v59 }
 0x640   : > { %3869 = vmatprep.subr.bf16.mxu0 %v1250_v23  ;;  %1482 = vrot.lane.b32.xlu1 %v4576_v22, %s5291_s23  ;;  %s5316_s23 = smov 32  }
 0x643   : > { %3870 = vmatpush3.bf16.msra.mxu0 %v1250_v23 }
 0x646   : > { %3872 = vmatmul.mubr.msk.bf16.vlgmr.msra.gmra.mrb[20].mxu0 %vm719_vm5, %v1237_v27 }
 0x685   : > { %v1453_v29 = vpop.xlane.xlu0 %1452 }
 0x686   : > { %v1460_v31 = vsub.f32 %v4699_v42, %v1453_v29 }
 0x687   : > { %v1456_v32 = vpop.xlane.xlu1 %1455 }
 0x688   : > { %v1463_v33 = vmul.f32 1.442695, %v1460_v31  ;;  %v1461_v34 = vsub.f32 %v1440_v53, %v1456_v32 }
 0x689   : > { %v1459_v35 = vpop.xlane.xlu0 %1458 }
 0x68a   : > { %4176 = vpow2.f32 %v1463_v33  ;;  %v1465_v36 = vmul.f32 1.442695, %v1461_v34  ;;  %v1462_v37 = vsub.f32 %v4697_v45, %v1459_v35 }
 0x68b   : > { %v1310_v38 = vpop.permute.xlu1 %1309 }
 0x68c   : > { %4178 = vpow2.f32 %v1465_v36  ;;  %v1467_v39 = vmul.f32 1.442695, %v1462_v37  ;;  %4043 = vmatprep.subr.msk.bf16.mxu0 %vm832_vm7, %v1310_v38  ;;  %v1318_v22 = vsel %vm832_vm7, %v1310_v38, 0 }
 0x68d   : > { %v1235_v40 = vpop.xlane.xlu0 %1234  ;;  %3876 = vmatpush3.bf16.msra.mxu0 %v1318_v22 }
 0x68e   : > { %4180 = vpow2.f32 %v1467_v39 }
 0x68f   : > { %4182 = vrcp.f32 %v1235_v40 }
 0x691   : > { %v1232_v41 = vpop.xlane.xlu0 %1231 }
 0x692   : > { %4184 = vrcp.f32 %v1232_v41 }
 0x694   : > { %v4177_v43 = vpop.eup %4176 }
 0x695   : > { %v1481_v25 = vpop.permute.xlu0 %1480  ;;  %v1469_v44 = vsel %vm719_vm5, %v4177_v43, 0.0 }
 0x696   : > { %v4179_v42 = vpop.eup %4178  ;;  %1470 = vadd.xlane.f32.xlu1 %v1469_v44  ;;  %3889 = vmatprep.subr.bf16.mxu0 %v1481_v25 }
 0x697   : > { %v1472_v45 = vsel %vm719_vm5, %v4179_v42, 0.0  ;;  %v1478_v46 = vpack.c.bf16 %v4179_v42, %v4177_v43 }
 0x698   : > { %v4181_v47 = vpop.eup %4180  ;;  %1473 = vadd.xlane.f32.xlu0 %v1472_v45 }
 0x699   : > { %v1475_v50 = vsel %vm726_vm4, %v4181_v47, 0.0  ;;  %v4183_v58 = vpop.eup %4182  ;;  %v1479_v26 = vpack.c.bf16 %v4181_v47, %v4181_v47 }
 0x69c   : > { %1476 = vadd.xlane.f32.xlu0 %v1475_v50 }
 0x6a7   : > { %1551 = vrot.lane.b32.xlu1 %v3613_v52, %s5299_s17 }
 0x6ab   : > { %891 = vrot.lane.b32.xlu1 %v3835_v2, %s4350_s30 }
 0x6af   : > { %889 = vrot.lane.b32.xlu1 %v873_v7, %s4350_s30 }
 0x6b2   : > { %1628 = vrot.lane.b32.xlu0 %v4505_v11, %s4350_s30  ;;  %v4185_v11 = vpop.eup %4184 }
 0x6b6   : > { %887 = vrot.lane.b32.xlu0 %v870_v4, %s4350_s30 }
 0x6bc   : > { %v1229_v53 = vpop.xlane.xlu1 %1228 }
 0x6bd   : > { %4186 = vrcp.f32 %v1229_v53 }
 0x6c0   : > { %v1483_v4 = vpop.permute.xlu1 %1482 }
 0x6c1   : > { %v1492_v7 = vand.u32 %v1483_v4, %v4638_v3 }
 0x6c7   : > { %v4187_v61 = vpop.eup %4186 }
 0x711   : > { %v3857_v51 = vpop.f32.mrb[16].mxu0 }
 0x712   : > { %1133 = vrot.lane.b32.xlu1 %v3857_v51, %s4350_s30  ;;  %v1112_v49 = vpop.f32.mrb[17].mxu0 }
 0x713   : > { %v3858_v28 = vpop.f32.mrb[18].mxu0 }
 0x714   : > { %v1115_v24 = vpop.f32.mrb[19].mxu0 }
 0x715   : > { %1131 = vrot.lane.b32.xlu0 %v1115_v24, %s4350_s30 }
 0x716   : > { %1129 = vrot.lane.b32.xlu1 %v1112_v49, %s4350_s30 }
 0x719   : > { %v3873_v54 = vpop.f32.mrb[20].mxu0 }
 0x71a   : > { %v1286_v59 = vpop.f32.mrb[21].mxu0  ;;  %v1305_v63 = vmul.f32 %v4183_v58, %v3873_v54 }
 0x71b   : > { %v3874_v60 = vpop.f32.mrb[22].mxu0  ;;  %v1301_v1 = vmul.f32 %v4187_v61, %v1286_v59 }
 0x71c   : > { %v1289_v0 = vpop.f32.mrb[23].mxu0  ;;  %v1307_v6 = vpack.c.bf16 %v1305_v63, %v1305_v63 }
 0x71d   : > { %v1303_v2 = vmul.f32 %v4185_v11, %v1289_v0 }
 0x71f   : > { %v1306_v5 = vpack.c.bf16 %v1303_v2, %v1301_v1 }
 0x721   : > { %3877 = vmatprep.mubr.msk.bf16.mxu0 %vm658_vm3, %v1306_v5 }
 0x722   : > { %3878 = vmatmul.mubr.msk.bf16.vlgmr.msra.gmra.mrb[24].mxu0 %vm658_vm3, %v1307_v6 }
 0x723   : > { %3890 = vmatpush3.bf16.msra.mxu0 %v1481_v25  ;;  %3893 = vmatprep.mubr.msk.bf16.mxu0 %vm719_vm5, %v1478_v46  ;;  %v1471_v9 = vpop.xlane.xlu1 %1470 }
 0x724   : > { %3891 = vmatprep.subr.bf16.mxu0 %v1492_v7  ;;  %4188 = vrcp.f32 %v1471_v9 }
 0x725   : > { %v1474_v13 = vpop.xlane.xlu0 %1473 }
 0x727   : > { %3892 = vmatpush3.bf16.msra.mxu0 %v1492_v7  ;;  %v1552_v10 = vpop.permute.xlu1 %1551 }
 0x728   : > { %4046 = vmatprep.subr.msk.bf16.mxu0 %vm832_vm7, %v1552_v10  ;;  %v1560_v12 = vsel %vm832_vm7, %v1552_v10, 0 }
 0x729   : > { %v1477_v14 = vpop.xlane.xlu0 %1476 }
 0x72a   : > { %3894 = vmatmul.mubr.msk.bf16.vlgmr.msra.gmra.mrb[28].mxu0 %vm719_vm5, %v1479_v26  ;;  %4190 = vrcp.f32 %v1477_v14 }
 0x72b   : > { %3898 = vmatpush3.bf16.msra.mxu0 %v1560_v12  ;;  %4192 = vrcp.f32 %v1474_v13  ;;  %v892_v40 = vpop.permute.xlu1 %891 }
 0x72c   : > { %v898_v53 = vadd.f32 %v4573_v17, %v892_v40 }
 0x72d   : > { %v1629_v41 = vpop.permute.xlu0 %1628 }
 0x72e   : > { %v4189_v20 = vpop.eup %4188 }
 0x72f   : > { %v890_v43 = vpop.permute.xlu1 %889 }
 0x731   : > { %v888_v25 = vpop.permute.xlu0 %887 }
 0x732   : > { %v896_v50 = vadd.f32 %v4573_v17, %v888_v25 }
 0x734   : > { %v4191_v23 = vpop.eup %4190 }
 0x735   : > { %v4193_v29 = vpop.eup %4192 }
 0x784   : > { %v1134_v44 = vpop.permute.xlu1 %1133 }
 0x785   : > { %v1140_v28 = vadd.f32 %v1134_v44, %v898_v53 }
 0x787   : > { %v1132_v42 = vpop.permute.xlu0 %1131 }
 0x788   : > { %v1130_v45 = vpop.permute.xlu1 %1129 }
 0x789   : > { %v1138_v49 = vadd.f32 %v1130_v45, %v896_v50 }
 0x7f5   : > { %v3879_v16 = vpop.f32.mrb[24].mxu0 }
 0x7f6   : > { %1375 = vrot.lane.b32.xlu0 %v3879_v16, %s4350_s30  ;;  %v1354_v48 = vpop.f32.mrb[25].mxu0 }
 0x7f7   : > { %v3880_v30 = vpop.f32.mrb[26].mxu0 }
 0x7f8   : > { %v1357_v18 = vpop.f32.mrb[27].mxu0 }
 0x7f9   : > { %1373 = vrot.lane.b32.xlu1 %v1357_v18, %s4350_s30 }
 0x7fa   : > { %1371 = vrot.lane.b32.xlu0 %v1354_v48, %s4350_s30 }
 0x7fd   : > { %v3895_v19 = vpop.f32.mrb[28].mxu0 }
 0x7fe   : > { %v1528_v21 = vpop.f32.mrb[29].mxu0  ;;  %v1547_v31 = vmul.f32 %v4191_v23, %v3895_v19 }
 0x7ff   : > { %v3896_v27 = vpop.f32.mrb[30].mxu0  ;;  %v1543_v33 = vmul.f32 %v4189_v20, %v1528_v21  ;;  %v1715_v21 = vsub.s32 2, %v4548_v55 }
 0x800   : > { %v1531_v32 = vpop.f32.mrb[31].mxu0  ;;  %v1549_v36 = vpack.c.bf16 %v1547_v31, %v1547_v31  ;;  %v1726_v27 = vsub.s32 3, %v4548_v55  ;;  %v4128_v31 = vld [vmem:[%s5281_s6] sm:$0xff]  }
 0x801   : > { %v1545_v34 = vmul.f32 %v4193_v29, %v1531_v32  ;;  %v1716_v23 = vrot.slane %v4556_v57, %v1715_v21  ;;  %v4129_v32 = vld [vmem:[%s5281_s6 + $0x8] sm:$0xff]   ;;  %3903 = vmatprep.subr.bf16.mxu1 %v4128_v31 }
 0x802   : > { %v1727_v29 = vrot.slane %v4556_v57, %v1726_v27  ;;  %3904 = vmatpush3.bf16.msra.mxu1 %v4128_v31 }
 0x803   : > { %v1548_v35 = vpack.c.bf16 %v1545_v34, %v1543_v33  ;;  %3905 = vmatprep.subr.bf16.mxu1 %v4129_v32 }
 0x805   : > { %3899 = vmatprep.mubr.msk.bf16.mxu0 %vm658_vm3, %v1548_v35 }
 0x806   : > { %3900 = vmatmul.mubr.msk.bf16.vlgmr.msra.gmra.mrb[32].mxu0 %vm658_vm3, %v1549_v36  ;;  %3906 = vmatpush3.bf16.msra.mxu1 %v4129_v32 }
 0x868   : > { %v1376_v46 = vpop.permute.xlu0 %1375 }
 0x869   : > { %v1382_v58 = vadd.f32 %v1376_v46, %v1140_v28 }
 0x86b   : > { %v1374_v47 = vpop.permute.xlu1 %1373 }
 0x86c   : > { %v1372_v52 = vpop.permute.xlu0 %1371 }
 0x86d   : > { %v1380_v24 = vadd.f32 %v1372_v52, %v1138_v49 }
 0x8d9   : > { %v3901_v37 = vpop.f32.mrb[32].mxu0 }
 0x8da   : > { %1617 = vrot.lane.b32.xlu1 %v3901_v37, %s4350_s30  ;;  %v1596_v38 = vpop.f32.mrb[33].mxu0 }
 0x8db   : > { %v3902_v39 = vpop.f32.mrb[34].mxu0 }
 0x8dc   : > { %v1599_v22 = vpop.f32.mrb[35].mxu0 }
 0x8dd   : > { %1615 = vrot.lane.b32.xlu0 %v1599_v22, %s4350_s30 }
 0x8de   : > { %1613 = vrot.lane.b32.xlu1 %v1596_v38, %s4350_s30 }
 0x8e1   : > { %1632 = vrot.lane.b32.xlu0 %v4500_v8, %s4350_s30  ;;  %v897_v8 = vadd.f32 %v4573_v17, %v890_v43 }
 0x8e2   : > { %1630 = vrot.lane.b32.xlu1 %v4509_v15, %s4350_s30 }
 0x8e3   : > { %v1139_v15 = vadd.f32 %v1132_v42, %v897_v8 }
 0x8e5   : > { %v1381_v11 = vadd.f32 %v1374_v47, %v1139_v15 }
 0x94c   : > { %v1618_v51 = vpop.permute.xlu1 %1617 }
 0x94d   : > { %v1624_v61 = vadd.f32 %v1618_v51, %v1382_v58 }
 0x94f   : > { %v1616_v54 = vpop.permute.xlu0 %1615 }
 0x950   : > { %v1614_v59 = vpop.permute.xlu1 %1613  ;;  %v1623_v63 = vadd.f32 %v1616_v54, %v1381_v11 }
 0x951   : > { %v1622_v60 = vadd.f32 %v1614_v59, %v1380_v24 }
 0x953   : > { %v1633_v0 = vpop.permute.xlu0 %1632  ;;  %v4765_v4 = vadd.f32 %v1629_v41, %v1622_v60 }
 0x954   : > { %v4763_v1 = vadd.f32 %v1633_v0, %v1624_v61  ;;  %v1631_v2 = vpop.permute.xlu1 %1630 }
 0x955   : > { %v4767_v5 = vadd.f32 %v1631_v2, %v1623_v63  ;;  %v1665_v17 = vmul.f32 %v4765_v4, %v4765_v4 }
 0x956   : > { %1648 = vrot.lane.b32.xlu1 %v4763_v1, %s5299_s17  ;;  %v1667_v7 = vmul.f32 %v4763_v1, %v4763_v1 }
 0x957   : > { %1646 = vrot.lane.b32.xlu0 %v4767_v5, %s5299_s17  ;;  %v1666_v6 = vmul.f32 %v4767_v5, %v4767_v5 }
 0x95a   : > { %1644 = vrot.lane.b32.xlu1 %v4765_v4, %s5299_s17 }
 0x95b   : > { %1671 = vrot.lane.b32.xlu0 %v1665_v17, %s5299_s17 }
 0x95e   : > { %1673 = vrot.lane.b32.xlu1 %v1666_v6, %s5299_s17 }
 0x95f   : > { %1675 = vrot.lane.b32.xlu0 %v1667_v7, %s5299_s17 }
 0x9c8   : > { %v4784_v9 = vpop.permute.xlu1 %1648 }
 0x9c9   : > { %v4786_v10 = vpop.permute.xlu0 %1646  ;;  %v1659_v26 = vsel %vm518_vm1, %v4784_v9, 0.0 }
 0x9ca   : > { %1660 = vadd.xlane.f32.xlu0 %v1659_v26  ;;  %v1656_v14 = vsel %vm511_vm2, %v4786_v10, 0.0 }
 0x9cc   : > { %v4790_v12 = vpop.permute.xlu1 %1644 }
 0x9cd   : > { %v1672_v13 = vpop.permute.xlu0 %1671  ;;  %v1653_v16 = vsel %vm511_vm2, %v4790_v12, 0.0 }
 0x9ce   : > { %1657 = vadd.xlane.f32.xlu0 %v1656_v14  ;;  %1654 = vadd.xlane.f32.xlu1 %v1653_v16  ;;  %v1680_v30 = vsel %vm511_vm2, %v1672_v13, 0.0 }
 0x9d0   : > { %v1674_v48 = vpop.permute.xlu1 %1673 }
 0x9d1   : > { %v1683_v18 = vsel %vm511_vm2, %v1674_v48, 0.0  ;;  %v1676_v19 = vpop.permute.xlu0 %1675 }
 0x9d2   : > { %1681 = vadd.xlane.f32.xlu0 %v1680_v30  ;;  %1684 = vadd.xlane.f32.xlu1 %v1683_v18  ;;  %v1686_v20 = vsel %vm518_vm1, %v1676_v19, 0.0  ;;  %v4830_v30 = vld [vmem:[%s5283_s8] sm:$0x3] }
 0x9d3   : > { %v1744_v18 = vrot.slane %v4830_v30, %v4551_v56 }
 0x9d6   : > { %1687 = vadd.xlane.f32.xlu0 %v1686_v20 }
 0x9e3   : > { %1718 = vrot.lane.b32.xlu1 %v1716_v23, %s4350_s30 }
 0x9ec   : > { %1729 = vrot.lane.b32.xlu0 %v1727_v29, %s4350_s30 }
 0xa57   : > { %v1661_v33 = vpop.xlane.xlu0 %1660 }
 0xa58   : > { %v1664_v57 = vmul.f32 0.03125, %v1661_v33 }
 0xa5a   : > { %v1694_v45 = vmul.f32 %v1664_v57, %v1664_v57  ;;  %v1703_v61 = vsub.f32 %v4763_v1, %v1664_v57  ;;  %v1900_v1 = vld [vmem:[%s5282_s7] sm:$0x3] }
 0xa5b   : > { %v1658_v34 = vpop.xlane.xlu0 %1657  ;;  %v1655_v35 = vpop.xlane.xlu1 %1654  ;;  %4047 = vmatprep.subr.msk.bf16.mxu0 %vm1912_vm8, %v1900_v1  ;;  %v1914_v48 = vsel %vm1912_vm8, %v1900_v1, 0 }
 0xa5c   : > { %v1663_v36 = vmul.f32 0.03125, %v1658_v34  ;;  %v1662_v37 = vmul.f32 0.03125, %v1655_v35  ;;  %3912 = vmatpush3.bf16.msra.mxu0 %v1914_v48 }
 0xa5e   : > { %v1693_v22 = vmul.f32 %v1663_v36, %v1663_v36  ;;  %v1692_v40 = vmul.f32 %v1662_v37, %v1662_v37  ;;  %v1701_v28 = vsub.f32 %v4765_v4, %v1662_v37  ;;  %v1702_v24 = vsub.f32 %v4767_v5, %v1663_v36 }
 0xa5f   : > { %v1682_v38 = vpop.xlane.xlu0 %1681  ;;  %v1685_v39 = vpop.xlane.xlu1 %1684 }
 0xa60   : > { %v1689_v41 = vmul.f32 0.03125, %v1682_v38  ;;  %v1690_v43 = vmul.f32 0.03125, %v1685_v39 }
 0xa62   : > { %v1695_v25 = vsub.f32 %v1689_v41, %v1692_v40  ;;  %v1696_v44 = vsub.f32 %v1690_v43, %v1693_v22 }
 0xa63   : > { %v1688_v42 = vpop.xlane.xlu0 %1687  ;;  %v1719_v54 = vpop.permute.xlu1 %1718 }
 0xa64   : > { %v1698_v46 = vmax.f32 %v1695_v25, 0.0  ;;  %v1699_v47 = vmax.f32 %v1696_v44, 0.0  ;;  %v1691_v50 = vmul.f32 0.03125, %v1688_v42 }
 0xa66   : > { %v1704_v52 = vadd.f32 1e-05, %v1698_v46  ;;  %v1705_v53 = vadd.f32 1e-05, %v1699_v47  ;;  %v1697_v51 = vsub.f32 %v1691_v50, %v1694_v45 }
 0xa67   : > { %v1730_v60 = vpop.permute.xlu0 %1729 }
 0xa68   : > { %4194 = vrsqrt.f32 %v1704_v52  ;;  %v1700_v8 = vmax.f32 %v1697_v51, 0.0 }
 0xa69   : > { %4196 = vrsqrt.f32 %v1705_v53 }
 0xa6a   : > { %v1706_v49 = vadd.f32 1e-05, %v1700_v8 }
 0xa6c   : > { %4198 = vrsqrt.f32 %v1706_v49 }
 0xa72   : > { %v4195_v15 = vpop.eup %4194 }
 0xa73   : > { %v4197_v58 = vpop.eup %4196  ;;  %v1710_v59 = vmul.f32 %v4195_v15, %v1701_v28 }
 0xa74   : > { %v1711_v11 = vmul.f32 %v4197_v58, %v1702_v24 }
 0xa75   : > { %v1721_v63 = vmul.f32 %v1719_v54, %v1710_v59 }
 0xa76   : > { %v4199_v0 = vpop.eup %4198  ;;  %v1722_v2 = vmul.f32 %v1719_v54, %v1711_v11 }
 0xa77   : > { %v1712_v17 = vmul.f32 %v4199_v0, %v1703_v61  ;;  %v1732_v6 = vadd.f32 %v1730_v60, %v1721_v63 }
 0xa78   : > { %v1733_v7 = vadd.f32 %v1730_v60, %v1722_v2 }
 0xa79   : > { %v1723_v26 = vmul.f32 %v1719_v54, %v1712_v17 }
 0xa7a   : > { %v1735_v13 = vpack.c.bf16 %v1733_v7, %v1732_v6 }
 0xa7b   : > { %v1734_v14 = vadd.f32 %v1730_v60, %v1723_v26 }
 0xa7c   : > { %1747 = vrot.lane.b32.xlu1 %v1735_v13, %s5299_s17 }
 0xa7d   : > { %v1736_v4 = vpack.c.bf16 %v1734_v14, %v1734_v14 }
 0xa80   : > { %1749 = vrot.lane.b32.xlu1 %v1736_v4, %s5299_s17 }
 0xaee   : > { %v1748_v5 = vpop.permute.xlu1 %1747 }
 0xaef   : > { %3907 = vmatprep.mubr.msk.bf16.mxu1 %vm511_vm2, %v1748_v5 }
 0xaf2   : > { %v1750_v16 = vpop.permute.xlu1 %1749 }
 0xaf3   : > { %3908 = vmatmul.mubr.msk.bf16.vlgmr.msra.gmra.mrb[20].mxu1 %vm511_vm2, %v1750_v16 }
 0xbc6   : > { %v3909_v19 = vpop.f32.mrb[20].mxu1 }
 0xbc7   : > { %v4834_v20 = vadd.f32 %v3909_v19, %v1744_v18  ;;  %v1803_v23 = vpop.f32.mrb[21].mxu1 }
 0xbc8   : > { %v4836_v29 = vadd.f32 %v1803_v23, %v1744_v18  ;;  %v3910_v31 = vpop.f32.mrb[22].mxu1 }
 0xbc9   : > { %v4839_v32 = vmul.f32 0.70710677, %v4834_v20  ;;  %v1806_v33 = vpop.f32.mrb[23].mxu1 }
 0xbca   : > { %v4842_v34 = vmul.f32 0.70710677, %v4836_v29  ;;  %v4844_v35 = vadd.f32 %v1806_v33, %v1744_v18 }
 0xbcb   : > { %v1831_v36 = vand.u32 2147483647, %v4839_v32  ;;  %vm1825_vm9 = vcmp.ge.f32.partialorder %v4839_v32, 0.0 }
 0xbcc   : > { %v1829_v37 = vand.u32 2147483647, %v4842_v34  ;;  %v4849_v38 = vmul.f32 0.70710677, %v4844_v35  ;;  %vm1823_vm10 = vcmp.ge.f32.partialorder %v4842_v34, 0.0 }
 0xbcd   : > { %v1834_v57 = vmul.f32 0.3275911, %v1831_v36  ;;  %v1873_v44 = vsub.f32 0.0, %v1831_v36 }
 0xbce   : > { %v1832_v39 = vmul.f32 0.3275911, %v1829_v37  ;;  %v1830_v40 = vand.u32 2147483647, %v4849_v38  ;;  %v1871_v42 = vsub.f32 0.0, %v1829_v37  ;;  %vm1824_vm11 = vcmp.ge.f32.partialorder %v4849_v38, 0.0 }
 0xbcf   : > { %v1837_v22 = vadd.f32 1.0, %v1834_v57  ;;  %v1876_v46 = vmul.f32 %v1873_v44, %v1831_v36 }
 0xbd0   : > { %v1835_v41 = vadd.f32 1.0, %v1832_v39  ;;  %v1833_v43 = vmul.f32 0.3275911, %v1830_v40  ;;  %v1872_v47 = vsub.f32 0.0, %v1830_v40  ;;  %v1874_v53 = vmul.f32 %v1871_v42, %v1829_v37 }
 0xbd1   : > { %4200 = vrcp.f32 %v1837_v22  ;;  %v1881_v28 = vmul.f32 1.442695, %v1876_v46 }
 0xbd2   : > { %4202 = vrcp.f32 %v1835_v41  ;;  %v1836_v25 = vadd.f32 1.0, %v1833_v43  ;;  %v1875_v24 = vmul.f32 %v1872_v47, %v1830_v40  ;;  %v1877_v58 = vmul.f32 1.442695, %v1874_v53 }
 0xbd3   : > { %v4363_v41 = vmov -1.0   ;;  %v1819_v53 = vmul.f32 0.5, %v4834_v20 }
 0xbd4   : > { %4204 = vrcp.f32 %v1836_v25  ;;  %v1879_v0 = vmul.f32 1.442695, %v1875_v24  ;;  %v1828_v43 = vsel %vm1825_vm9, 1.0, %v4363_v41  ;;  %v1826_v42 = vsel %vm1823_vm10, 1.0, %v4363_v41 }
 0xbd5   : > { %4206 = vpow2.f32 %v1881_v28 }
 0xbd6   : > { %4208 = vpow2.f32 %v1877_v58  ;;  %v1904_v58 = vrot.slane %v4830_v30, %v4562_v62 }
 0xbd7   : > { %4210 = vpow2.f32 %v1879_v0 }
 0xbdb   : > { %v4201_v45 = vpop.eup %4200 }
 0xbdc   : > { %v4203_v50 = vpop.eup %4202  ;;  %v1846_v52 = vmul.f32 1.0614054, %v4201_v45 }
 0xbdd   : > { %v1844_v51 = vmul.f32 1.0614054, %v4203_v50 }
 0xbde   : > { %v1849_v8 = vadd.f32 -1.4531521, %v1846_v52  ;;  %v4205_v49 = vpop.eup %4204 }
 0xbdf   : > { %v1847_v15 = vadd.f32 -1.4531521, %v1844_v51  ;;  %v1845_v59 = vmul.f32 1.0614054, %v4205_v49  ;;  %v4207_v23 = vpop.eup %4206  ;;  %v1817_v51 = vmul.f32 0.5, %v4836_v29 }
 0xbe0   : > { %v1852_v54 = vmul.f32 %v4201_v45, %v1849_v8  ;;  %v4209_v33 = vpop.eup %4208  ;;  %v1818_v8 = vmul.f32 0.5, %v4844_v35 }
 0xbe1   : > { %v1850_v11 = vmul.f32 %v4203_v50, %v1847_v15  ;;  %v1848_v61 = vadd.f32 -1.4531521, %v1845_v59  ;;  %v4211_v40 = vpop.eup %4210 }
 0xbe2   : > { %v1855_v60 = vadd.f32 1.4214138, %v1852_v54 }
 0xbe3   : > { %v1853_v63 = vadd.f32 1.4214138, %v1850_v11  ;;  %v1851_v17 = vmul.f32 %v4205_v49, %v1848_v61 }
 0xbe4   : > { %v1858_v2 = vmul.f32 %v4201_v45, %v1855_v60 }
 0xbe5   : > { %v1856_v6 = vmul.f32 %v4203_v50, %v1853_v63  ;;  %v1854_v26 = vadd.f32 1.4214138, %v1851_v17 }
 0xbe6   : > { %v1861_v7 = vadd.f32 -0.28449672, %v1858_v2 }
 0xbe7   : > { %v1859_v13 = vadd.f32 -0.28449672, %v1856_v6  ;;  %v1857_v4 = vmul.f32 %v4205_v49, %v1854_v26 }
 0xbe8   : > { %v1864_v14 = vmul.f32 %v4201_v45, %v1861_v7 }
 0xbe9   : > { %v1862_v5 = vmul.f32 %v4203_v50, %v1859_v13  ;;  %v1860_v1 = vadd.f32 -0.28449672, %v1857_v4  ;;  %v4897_v4 = vld [vmem:[%s5278_s3 + $0x14] sm:$0xf] }
 0xbea   : > { %v1867_v16 = vadd.f32 0.2548296, %v1864_v14  ;;  %v4892_v14 = vld [vmem:[%s5278_s3 + $0x10] sm:$0xf] }
 0xbeb   : > { %v1865_v48 = vadd.f32 0.2548296, %v1862_v5  ;;  %v1863_v19 = vmul.f32 %v4205_v49, %v1860_v1  ;;  %v3629_v5 = vcombine.low %v4892_v14, %v4897_v4  ;;  %v4909_v1 = vld [vmem:[%s5278_s3 + $0x1c] sm:$0xf] }
 0xbec   : > { %v1870_v18 = vmul.f32 %v4201_v45, %v1867_v16  ;;  %v4904_v16 = vld [vmem:[%s5278_s3 + $0x18] sm:$0xf] }
 0xbed   : > { %v1868_v31 = vmul.f32 %v4203_v50, %v1865_v48  ;;  %v1866_v37 = vadd.f32 0.2548296, %v1863_v19  ;;  %v1827_v50 = vsel %vm1824_vm11, 1.0, %v4363_v41  ;;  %3917 = vmatprep.subr.bf16.mxu1 %v3629_v5  ;;  %v3630_v48 = vcombine.low %v4904_v16, %v4909_v1 }
 0xbee   : > { %v1885_v36 = vmul.f32 %v4207_v23, %v1870_v18  ;;  %3918 = vmatpush3.bf16.msra.mxu1 %v3629_v5 }
 0xbef   : > { %v1883_v57 = vmul.f32 %v4209_v33, %v1868_v31  ;;  %v1869_v22 = vmul.f32 %v4205_v49, %v1866_v37  ;;  %3919 = vmatprep.subr.bf16.mxu1 %v3630_v48 }
 0xbf0   : > { %v1888_v39 = vsub.f32 1.0, %v1885_v36 }
 0xbf1   : > { %v1886_v25 = vsub.f32 1.0, %v1883_v57  ;;  %v1884_v45 = vmul.f32 %v4211_v40, %v1869_v22 }
 0xbf2   : > { %v1891_v44 = vmul.f32 %v1888_v39, %v1828_v43  ;;  %3920 = vmatpush3.bf16.msra.mxu1 %v3630_v48 }
 0xbf3   : > { %v1889_v46 = vmul.f32 %v1886_v25, %v1826_v42  ;;  %v1887_v32 = vsub.f32 1.0, %v1884_v45 }
 0xbf4   : > { %v1894_v47 = vadd.f32 1.0, %v1891_v44 }
 0xbf5   : > { %v1892_v34 = vadd.f32 1.0, %v1889_v46  ;;  %v1890_v52 = vmul.f32 %v1887_v32, %v1827_v50 }
 0xbf6   : > { %v1897_v28 = vmul.f32 %v1894_v47, %v1819_v53 }
 0xbf7   : > { %v1893_v49 = vadd.f32 1.0, %v1890_v52  ;;  %v1895_v15 = vmul.f32 %v1892_v34, %v1817_v51 }
 0xbf8   : > { %v1899_v54 = vpack.c.bf16 %v1897_v28, %v1897_v28 }
 0xbf9   : > { %v1896_v24 = vmul.f32 %v1893_v49, %v1818_v8  ;;  %v4916_v8 = vld [vmem:[%s5280_s5 + $0x4] sm:$0xf] }
 0xbfa   : > { %v2027_v28 = vrot.slane %v4916_v8, %v4551_v56 }
 0xbfb   : > { %v1898_v38 = vpack.c.bf16 %v1896_v24, %v1895_v15 }
 0xbfd   : > { %3913 = vmatprep.mubr.msk.bf16.mxu0 %vm1905_vm12, %v1898_v38 }
 0xbfe   : > { %3914 = vmatmul.mubr.msk.bf16.vlgmr.msra.gmra.mrb[36].mxu0 %vm1905_vm12, %v1899_v54 }
 0xcd1   : > { %v3915_v59 = vpop.f32.mrb[36].mxu0 }
 0xcd2   : > { %v1959_v20 = vadd.f32 %v3915_v59, %v1904_v58  ;;  %v1950_v11 = vpop.f32.mrb[37].mxu0 }
 0xcd3   : > { %v1951_v29 = vadd.f32 %v1950_v11, %v1904_v58  ;;  %v3916_v60 = vpop.f32.mrb[38].mxu0 }
 0xcd4   : > { %v4866_v35 = vadd.f32 %v1959_v20, %v4784_v9  ;;  %v1953_v61 = vpop.f32.mrb[39].mxu0  ;;  %v2034_v20 = vrot.slane %v4916_v8, %v4562_v62 }
 0xcd5   : > { %v4869_v63 = vadd.f32 %v1951_v29, %v4790_v12  ;;  %v1954_v0 = vadd.f32 %v1953_v61, %v1904_v58 }
 0xcd6   : > { %v1982_v2 = vsel %vm518_vm1, %v4866_v35, 0.0  ;;  %v1990_v26 = vmul.f32 %v4866_v35, %v4866_v35 }
 0xcd7   : > { %v4874_v17 = vadd.f32 %v1954_v0, %v4786_v10  ;;  %1983 = vadd.xlane.f32.xlu0 %v1982_v2  ;;  %v1976_v30 = vsel %vm511_vm2, %v4869_v63, 0.0  ;;  %v1988_v12 = vmul.f32 %v4869_v63, %v4869_v63 }
 0xcd8   : > { %1977 = vadd.xlane.f32.xlu1 %v1976_v30  ;;  %v1997_v13 = vsel %vm518_vm1, %v1990_v26, 0.0 }
 0xcd9   : > { %v1979_v9 = vsel %vm511_vm2, %v4874_v17, 0.0  ;;  %v1989_v6 = vmul.f32 %v4874_v17, %v4874_v17  ;;  %v1991_v10 = vsel %vm511_vm2, %v1988_v12, 0.0 }
 0xcdb   : > { %1980 = vadd.xlane.f32.xlu0 %v1979_v9  ;;  %v1994_v7 = vsel %vm511_vm2, %v1989_v6, 0.0 }
 0xcdc   : > { %1995 = vadd.xlane.f32.xlu1 %v1994_v7  ;;  %v4930_v7 = vld [vmem:[%s5279_s4 + $0x1] ss:$0 sm:$0xff] }
 0xcdf   : > { %1992 = vadd.xlane.f32.xlu0 %v1991_v10 }
 0xce3   : > { %1998 = vadd.xlane.f32.xlu0 %v1997_v13 }
 0xd64   : > { %v1984_v18 = vpop.xlane.xlu0 %1983 }
 0xd65   : > { %v1978_v19 = vpop.xlane.xlu1 %1977  ;;  %v1987_v22 = vmul.f32 0.03125, %v1984_v18 }
 0xd66   : > { %v1985_v31 = vmul.f32 0.03125, %v1978_v19 }
 0xd67   : > { %v2005_v46 = vmul.f32 %v1987_v22, %v1987_v22  ;;  %v2014_v11 = vsub.f32 %v4866_v35, %v1987_v22 }
 0xd68   : > { %v1981_v23 = vpop.xlane.xlu0 %1980  ;;  %v2003_v40 = vmul.f32 %v1985_v31, %v1985_v31  ;;  %v2012_v24 = vsub.f32 %v4869_v63, %v1985_v31 }
 0xd69   : > { %v1986_v33 = vmul.f32 0.03125, %v1981_v23  ;;  %v1996_v36 = vpop.xlane.xlu1 %1995 }
 0xd6a   : > { %v2001_v37 = vmul.f32 0.03125, %v1996_v36 }
 0xd6b   : > { %v2004_v57 = vmul.f32 %v1986_v33, %v1986_v33  ;;  %v2013_v49 = vsub.f32 %v4874_v17, %v1986_v33 }
 0xd6c   : > { %v1993_v39 = vpop.xlane.xlu0 %1992 }
 0xd6d   : > { %v2007_v43 = vsub.f32 %v2001_v37, %v2004_v57  ;;  %v2000_v25 = vmul.f32 0.03125, %v1993_v39 }
 0xd6f   : > { %v2010_v44 = vmax.f32 %v2007_v43, 0.0  ;;  %v2006_v42 = vsub.f32 %v2000_v25, %v2003_v40 }
 0xd70   : > { %v1999_v45 = vpop.xlane.xlu0 %1998 }
 0xd71   : > { %v2016_v32 = vadd.f32 1e-05, %v2010_v44  ;;  %v2009_v47 = vmax.f32 %v2006_v42, 0.0  ;;  %v2002_v50 = vmul.f32 0.03125, %v1999_v45 }
 0xd73   : > { %4212 = vrsqrt.f32 %v2016_v32  ;;  %v2015_v34 = vadd.f32 1e-05, %v2009_v47  ;;  %v2008_v52 = vsub.f32 %v2002_v50, %v2005_v46 }
 0xd75   : > { %4214 = vrsqrt.f32 %v2015_v34  ;;  %v2011_v53 = vmax.f32 %v2008_v52, 0.0 }
 0xd77   : > { %v2017_v51 = vadd.f32 1e-05, %v2011_v53 }
 0xd79   : > { %4216 = vrsqrt.f32 %v2017_v51 }
 0xd7d   : > { %v4213_v15 = vpop.eup %4212 }
 0xd7e   : > { %v2022_v38 = vmul.f32 %v4213_v15, %v2013_v49 }
 0xd7f   : > { %v4215_v54 = vpop.eup %4214 }
 0xd80   : > { %v2021_v58 = vmul.f32 %v4215_v54, %v2012_v24  ;;  %v2029_v59 = vmul.f32 %v2027_v28, %v2022_v38 }
 0xd82   : > { %v2028_v29 = vmul.f32 %v2027_v28, %v2021_v58  ;;  %v2036_v2 = vadd.f32 %v2034_v20, %v2029_v59 }
 0xd83   : > { %v4217_v60 = vpop.eup %4216 }
 0xd84   : > { %v2023_v61 = vmul.f32 %v4217_v60, %v2014_v11  ;;  %v2035_v0 = vadd.f32 %v2034_v20, %v2028_v29 }
 0xd86   : > { %v2038_v30 = vpack.c.bf16 %v2036_v2, %v2035_v0  ;;  %v2030_v9 = vmul.f32 %v2027_v28, %v2023_v61 }
 0xd88   : > { %3921 = vmatprep.mubr.msk.bf16.mxu1 %vm511_vm2, %v2038_v30  ;;  %v2037_v6 = vadd.f32 %v2034_v20, %v2030_v9 }
 0xd8a   : > { %v2039_v12 = vpack.c.bf16 %v2037_v6, %v2037_v6 }
 0xd8c   : > { %3922 = vmatmul.mubr.msk.bf16.vlgmr.msra.gmra.mrb[24].mxu1 %vm511_vm2, %v2039_v12 }
 0xe5f   : > { %v3923_v10 = vpop.f32.mrb[24].mxu1 }
 0xe60   : > { %v2107_v26 = vadd.f32 %v3923_v10, %v4930_v7  ;;  %v2098_v13 = vpop.f32.mrb[25].mxu1 }
 0xe61   : > { %v3924_v5 = vpop.f32.mrb[26].mxu1  ;;  %v2099_v19 = vadd.f32 %v4930_v7, %v2098_v13 }
 0xe62   : > { %v4933_v48 = vpack.c.bf16 %v2107_v26, %v2107_v26  ;;  %v2101_v18 = vpop.f32.mrb[27].mxu1 }
 0xe63   : > { %v2102_v23 = vadd.f32 %v4930_v7, %v2101_v18 }
 0xe64   : > { %2118 = vrot.lane.b32.xlu0 %v4933_v48, %s4350_s30 }
 0xe65   : > { %v4939_v31 = vpack.c.bf16 %v2102_v23, %v2099_v19 }
 0xe67   : > { %2116 = vrot.lane.b32.xlu1 %v4939_v31, %s4350_s30  ;;  %3929 = vmatprep.mubr.msk.bf16.mxu0 %vm658_vm3, %v4939_v31 }
 0xe68   : > { %2356 = vrot.lane.b32.xlu0 %v4933_v48, %s4352_s28 }
 0xe6b   : > { %2358 = vrot.lane.b32.xlu1 %v4939_v31, %s4351_s26 }
 0xe6f   : > { %2360 = vrot.lane.b32.xlu1 %v4933_v48, %s4351_s26  ;;  %s5311_s26 = smov 64  }
 0xe73   : > { %2354 = vrot.lane.b32.xlu1 %v4939_v31, %s4352_s28  ;;  %s5312_s28 = smov 80  }
 0xed6   : > { %v2119_v37 = vpop.permute.xlu0 %2118 }
 0xed7   : > { %v2130_v39 = vsel %vm658_vm3, %v2119_v37, 0 }
 0xed9   : > { %v2117_v33 = vpop.permute.xlu1 %2116 }
 0xeda   : > { %v2127_v36 = vsel %vm658_vm3, %v2117_v33, 0  ;;  %4048 = vmatprep.subr.msk.bf16.mxu0 %vm658_vm3, %v2117_v33  ;;  %v2357_v44 = vpop.permute.xlu0 %2356 }
 0xedb   : > { %3926 = vmatpush3.bf16.xpose.msra.mxu0 %v2127_v36 }
 0xedc   : > { %4049 = vmatprep.subr.msk.bf16.mxu0 %vm658_vm3, %v2119_v37 }
 0xedd   : > { %v2359_v57 = vpop.permute.xlu1 %2358 }
 0xede   : > { %v2369_v40 = vsel %vm658_vm3, %v2359_v57, 0 }
 0xee1   : > { %v2361_v22 = vpop.permute.xlu1 %2360 }
 0xee2   : > { %v2372_v25 = vsel %vm658_vm3, %v2361_v22, 0 }
 0xee3   : > { %3928 = vmatpush3.bf16.xpose.msra.mxu0 %v2130_v39  ;;  %v3637_v39 = vcombine.low %v4892_v14, %v4892_v14 }
 0xee4   : > { %4051 = vmatprep.subr.msk.bf16.mxu0 %vm658_vm3, %v2359_v57 }
 0xee5   : > { %v2355_v43 = vpop.permute.xlu1 %2354 }
 0xeea   : > { %3930 = vmatmul.mubr.msk.bf16.vlgmr.msra.gmra.mrb[40].mxu0 %vm658_vm3, %v4933_v48 }
 0xeeb   : > { %3948 = vmatpush3.bf16.xpose.msra.mxu0 %v2369_v40  ;;  %3951 = vmatprep.mubr.msk.bf16.mxu0 %vm658_vm3, %v2355_v43 }
 0xeec   : > { %4052 = vmatprep.subr.msk.bf16.mxu0 %vm658_vm3, %v2361_v22 }
 0xef3   : > { %3950 = vmatpush3.bf16.xpose.msra.mxu0 %v2372_v25 }
 0xefa   : > { %3952 = vmatmul.mubr.msk.bf16.vlgmr.msra.gmra.mrb[44].mxu0 %vm658_vm3, %v2357_v44 }
 0xfbd   : > { %v3931_v42 = vpop.f32.mrb[40].mxu0 }
 0xfbe   : > { %v2166_v45 = vpop.f32.mrb[41].mxu0  ;;  %v2186_v46 = vsel %vm726_vm4, %v3931_v42, -inf }
 0xfbf   : > { %2187 = vmax.xlane.f32.xlu0 %v2186_v46  ;;  %v3932_v32 = vpop.f32.mrb[42].mxu0  ;;  %v2180_v47 = vsel %vm719_vm5, %v2166_v45, -inf }
 0xfc0   : > { %2181 = vmax.xlane.f32.xlu1 %v2180_v47  ;;  %v2169_v50 = vpop.f32.mrb[43].mxu0 }
 0xfc1   : > { %v2183_v34 = vsel %vm719_vm5, %v2169_v50, -inf }
 0xfc3   : > { %2184 = vmax.xlane.f32.xlu0 %v2183_v34 }
 0xfcd   : > { %v4968_v52 = vpop.f32.mrb[44].mxu0 }
 0xfce   : > { %v4970_v53 = vpop.f32.mrb[45].mxu0  ;;  %v2428_v24 = vsel %vm726_vm4, %v4968_v52, -inf }
 0xfcf   : > { %v3954_v51 = vpop.f32.mrb[46].mxu0  ;;  %v2422_v28 = vsel %vm719_vm5, %v4970_v53, -inf }
 0xfd0   : > { %v4972_v49 = vpop.f32.mrb[47].mxu0 }
 0xfd1   : > { %2211 = vrot.lane.b32.xlu1 %v4933_v48, %s5311_s26  ;;  %v2425_v15 = vsel %vm719_vm5, %v4972_v49, -inf }
 0xfd5   : > { %2600 = vrot.lane.b32.xlu1 %v4939_v31, %s5312_s28 }
 0xfd9   : > { %2602 = vrot.lane.b32.xlu1 %v4933_v48, %s5312_s28  ;;  %2209 = vrot.lane.b32.xlu0 %v4939_v31, %s5311_s26  ;;  %s4366_s28 = smov [#allocation2]  }
 0xfdd   : > { %2598 = vrot.lane.b32.xlu1 %v4933_v48, %s5313_s18  ;;  %2596 = vrot.lane.b32.xlu0 %v4939_v31, %s5313_s18  ;;  %s404_s18 = sand.u32 1, %s4340_s22  }
 0xfde   : > { %s3504_s26 = scalar_lea.sflag [#allocation3], %s404_s18 }
 0xffc   : > { %2423 = vmax.xlane.f32.xlu0 %v2422_v28 }
0x1000   : > { %2426 = vmax.xlane.f32.xlu0 %v2425_v15 }
0x1001   : > { %2429 = vmax.xlane.f32.xlu1 %v2428_v24 }
0x1012   : > { %2451 = vrot.lane.b32.xlu1 %v4939_v31, %s5314_s19 }
0x104c   : > { %v2188_v38 = vpop.xlane.xlu0 %2187 }
0x104d   : > { %v2191_v54 = vsub.f32 %v3931_v42, %v2188_v38  ;;  %v2182_v58 = vpop.xlane.xlu1 %2181 }
0x104e   : > { %v2189_v59 = vsub.f32 %v2166_v45, %v2182_v58 }
0x104f   : > { %v2196_v20 = vmul.f32 1.442695, %v2191_v54 }
0x1050   : > { %v2192_v11 = vmul.f32 1.442695, %v2189_v59  ;;  %v2185_v29 = vpop.xlane.xlu0 %2184 }
0x1051   : > { %4218 = vpow2.f32 %v2196_v20  ;;  %v2190_v60 = vsub.f32 %v2169_v50, %v2185_v29  ;;  %v2212_v61 = vpop.permute.xlu1 %2211 }
0x1052   : > { %4220 = vpow2.f32 %v2192_v11  ;;  %v2221_v30 = vand.u32 %v2212_v61, %v4638_v3 }
0x1053   : > { %v2194_v0 = vmul.f32 1.442695, %v2190_v60 }
0x1054   : > { %v2210_v2 = vpop.permute.xlu0 %2209 }
0x1055   : > { %4222 = vpow2.f32 %v2194_v0  ;;  %v2601_v9 = vpop.permute.xlu1 %2600  ;;  %3933 = vmatprep.subr.bf16.mxu1 %v2210_v2 }
0x1056   : > { %v2611_v6 = vsel %vm658_vm3, %v2601_v9, 0  ;;  %3934 = vmatpush3.bf16.msra.mxu1 %v2210_v2  ;;  %4054 = vmatprep.subr.msk.bf16.mxu0 %vm658_vm3, %v2601_v9 }
0x1057   : > { %3935 = vmatprep.subr.bf16.mxu1 %v2221_v30  ;;  %3970 = vmatpush3.bf16.xpose.msra.mxu0 %v2611_v6 }
0x1058   : > { %v2597_v12 = vpop.permute.xlu0 %2596 }
0x1059   : > { %v2603_v10 = vpop.permute.xlu1 %2602  ;;  %3973 = vmatprep.mubr.msk.bf16.mxu0 %vm658_vm3, %v2597_v12 }
0x105a   : > { %3936 = vmatpush3.bf16.msra.mxu1 %v2221_v30  ;;  %4055 = vmatprep.subr.msk.bf16.mxu0 %vm658_vm3, %v2603_v10  ;;  %v2614_v18 = vsel %vm658_vm3, %v2603_v10, 0 }
0x105b   : > { %v4219_v26 = vpop.eup %4218 }
0x105c   : > { %v2204_v13 = vsel %vm726_vm4, %v4219_v26, 0.0  ;;  %v4221_v5 = vpop.eup %4220  ;;  %v2208_v37 = vpack.c.bf16 %v4219_v26, %v4219_v26 }
0x105d   : > { %2205 = vadd.xlane.f32.xlu0 %v2204_v13  ;;  %v2198_v23 = vsel %vm719_vm5, %v4221_v5, 0.0  ;;  %v2599_v57 = vpop.permute.xlu1 %2598 }
0x105f   : > { %v4223_v19 = vpop.eup %4222  ;;  %3972 = vmatpush3.bf16.xpose.msra.mxu0 %v2614_v18 }
0x1060   : > { %v2201_v33 = vsel %vm719_vm5, %v4223_v19, 0.0  ;;  %v2207_v36 = vpack.c.bf16 %v4223_v19, %v4221_v5 }
0x1061   : > { %2199 = vadd.xlane.f32.xlu0 %v2198_v23  ;;  %2202 = vadd.xlane.f32.xlu1 %v2201_v33 }
0x1062   : > { %3937 = vmatprep.mubr.msk.bf16.mxu1 %vm719_vm5, %v2207_v36 }
0x1063   : > { %3938 = vmatmul.mubr.msk.bf16.vlgmr.msra.gmra.mrb[28].mxu1 %vm719_vm5, %v2208_v37 }
0x1066   : > { %3974 = vmatmul.mubr.msk.bf16.vlgmr.msra.gmra.mrb[48].mxu0 %vm658_vm3, %v2599_v57 }
0x1072   : > { %2453 = vrot.lane.b32.xlu1 %v4933_v48, %s5314_s19 }
0x1076   : > { %2842 = vrot.lane.b32.xlu1 %v4939_v31, %s5315_s20 }
0x1077   : > { %2280 = vrot.lane.b32.xlu0 %v3637_v39, %s5316_s23 }
0x107a   : > { %2838 = vrot.lane.b32.xlu1 %v4939_v31, %s5317_s29 }
0x107b   : > { %2844 = vrot.lane.b32.xlu0 %v4933_v48, %s5315_s20  ;;  %s3676_s20 = sshll.u32 %s4453_s25, 4 }
0x107c   : > { %s5233_s17 = scalar_lea.hbm %s5287_s12, %s3676_s20 }
0x107f   : > { %2840 = vrot.lane.b32.xlu0 %v4933_v48, %s5317_s29  ;;  %s405_s29 = scalar_lea.vmem [#allocation2], %s404_s18 }
0x1089   : > { %v2424_v22 = vpop.xlane.xlu0 %2423 }
0x108a   : > { %v2431_v40 = vsub.f32 %v4970_v53, %v2424_v22 }
0x108c   : > { %v2434_v43 = vmul.f32 1.442695, %v2431_v40 }
0x108d   : > { %v2427_v25 = vpop.xlane.xlu0 %2426 }
0x108e   : > { %v2432_v14 = vsub.f32 %v4972_v49, %v2427_v25  ;;  %v2430_v44 = vpop.xlane.xlu1 %2429  ;;  %4224 = vpow2.f32 %v2434_v43  ;;  %v3644_v43 = vcombine.low %v4897_v4, %v4897_v4 }
0x108f   : > { %v2433_v42 = vsub.f32 %v4968_v52, %v2430_v44 }
0x1090   : > { %v2436_v45 = vmul.f32 1.442695, %v2432_v14 }
0x1091   : > { %v2438_v20 = vmul.f32 1.442695, %v2433_v42 }
0x1092   : > { %4226 = vpow2.f32 %v2436_v45  ;;  %v2452_v50 = vpop.permute.xlu1 %2451 }
0x1098   : > { %v5022_v46 = vpop.eup %4224 }
0x1099   : > { %v2440_v25 = vsel %vm719_vm5, %v5022_v46, 0.0 }
0x109c   : > { %v5024_v32 = vpop.eup %4226 }
0x109d   : > { %v2449_v47 = vpack.c.bf16 %v5024_v32, %v5022_v46  ;;  %v2443_v40 = vsel %vm719_vm5, %v5024_v32, 0.0 }
0x10ea   : > { %v2206_v34 = vpop.xlane.xlu0 %2205 }
0x10eb   : > { %4228 = vrcp.f32 %v2206_v34 }
0x10ee   : > { %v2203_v53 = vpop.xlane.xlu1 %2202  ;;  %v2200_v51 = vpop.xlane.xlu0 %2199 }
0x10ef   : > { %4230 = vrcp.f32 %v2200_v51 }
0x10f0   : > { %4232 = vrcp.f32 %v2203_v53 }
0x10f1   : > { %4234 = vpow2.f32 %v2438_v20 }
0x10f2   : > { %v2454_v28 = vpop.permute.xlu1 %2453  ;;  %v2281_v15 = vpop.permute.xlu0 %2280 }
0x10f3   : > { %v2289_v49 = vsel %vm832_vm7, %v2281_v15, 0  ;;  %4050 = vmatprep.subr.msk.bf16.mxu1 %vm832_vm7, %v2281_v15  ;;  %v2463_v36 = vand.u32 %v2454_v28, %v4638_v3 }
0x10f4   : > { %3942 = vmatpush3.bf16.msra.mxu1 %v2289_v49 }
0x10f5   : > { %3955 = vmatprep.subr.bf16.mxu1 %v2452_v50  ;;  %v4229_v11 = vpop.eup %4228 }
0x10f6   : > { %v2843_v52 = vpop.permute.xlu1 %2842  ;;  %v2845_v38 = vpop.permute.xlu0 %2844 }
0x10f7   : > { %v2853_v24 = vsel %vm658_vm3, %v2843_v52, 0  ;;  %4057 = vmatprep.subr.msk.bf16.mxu0 %vm658_vm3, %v2843_v52  ;;  %v2856_v58 = vsel %vm658_vm3, %v2845_v38, 0 }
0x10f8   : > { %3992 = vmatpush3.bf16.xpose.msra.mxu0 %v2853_v24 }
0x10f9   : > { %4058 = vmatprep.subr.msk.bf16.mxu0 %vm658_vm3, %v2845_v38  ;;  %v4231_v60 = vpop.eup %4230 }
0x10fa   : > { %v2839_v54 = vpop.permute.xlu1 %2838  ;;  %v2841_v59 = vpop.permute.xlu0 %2840 }
0x10fb   : > { %3995 = vmatprep.mubr.msk.bf16.mxu0 %vm658_vm3, %v2839_v54  ;;  %v4233_v9 = vpop.eup %4232 }
0x10fc   : > { %v4235_v57 = vpop.eup %4234 }
0x10fd   : > { %v2446_v39 = vsel %vm726_vm4, %v4235_v57, 0.0  ;;  %v2450_v22 = vpack.c.bf16 %v4235_v57, %v4235_v57 }
0x1100   : > { %3994 = vmatpush3.bf16.xpose.msra.mxu0 %v2856_v58 }
0x1107   : > { %3996 = vmatmul.mubr.msk.bf16.vlgmr.msra.gmra.mrb[52].mxu0 %vm658_vm3, %v2841_v59 }
0x1136   : > { %v3939_v29 = vpop.f32.mrb[28].mxu1 }
0x1137   : > { %v2276_v61 = vmul.f32 %v4229_v11, %v3939_v29  ;;  %v2257_v0 = vpop.f32.mrb[29].mxu1 }
0x1138   : > { %v2272_v2 = vmul.f32 %v4231_v60, %v2257_v0  ;;  %v3940_v30 = vpop.f32.mrb[30].mxu1 }
0x1139   : > { %v2260_v6 = vpop.f32.mrb[31].mxu1  ;;  %v3975_v12 = vpop.f32.mrb[48].mxu0  ;;  %v2278_v23 = vpack.c.bf16 %v2276_v61, %v2276_v61  ;;  %v3651_v30 = vcombine.low %v4904_v16, %v4904_v16 }
0x113a   : > { %v2274_v10 = vmul.f32 %v4233_v9, %v2260_v6  ;;  %v2650_v26 = vpop.f32.mrb[49].mxu0  ;;  %v2670_v37 = vsel %vm726_vm4, %v3975_v12, -inf }
0x113b   : > { %v3976_v13 = vpop.f32.mrb[50].mxu0  ;;  %v2664_v5 = vsel %vm719_vm5, %v2650_v26, -inf }
0x113c   : > { %v2277_v18 = vpack.c.bf16 %v2274_v10, %v2272_v2  ;;  %2665 = vmax.xlane.f32.xlu0 %v2664_v5  ;;  %v2653_v19 = vpop.f32.mrb[51].mxu0 }
0x113d   : > { %v2667_v33 = vsel %vm719_vm5, %v2653_v19, -inf }
0x113e   : > { %2668 = vmax.xlane.f32.xlu1 %v2667_v33  ;;  %3943 = vmatprep.mubr.msk.bf16.mxu1 %vm658_vm3, %v2277_v18 }
0x113f   : > { %3944 = vmatmul.mubr.msk.bf16.vlgmr.msra.gmra.mrb[32].mxu1 %vm658_vm3, %v2278_v23 }
0x1140   : > { %3956 = vmatpush3.bf16.msra.mxu1 %v2452_v50  ;;  %2671 = vmax.xlane.f32.xlu0 %v2670_v37 }
0x1141   : > { %3957 = vmatprep.subr.bf16.mxu1 %v2463_v36  ;;  %3959 = vmatprep.mubr.msk.bf16.mxu1 %vm719_vm5, %v2449_v47 }
0x1144   : > { %3958 = vmatpush3.bf16.msra.mxu1 %v2463_v36  ;;  %2447 = vadd.xlane.f32.xlu0 %v2446_v39 }
0x1147   : > { %3960 = vmatmul.mubr.msk.bf16.vlgmr.msra.gmra.mrb[36].mxu1 %vm719_vm5, %v2450_v22 }
0x1148   : > { %2444 = vadd.xlane.f32.xlu0 %v2443_v40 }
0x114f   : > { %2522 = vrot.lane.b32.xlu1 %v3644_v43, %s5316_s23 }
0x115e   : > { %2693 = vrot.lane.b32.xlu0 %v4939_v31, %s5318_s15 }
0x1173   : > { %2441 = vadd.xlane.f32.xlu1 %v2440_v25 }
0x1184   : > { %2695 = vrot.lane.b32.xlu1 %v4933_v48, %s5318_s15 }
0x11c9   : > { %v2666_v14 = vpop.xlane.xlu0 %2665 }
0x11ca   : > { %v2673_v44 = vsub.f32 %v2650_v26, %v2666_v14 }
0x11cb   : > { %v2669_v42 = vpop.xlane.xlu1 %2668 }
0x11cc   : > { %v2676_v45 = vmul.f32 1.442695, %v2673_v44  ;;  %v2674_v32 = vsub.f32 %v2653_v19, %v2669_v42 }
0x11cd   : > { %v2672_v47 = vpop.xlane.xlu0 %2671 }
0x11ce   : > { %v2678_v50 = vmul.f32 1.442695, %v2674_v32  ;;  %v2675_v4 = vsub.f32 %v3975_v12, %v2672_v47  ;;  %4236 = vpow2.f32 %v2676_v45 }
0x11cf   : > { %v2523_v34 = vpop.permute.xlu1 %2522 }
0x11d0   : > { %4238 = vpow2.f32 %v2678_v50  ;;  %v2531_v53 = vsel %vm832_vm7, %v2523_v34, 0  ;;  %4053 = vmatprep.subr.msk.bf16.mxu1 %vm832_vm7, %v2523_v34  ;;  %v2680_v46 = vmul.f32 1.442695, %v2675_v4 }
0x11d1   : > { %v2448_v51 = vpop.xlane.xlu0 %2447  ;;  %3964 = vmatpush3.bf16.msra.mxu1 %v2531_v53 }
0x11d2   : > { %4240 = vpow2.f32 %v2680_v46 }
0x11d3   : > { %4242 = vrcp.f32 %v2448_v51 }
0x11d5   : > { %v2445_v28 = vpop.xlane.xlu0 %2444 }
0x11d6   : > { %4244 = vrcp.f32 %v2445_v28 }
0x11d8   : > { %v4237_v15 = vpop.eup %4236 }
0x11d9   : > { %v2694_v49 = vpop.permute.xlu0 %2693  ;;  %v2682_v0 = vsel %vm719_vm5, %v4237_v15, 0.0 }
0x11da   : > { %v4239_v52 = vpop.eup %4238  ;;  %3977 = vmatprep.subr.bf16.mxu1 %v2694_v49  ;;  %v5058_v24 = vpop.f32.mrb[52].mxu0 }
0x11db   : > { %v2892_v38 = vpop.f32.mrb[53].mxu0  ;;  %v2691_v54 = vpack.c.bf16 %v4239_v52, %v4237_v15  ;;  %v2912_v60 = vsel %vm726_vm4, %v5058_v24, -inf  ;;  %v2685_v2 = vsel %vm719_vm5, %v4239_v52, 0.0 }
0x11dc   : > { %v3998_v58 = vpop.f32.mrb[54].mxu0  ;;  %v2906_v59 = vsel %vm719_vm5, %v2892_v38, -inf  ;;  %v4241_v29 = vpop.eup %4240 }
0x11dd   : > { %2907 = vmax.xlane.f32.xlu1 %v2906_v59  ;;  %v2895_v20 = vpop.f32.mrb[55].mxu0  ;;  %v2688_v61 = vsel %vm726_vm4, %v4241_v29, 0.0  ;;  %v4243_v13 = vpop.eup %4242  ;;  %v2692_v40 = vpack.c.bf16 %v4241_v29, %v4241_v29  ;;  %v3658_v59 = vcombine.low %v4909_v1, %v4909_v1 }
0x11de   : > { %v2909_v11 = vsel %vm719_vm5, %v2895_v20, -inf }
0x11df   : > { %2910 = vmax.xlane.f32.xlu0 %v2909_v11 }
0x11e0   : > { %v4245_v19 = vpop.eup %4244 }
0x11e1   : > { %2913 = vmax.xlane.f32.xlu1 %v2912_v60 }
0x11e3   : > { %2689 = vadd.xlane.f32.xlu0 %v2688_v61 }
0x11e5   : > { %2683 = vadd.xlane.f32.xlu1 %v2682_v0 }
0x11e7   : > { %2686 = vadd.xlane.f32.xlu0 %v2685_v2 }
0x11f6   : > { %2935 = vrot.lane.b32.xlu1 %v4939_v31, %s5319_s16 }
0x11fa   : > { %2937 = vrot.lane.b32.xlu1 %v4933_v48, %s5319_s16 }
0x11fd   : > { %2764 = vrot.lane.b32.xlu0 %v3651_v30, %s5316_s23 }
0x1200   : > { %v2442_v9 = vpop.xlane.xlu1 %2441 }
0x1201   : > { %4246 = vrcp.f32 %v2442_v9 }
0x1204   : > { %v2696_v37 = vpop.permute.xlu1 %2695 }
0x1205   : > { %v2705_v22 = vand.u32 %v2696_v37, %v4638_v3 }
0x120b   : > { %v4247_v16 = vpop.eup %4246 }
0x1212   : > { %v3945_v6 = vpop.f32.mrb[32].mxu1 }
0x1213   : > { %v2325_v12 = vpop.f32.mrb[33].mxu1 }
0x1214   : > { %v3946_v10 = vpop.f32.mrb[34].mxu1 }
0x1215   : > { %v2328_v26 = vpop.f32.mrb[35].mxu1 }
0x121a   : > { %v3961_v5 = vpop.f32.mrb[36].mxu1 }
0x121b   : > { %v2518_v18 = vmul.f32 %v4243_v13, %v3961_v5  ;;  %v2499_v31 = vpop.f32.mrb[37].mxu1 }
0x121c   : > { %v3962_v23 = vpop.f32.mrb[38].mxu1  ;;  %v2514_v36 = vmul.f32 %v4247_v16, %v2499_v31 }
0x121d   : > { %v2502_v33 = vpop.f32.mrb[39].mxu1  ;;  %v2520_v39 = vpack.c.bf16 %v2518_v18, %v2518_v18 }
0x121e   : > { %v2516_v48 = vmul.f32 %v4245_v19, %v2502_v33 }
0x1220   : > { %v2519_v57 = vpack.c.bf16 %v2516_v48, %v2514_v36 }
0x1222   : > { %3965 = vmatprep.mubr.msk.bf16.mxu1 %vm658_vm3, %v2519_v57 }
0x1223   : > { %3966 = vmatmul.mubr.msk.bf16.vlgmr.msra.gmra.mrb[40].mxu1 %vm658_vm3, %v2520_v39 }
0x1224   : > { %3978 = vmatpush3.bf16.msra.mxu1 %v2694_v49  ;;  %3981 = vmatprep.mubr.msk.bf16.mxu1 %vm719_vm5, %v2691_v54 }
0x1225   : > { %3979 = vmatprep.subr.bf16.mxu1 %v2705_v22 }
0x1228   : > { %3980 = vmatpush3.bf16.msra.mxu1 %v2705_v22 }
0x122b   : > { %3982 = vmatmul.mubr.msk.bf16.vlgmr.msra.gmra.mrb[44].mxu1 %vm719_vm5, %v2692_v40 }
0x126a   : > { %v2908_v43 = vpop.xlane.xlu1 %2907 }
0x126b   : > { %v2915_v25 = vsub.f32 %v2892_v38, %v2908_v43 }
0x126c   : > { %v2911_v14 = vpop.xlane.xlu0 %2910 }
0x126d   : > { %v2918_v44 = vmul.f32 1.442695, %v2915_v25  ;;  %v2916_v42 = vsub.f32 %v2895_v20, %v2911_v14 }
0x126e   : > { %v2914_v45 = vpop.xlane.xlu1 %2913 }
0x126f   : > { %4248 = vpow2.f32 %v2918_v44  ;;  %v2920_v32 = vmul.f32 1.442695, %v2916_v42  ;;  %v2917_v47 = vsub.f32 %v5058_v24, %v2914_v45 }
0x1270   : > { %v2690_v50 = vpop.xlane.xlu0 %2689 }
0x1271   : > { %4250 = vpow2.f32 %v2920_v32  ;;  %v2922_v4 = vmul.f32 1.442695, %v2917_v47 }
0x1272   : > { %v2684_v34 = vpop.xlane.xlu1 %2683 }
0x1273   : > { %4252 = vpow2.f32 %v2922_v4 }
0x1274   : > { %v2687_v53 = vpop.xlane.xlu0 %2686  ;;  %4254 = vrcp.f32 %v2690_v50 }
0x1275   : > { %4256 = vrcp.f32 %v2684_v34 }
0x1276   : > { %v2936_v15 = vpop.permute.xlu1 %2935  ;;  %4258 = vrcp.f32 %v2687_v53 }
0x1278   : > { %v2765_v46 = vpop.permute.xlu0 %2764 }
0x1279   : > { %v4249_v51 = vpop.eup %4248  ;;  %v2773_v28 = vsel %vm832_vm7, %v2765_v46, 0  ;;  %4056 = vmatprep.subr.msk.bf16.mxu1 %vm832_vm7, %v2765_v46 }
0x127a   : > { %3986 = vmatpush3.bf16.msra.mxu1 %v2773_v28  ;;  %v2924_v49 = vsel %vm719_vm5, %v4249_v51, 0.0 }
0x127b   : > { %v4251_v52 = vpop.eup %4250  ;;  %2925 = vadd.xlane.f32.xlu1 %v2924_v49  ;;  %3999 = vmatprep.subr.bf16.mxu1 %v2936_v15 }
0x127c   : > { %v2933_v24 = vpack.c.bf16 %v4251_v52, %v4249_v51  ;;  %v2927_v58 = vsel %vm719_vm5, %v4251_v52, 0.0 }
0x127d   : > { %v4253_v38 = vpop.eup %4252 }
0x127e   : > { %v2930_v54 = vsel %vm726_vm4, %v4253_v38, 0.0  ;;  %v4255_v60 = vpop.eup %4254  ;;  %v2934_v19 = vpack.c.bf16 %v4253_v38, %v4253_v38 }
0x127f   : > { %2931 = vadd.xlane.f32.xlu0 %v2930_v54  ;;  %v4257_v1 = vpop.eup %4256 }
0x1283   : > { %2928 = vadd.xlane.f32.xlu0 %v2927_v58 }
0x128c   : > { %3083 = vrot.lane.b32.xlu1 %v4869_v63, %s4350_s30 }
0x1290   : > { %2346 = vrot.lane.b32.xlu1 %v3945_v6, %s4350_s30  ;;  %v4259_v6 = vpop.eup %4258 }
0x1294   : > { %2342 = vrot.lane.b32.xlu1 %v2325_v12, %s4350_s30 }
0x1298   : > { %2344 = vrot.lane.b32.xlu1 %v2328_v26, %s4350_s30  ;;  %v2938_v26 = vpop.permute.xlu1 %2937 }
0x1299   : > { %3006 = vrot.lane.b32.xlu0 %v3658_v59, %s5316_s23  ;;  %v2947_v18 = vand.u32 %v2938_v26, %v4638_v3 }
0x12f6   : > { %v3967_v20 = vpop.f32.mrb[40].mxu1 }
0x12f7   : > { %v2567_v11 = vpop.f32.mrb[41].mxu1  ;;  %2588 = vrot.lane.b32.xlu0 %v3967_v20, %s4350_s30 }
0x12f8   : > { %v3968_v29 = vpop.f32.mrb[42].mxu1 }
0x12f9   : > { %v2570_v63 = vpop.f32.mrb[43].mxu1 }
0x12fa   : > { %2586 = vrot.lane.b32.xlu1 %v2570_v63, %s4350_s30 }
0x12fb   : > { %2584 = vrot.lane.b32.xlu0 %v2567_v11, %s4350_s30 }
0x12fe   : > { %v3983_v61 = vpop.f32.mrb[44].mxu1 }
0x12ff   : > { %v2760_v0 = vmul.f32 %v4255_v60, %v3983_v61  ;;  %v2741_v2 = vpop.f32.mrb[45].mxu1 }
0x1300   : > { %v2756_v30 = vmul.f32 %v4257_v1, %v2741_v2  ;;  %v3984_v9 = vpop.f32.mrb[46].mxu1 }
0x1301   : > { %v2744_v12 = vpop.f32.mrb[47].mxu1  ;;  %v2762_v5 = vpack.c.bf16 %v2760_v0, %v2760_v0 }
0x1302   : > { %v2758_v10 = vmul.f32 %v4259_v6, %v2744_v12 }
0x1304   : > { %v2761_v13 = vpack.c.bf16 %v2758_v10, %v2756_v30 }
0x1306   : > { %3987 = vmatprep.mubr.msk.bf16.mxu1 %vm658_vm3, %v2761_v13 }
0x1307   : > { %3988 = vmatmul.mubr.msk.bf16.vlgmr.msra.gmra.mrb[48].mxu1 %vm658_vm3, %v2762_v5 }
0x1308   : > { %4000 = vmatpush3.bf16.msra.mxu1 %v2936_v15  ;;  %4003 = vmatprep.mubr.msk.bf16.mxu1 %vm719_vm5, %v2933_v24  ;;  %v2926_v36 = vpop.xlane.xlu1 %2925 }
0x1309   : > { %4001 = vmatprep.subr.bf16.mxu1 %v2947_v18 }
0x130c   : > { %4002 = vmatpush3.bf16.msra.mxu1 %v2947_v18  ;;  %v2932_v31 = vpop.xlane.xlu0 %2931  ;;  %v3084_v51 = vpop.permute.xlu1 %3083 }
0x130d   : > { %4260 = vrcp.f32 %v2932_v31 }
0x130e   : > { %4262 = vrcp.f32 %v2926_v36 }
0x130f   : > { %4004 = vmatmul.mubr.msk.bf16.vlgmr.msra.gmra.mrb[52].mxu1 %vm719_vm5, %v2934_v19 }
0x1310   : > { %v2929_v23 = vpop.xlane.xlu0 %2928  ;;  %v2347_v28 = vpop.permute.xlu1 %2346 }
0x1311   : > { %4264 = vrcp.f32 %v2929_v23  ;;  %v2353_v11 = vadd.f32 %v4930_v7, %v2347_v28 }
0x1314   : > { %v3007_v16 = vpop.permute.xlu0 %3006  ;;  %v2343_v15 = vpop.permute.xlu1 %2342 }
0x1315   : > { %v3015_v33 = vsel %vm832_vm7, %v3007_v16, 0  ;;  %4059 = vmatprep.subr.msk.bf16.mxu1 %vm832_vm7, %v3007_v16  ;;  %v2351_v59 = vadd.f32 %v4930_v7, %v2343_v15 }
0x1316   : > { %4008 = vmatpush3.bf16.msra.mxu1 %v3015_v33 }
0x1317   : > { %v4261_v39 = vpop.eup %4260 }
0x1318   : > { %v4263_v25 = vpop.eup %4262  ;;  %v2345_v49 = vpop.permute.xlu1 %2344 }
0x131b   : > { %v4265_v44 = vpop.eup %4264 }
0x1369   : > { %v2589_v52 = vpop.permute.xlu0 %2588 }
0x136a   : > { %v2595_v60 = vadd.f32 %v2589_v52, %v2353_v11 }
0x136c   : > { %v2587_v24 = vpop.permute.xlu1 %2586 }
0x136d   : > { %v2585_v38 = vpop.permute.xlu0 %2584 }
0x136e   : > { %v2593_v63 = vadd.f32 %v2585_v38, %v2351_v59 }
0x13da   : > { %v3989_v3 = vpop.f32.mrb[48].mxu1 }
0x13db   : > { %2830 = vrot.lane.b32.xlu1 %v3989_v3, %s4350_s30  ;;  %v2809_v48 = vpop.f32.mrb[49].mxu1 }
0x13dc   : > { %v3990_v37 = vpop.f32.mrb[50].mxu1 }
0x13dd   : > { %v2812_v57 = vpop.f32.mrb[51].mxu1 }
0x13de   : > { %2828 = vrot.lane.b32.xlu0 %v2812_v57, %s4350_s30 }
0x13df   : > { %2826 = vrot.lane.b32.xlu1 %v2809_v48, %s4350_s30 }
0x13e2   : > { %v4005_v22 = vpop.f32.mrb[52].mxu1 }
0x13e3   : > { %v3002_v40 = vmul.f32 %v4261_v39, %v4005_v22  ;;  %v2983_v43 = vpop.f32.mrb[53].mxu1 }
0x13e4   : > { %v4006_v14 = vpop.f32.mrb[54].mxu1  ;;  %v2998_v45 = vmul.f32 %v4263_v25, %v2983_v43  ;;  %v3183_v25 = vrot.slane %v4916_v8, %v1726_v27 }
0x13e5   : > { %v2986_v42 = vpop.f32.mrb[55].mxu1  ;;  %v3004_v50 = vpack.c.bf16 %v3002_v40, %v3002_v40  ;;  %v3172_v14 = vrot.slane %v4916_v8, %v1715_v21 }
0x13e6   : > { %v3000_v32 = vmul.f32 %v4265_v44, %v2986_v42  ;;  %v4136_v44 = vld [vmem:[%s5281_s6 + $0x10] sm:$0xff]   ;;  %v4137_v42 = vld [vmem:[%s5281_s6 + $0x18] sm:$0xff]  }
0x13e7   : > { %4013 = vmatprep.subr.bf16.mxu0 %v4136_v44 }
0x13e8   : > { %v3003_v47 = vpack.c.bf16 %v3000_v32, %v2998_v45  ;;  %4014 = vmatpush3.bf16.msra.mxu0 %v4136_v44 }
0x13e9   : > { %4015 = vmatprep.subr.bf16.mxu0 %v4137_v42 }
0x13ea   : > { %4009 = vmatprep.mubr.msk.bf16.mxu1 %vm658_vm3, %v3003_v47 }
0x13eb   : > { %4010 = vmatmul.mubr.msk.bf16.vlgmr.msra.gmra.mrb[56].mxu1 %vm658_vm3, %v3004_v50 }
0x13ec   : > { %4016 = vmatpush3.bf16.msra.mxu0 %v4137_v42 }
0x144d   : > { %v2831_v54 = vpop.permute.xlu1 %2830 }
0x144e   : > { %v2837_v0 = vadd.f32 %v2831_v54, %v2595_v60 }
0x1450   : > { %v2829_v58 = vpop.permute.xlu0 %2828 }
0x1451   : > { %v2827_v20 = vpop.permute.xlu1 %2826 }
0x1452   : > { %v2835_v61 = vadd.f32 %v2827_v20, %v2593_v63 }
0x14be   : > { %v4011_v4 = vpop.f32.mrb[56].mxu1 }
0x14bf   : > { %3072 = vrot.lane.b32.xlu0 %v4011_v4, %s4350_s30  ;;  %v3051_v34 = vpop.f32.mrb[57].mxu1 }
0x14c0   : > { %v4012_v53 = vpop.f32.mrb[58].mxu1 }
0x14c1   : > { %v3054_v46 = vpop.f32.mrb[59].mxu1 }
0x14c2   : > { %3070 = vrot.lane.b32.xlu1 %v3054_v46, %s4350_s30 }
0x14c3   : > { %3068 = vrot.lane.b32.xlu0 %v3051_v34, %s4350_s30 }
0x14c6   : > { %3087 = vrot.lane.b32.xlu1 %v4866_v35, %s4350_s30  ;;  %v2352_v35 = vadd.f32 %v4930_v7, %v2345_v49 }
0x14c7   : > { %3085 = vrot.lane.b32.xlu0 %v4874_v17, %s4350_s30 }
0x14c8   : > { %v2594_v17 = vadd.f32 %v2587_v24, %v2352_v35 }
0x14ca   : > { %v2836_v30 = vadd.f32 %v2829_v58, %v2594_v17 }
0x1531   : > { %v3073_v29 = vpop.permute.xlu0 %3072 }
0x1532   : > { %v3079_v6 = vadd.f32 %v3073_v29, %v2837_v0 }
0x1534   : > { %v3071_v1 = vpop.permute.xlu1 %3070 }
0x1535   : > { %v3069_v2 = vpop.permute.xlu0 %3068  ;;  %v3078_v12 = vadd.f32 %v3071_v1, %v2836_v30 }
0x1536   : > { %v3077_v9 = vadd.f32 %v3069_v2, %v2835_v61 }
0x1538   : > { %v3088_v10 = vpop.permute.xlu1 %3087  ;;  %v5120_v5 = vadd.f32 %v3084_v51, %v3077_v9 }
0x1539   : > { %v5118_v26 = vadd.f32 %v3088_v10, %v3079_v6  ;;  %v3086_v13 = vpop.permute.xlu0 %3085 }
0x153a   : > { %v5122_v18 = vadd.f32 %v3086_v13, %v3078_v12  ;;  %v3121_v7 = vmul.f32 %v5120_v5, %v5120_v5 }
0x153b   : > { %3104 = vrot.lane.b32.xlu0 %v5118_v26, %s5316_s23  ;;  %v3123_v19 = vmul.f32 %v5118_v26, %v5118_v26 }
0x153c   : > { %3102 = vrot.lane.b32.xlu1 %v5122_v18, %s5316_s23  ;;  %v3122_v31 = vmul.f32 %v5122_v18, %v5122_v18 }
0x153f   : > { %3100 = vrot.lane.b32.xlu0 %v5120_v5, %s5316_s23 }
0x1540   : > { %3127 = vrot.lane.b32.xlu1 %v3121_v7, %s5316_s23 }
0x1543   : > { %3129 = vrot.lane.b32.xlu0 %v3122_v31, %s5316_s23 }
0x1544   : > { %3131 = vrot.lane.b32.xlu1 %v3123_v19, %s5316_s23 }
0x15ad   : > { %v3105_v23 = vpop.permute.xlu0 %3104 }
0x15ae   : > { %v3115_v16 = vsel %vm518_vm1, %v3105_v23, 0.0  ;;  %v3103_v33 = vpop.permute.xlu1 %3102  ;;  %v3670_v23 = vld [vmem:[%s5282_s7 + $0x2] sm:$0x3] }
0x15af   : > { %v3112_v36 = vsel %vm511_vm2, %v3103_v33, 0.0  ;;  %3116 = vadd.xlane.f32.xlu0 %v3115_v16  ;;  %4060 = vmatprep.subr.msk.bf16.mxu1 %vm1912_vm8, %v3670_v23  ;;  %v3370_v16 = vsel %vm1912_vm8, %v3670_v23, 0  ;;  %v5177_v33 = vld [vmem:[%s5283_s8 + $0x2] sm:$0x3] }
0x15b0   : > { %3113 = vadd.xlane.f32.xlu1 %v3112_v36  ;;  %4022 = vmatpush3.bf16.msra.mxu1 %v3370_v16  ;;  %v3201_v36 = vrot.slane %v5177_v33, %v4551_v56 }
0x15b1   : > { %v5141_v3 = vpop.permute.xlu0 %3100 }
0x15b2   : > { %v3128_v48 = vpop.permute.xlu1 %3127  ;;  %v3109_v37 = vsel %vm511_vm2, %v5141_v3, 0.0 }
0x15b3   : > { %3110 = vadd.xlane.f32.xlu0 %v3109_v37  ;;  %v3136_v57 = vsel %vm511_vm2, %v3128_v48, 0.0 }
0x15b5   : > { %v3130_v22 = vpop.permute.xlu0 %3129 }
0x15b6   : > { %v3132_v39 = vpop.permute.xlu1 %3131  ;;  %v3139_v43 = vsel %vm511_vm2, %v3130_v22, 0.0 }
0x15b7   : > { %v3142_v40 = vsel %vm518_vm1, %v3132_v39, 0.0  ;;  %3137 = vadd.xlane.f32.xlu0 %v3136_v57 }
0x15b8   : > { %3143 = vadd.xlane.f32.xlu1 %v3142_v40 }
0x15bb   : > { %3140 = vadd.xlane.f32.xlu0 %v3139_v43 }
0x15c9   : > { %3185 = vrot.lane.b32.xlu1 %v3183_v25, %s4350_s30 }
0x15d1   : > { %3174 = vrot.lane.b32.xlu0 %v3172_v14, %s4350_s30  ;;  %s4290_s30 = sshll.u32 %s4366_s28, 4  ;;  %s4291_s30 = int_to_ptr.vmem [resolvable:$false] %s4290_s30 }
0x15d2   : > { %s4292_s19 = scalar_lea.vmem %s4291_s30, 32 }
0x163c   : > { %v3117_v27 = vpop.xlane.xlu0 %3116 }
0x163d   : > { %v3114_v32 = vpop.xlane.xlu1 %3113  ;;  %v3120_v47 = vmul.f32 0.03125, %v3117_v27 }
0x163e   : > { %v3119_v8 = vmul.f32 0.03125, %v3114_v32 }
0x163f   : > { %v3150_v53 = vmul.f32 %v3120_v47, %v3120_v47  ;;  %v3159_v60 = vsub.f32 %v5118_v26, %v3120_v47 }
0x1640   : > { %v3111_v45 = vpop.xlane.xlu0 %3110  ;;  %v3149_v49 = vmul.f32 %v3119_v8, %v3119_v8  ;;  %v3158_v1 = vsub.f32 %v5122_v18, %v3119_v8 }
0x1641   : > { %v3118_v55 = vmul.f32 0.03125, %v3111_v45 }
0x1643   : > { %v3148_v50 = vmul.f32 %v3118_v55, %v3118_v55  ;;  %v3157_v29 = vsub.f32 %v5120_v5, %v3118_v55 }
0x1644   : > { %v3138_v21 = vpop.xlane.xlu0 %3137 }
0x1645   : > { %v3145_v4 = vmul.f32 0.03125, %v3138_v21  ;;  %v3144_v34 = vpop.xlane.xlu1 %3143 }
0x1646   : > { %v3147_v46 = vmul.f32 0.03125, %v3144_v34 }
0x1647   : > { %v3151_v51 = vsub.f32 %v3145_v4, %v3148_v50 }
0x1648   : > { %v3153_v28 = vsub.f32 %v3147_v46, %v3150_v53  ;;  %v3141_v15 = vpop.xlane.xlu0 %3140 }
0x1649   : > { %v3154_v52 = vmax.f32 %v3151_v51, 0.0  ;;  %v3146_v24 = vmul.f32 0.03125, %v3141_v15  ;;  %v3186_v6 = vpop.permute.xlu1 %3185 }
0x164a   : > { %v3156_v38 = vmax.f32 %v3153_v28, 0.0 }
0x164b   : > { %v3160_v54 = vadd.f32 1e-05, %v3154_v52  ;;  %v3152_v58 = vsub.f32 %v3146_v24, %v3149_v49 }
0x164c   : > { %v3162_v59 = vadd.f32 1e-05, %v3156_v38  ;;  %v3175_v61 = vpop.permute.xlu0 %3174 }
0x164d   : > { %4266 = vrsqrt.f32 %v3160_v54  ;;  %v3155_v20 = vmax.f32 %v3152_v58, 0.0 }
0x164e   : > { %4268 = vrsqrt.f32 %v3162_v59 }
0x164f   : > { %v3161_v11 = vadd.f32 1e-05, %v3155_v20 }
0x1651   : > { %4270 = vrsqrt.f32 %v3161_v11 }
0x1657   : > { %v4267_v35 = vpop.eup %4266 }
0x1658   : > { %v4269_v63 = vpop.eup %4268  ;;  %v3166_v17 = vmul.f32 %v4267_v35, %v3157_v29 }
0x1659   : > { %v3168_v0 = vmul.f32 %v4269_v63, %v3159_v60 }
0x165a   : > { %v3177_v9 = vmul.f32 %v3175_v61, %v3166_v17 }
0x165b   : > { %v4271_v2 = vpop.eup %4270  ;;  %v3179_v10 = vmul.f32 %v3175_v61, %v3168_v0 }
0x165c   : > { %v3167_v30 = vmul.f32 %v4271_v2, %v3158_v1  ;;  %v3188_v13 = vadd.f32 %v3186_v6, %v3177_v9 }
0x165d   : > { %v3190_v31 = vadd.f32 %v3186_v6, %v3179_v10 }
0x165e   : > { %v3178_v12 = vmul.f32 %v3175_v61, %v3167_v30 }
0x165f   : > { %v3192_v5 = vpack.c.bf16 %v3190_v31, %v3190_v31 }
0x1660   : > { %v3189_v7 = vadd.f32 %v3186_v6, %v3178_v12 }
0x1662   : > { %v3191_v19 = vpack.c.bf16 %v3189_v7, %v3188_v13 }
0x1664   : > { %3204 = vrot.lane.b32.xlu1 %v3191_v19, %s5316_s23 }
0x1668   : > { %3206 = vrot.lane.b32.xlu1 %v3192_v5, %s5316_s23  ;;  %s3516_s23 = sshll.u32 %s405_s29, 4  ;;  %s5235_s23 = int_to_ptr.vmem [resolvable:$true] %s3516_s23 }
0x1669   : > { %s4286_s25 = scalar_lea.vmem %s5235_s23, 16  ;;  %p4293_p0 = scmp.lt.s32.totalorder %s5235_s23, %s4291_s30 }
0x166a   : > { %p4287_p11 = scmp.ne.s32.totalorder %s5235_s23, %s4286_s25  ;;  %p4294_p1 = scmp.lt.s32.totalorder %s4292_s19, %s4286_s25 }
0x166c   : > { %p4288_p12 = pnand %p4287_p11, %p4470_p5  ;;  %p4295_p2 = por %p4294_p1, %p4293_p0 }
0x166e   : > { %p4289_p13 = pneg %p4288_p12 }
0x1670   : > { %p4296_p3 = pnand %p4295_p2, %p4289_p13 }
0x16d6   : > { %v3205_v26 = vpop.permute.xlu1 %3204 }
0x16d7   : > { %4017 = vmatprep.mubr.msk.bf16.mxu0 %vm511_vm2, %v3205_v26 }
0x16da   : > { %v3207_v18 = vpop.permute.xlu1 %3206 }
0x16db   : > { %4018 = vmatmul.mubr.msk.bf16.vlgmr.msra.gmra.mrb[56].mxu0 %vm511_vm2, %v3207_v18 }
0x17ae   : > { %v4019_v48 = vpop.f32.mrb[56].mxu0 }
0x17af   : > { %v5181_v37 = vadd.f32 %v4019_v48, %v3201_v36  ;;  %v3260_v57 = vpop.f32.mrb[57].mxu0 }
0x17b0   : > { %v5183_v39 = vadd.f32 %v3260_v57, %v3201_v36  ;;  %v4020_v22 = vpop.f32.mrb[58].mxu0 }
0x17b1   : > { %v5186_v40 = vmul.f32 0.70710677, %v5181_v37  ;;  %v3263_v43 = vpop.f32.mrb[59].mxu0 }
0x17b2   : > { %v5189_v25 = vmul.f32 0.70710677, %v5183_v39  ;;  %v5191_v14 = vadd.f32 %v3263_v43, %v3201_v36 }
0x17b3   : > { %v3288_v44 = vand.u32 2147483647, %v5186_v40  ;;  %vm3282_vm13 = vcmp.ge.f32.partialorder %v5186_v40, 0.0 }
0x17b4   : > { %v3286_v56 = vand.u32 2147483647, %v5189_v25  ;;  %v5196_v27 = vmul.f32 0.70710677, %v5191_v14  ;;  %vm3280_vm14 = vcmp.ge.f32.partialorder %v5189_v25, 0.0 }
0x17b5   : > { %v3291_v42 = vmul.f32 0.3275911, %v3288_v44  ;;  %v3330_v50 = vsub.f32 0.0, %v3288_v44 }
0x17b6   : > { %v3289_v45 = vmul.f32 0.3275911, %v3286_v56  ;;  %v3287_v55 = vand.u32 2147483647, %v5196_v27  ;;  %v3328_v4 = vsub.f32 0.0, %v3286_v56  ;;  %vm3281_vm15 = vcmp.ge.f32.partialorder %v5196_v27, 0.0 }
0x17b7   : > { %v3294_v32 = vadd.f32 1.0, %v3291_v42  ;;  %v3333_v53 = vmul.f32 %v3330_v50, %v3288_v44  ;;  %v3285_v44 = vsel %vm3282_vm13, 1.0, %v4363_v41  ;;  %v3276_v50 = vmul.f32 0.5, %v5181_v37 }
0x17b8   : > { %v3292_v47 = vadd.f32 1.0, %v3289_v45  ;;  %v3290_v21 = vmul.f32 0.3275911, %v3287_v55  ;;  %v3329_v46 = vsub.f32 0.0, %v3287_v55  ;;  %v3331_v15 = vmul.f32 %v3328_v4, %v3286_v56 }
0x17b9   : > { %4272 = vrcp.f32 %v3294_v32  ;;  %v3338_v38 = vmul.f32 1.442695, %v3333_v53  ;;  %v3283_v45 = vsel %vm3280_vm14, 1.0, %v4363_v41  ;;  %v3274_v4 = vmul.f32 0.5, %v5183_v39 }
0x17ba   : > { %4274 = vrcp.f32 %v3292_v47  ;;  %v3293_v8 = vadd.f32 1.0, %v3290_v21  ;;  %v3332_v58 = vmul.f32 %v3329_v46, %v3287_v55  ;;  %v3334_v20 = vmul.f32 1.442695, %v3331_v15 }
0x17bb   : > { %v3284_v21 = vsel %vm3281_vm15, 1.0, %v4363_v41  ;;  %v3362_v41 = vrot.slane %v5177_v33, %v4562_v62  ;;  %v4139_v62 = vld [vmem:[%s5285_s10 + $0x8] sm:$0xff]  }
0x17bc   : > { %4276 = vrcp.f32 %v3293_v8  ;;  %v3336_v17 = vmul.f32 1.442695, %v3332_v58 }
0x17bd   : > { %4278 = vpow2.f32 %v3338_v38 }
0x17be   : > { %4280 = vpow2.f32 %v3334_v20  ;;  %v4364_v20 = vmov 0.0  }
0x17bf   : > { %4282 = vpow2.f32 %v3336_v17  ;;  %4027 = vmatprep.subr.bf16.mxu0 %v4364_v20  ;;  %4031 = vmatprep.mubr.msk.bf16.mxu0 %vm4365_vm0, %v4364_v20 }
0x17c3   : > { %v4273_v34 = vpop.eup %4272 }
0x17c4   : > { %v4275_v51 = vpop.eup %4274  ;;  %v3303_v28 = vmul.f32 1.0614054, %v4273_v34 }
0x17c5   : > { %v3301_v49 = vmul.f32 1.0614054, %v4275_v51 }
0x17c6   : > { %v3306_v52 = vadd.f32 -1.4531521, %v3303_v28  ;;  %v4277_v24 = vpop.eup %4276 }
0x17c7   : > { %v3304_v54 = vadd.f32 -1.4531521, %v3301_v49  ;;  %v3302_v11 = vmul.f32 1.0614054, %v4277_v24  ;;  %v4279_v26 = vpop.eup %4278 }
0x17c8   : > { %v3309_v59 = vmul.f32 %v4273_v34, %v3306_v52  ;;  %v4281_v23 = vpop.eup %4280 }
0x17c9   : > { %v3307_v29 = vmul.f32 %v4275_v51, %v3304_v54  ;;  %v3305_v63 = vadd.f32 -1.4531521, %v3302_v11  ;;  %v4283_v43 = vpop.eup %4282 }
0x17ca   : > { %v3312_v35 = vadd.f32 1.4214138, %v3309_v59  ;;  %v4138_v59 = vld [vmem:[%s5285_s10] sm:$0xff]  }
0x17cb   : > { %v3310_v60 = vadd.f32 1.4214138, %v3307_v29  ;;  %v3308_v1 = vmul.f32 %v4277_v24, %v3305_v63  ;;  %4028 = vmatpush3.bf16.msra.mxu0 %v4138_v59 }
0x17cc   : > { %v3315_v61 = vmul.f32 %v4273_v34, %v3312_v35  ;;  %4029 = vmatprep.subr.bf16.mxu0 %v4364_v20 }
0x17cd   : > { %v3313_v0 = vmul.f32 %v4275_v51, %v3310_v60  ;;  %v3311_v30 = vadd.f32 1.4214138, %v3308_v1 }
0x17ce   : > { %v3318_v2 = vadd.f32 -0.28449672, %v3315_v61  ;;  %v3419_v61 = vld [vmem:[%s5284_s9] sm:$0x3] }
0x17cf   : > { %v3316_v9 = vadd.f32 -0.28449672, %v3313_v0  ;;  %v3314_v12 = vmul.f32 %v4277_v24, %v3311_v30  ;;  %4030 = vmatpush3.bf16.msra.mxu0 %v4139_v62  ;;  %v3438_v30 = vrot.slane %v3419_v61, 1 }
0x17d0   : > { %v3321_v6 = vmul.f32 %v4273_v34, %v3318_v2 }
0x17d1   : > { %v3319_v10 = vmul.f32 %v4275_v51, %v3316_v9  ;;  %v3317_v7 = vadd.f32 -0.28449672, %v3314_v12 }
0x17d2   : > { %v3324_v13 = vadd.f32 0.2548296, %v3321_v6 }
0x17d3   : > { %v3322_v31 = vadd.f32 0.2548296, %v3319_v10  ;;  %v3320_v5 = vmul.f32 %v4277_v24, %v3317_v7  ;;  %v3446_v10 = vld [vmem:[%s5286_s11] sm:$0x1] }
0x17d4   : > { %v3327_v19 = vmul.f32 %v4273_v34, %v3324_v13  ;;  %v3275_v34 = vmul.f32 0.5, %v5191_v14 }
0x17d5   : > { %v3325_v18 = vmul.f32 %v4275_v51, %v3322_v31  ;;  %v3323_v36 = vadd.f32 0.2548296, %v3320_v5 }
0x17d6   : > { %v3342_v16 = vmul.f32 %v4279_v26, %v3327_v19 }
0x17d7   : > { %v3340_v48 = vmul.f32 %v4281_v23, %v3325_v18  ;;  %v3326_v22 = vmul.f32 %v4277_v24, %v3323_v36 }
0x17d8   : > { %v3345_v57 = vsub.f32 1.0, %v3342_v16 }
0x17d9   : > { %v3343_v56 = vsub.f32 1.0, %v3340_v48  ;;  %v3341_v32 = vmul.f32 %v4283_v43, %v3326_v22 }
0x17da   : > { %v3348_v42 = vmul.f32 %v3345_v57, %v3285_v44 }
0x17db   : > { %v3346_v55 = vmul.f32 %v3343_v56, %v3283_v45  ;;  %v3344_v47 = vsub.f32 1.0, %v3341_v32 }
0x17dc   : > { %v3351_v40 = vadd.f32 1.0, %v3348_v42 }
0x17dd   : > { %v3349_v8 = vadd.f32 1.0, %v3346_v55  ;;  %v3347_v25 = vmul.f32 %v3344_v47, %v3284_v21 }
0x17de   : > { %v3354_v46 = vmul.f32 %v3351_v40, %v3276_v50 }
0x17df   : > { %v3350_v53 = vadd.f32 1.0, %v3347_v25  ;;  %v3352_v51 = vmul.f32 %v3349_v8, %v3274_v4 }
0x17e0   : > { %v3356_v27 = vpack.c.bf16 %v3354_v46, %v3354_v46 }
0x17e1   : > { %v3353_v28 = vmul.f32 %v3350_v53, %v3275_v34 }
0x17e3   : > { %v3355_v15 = vpack.c.bf16 %v3353_v28, %v3352_v51 }
0x17e5   : > { %4023 = vmatprep.mubr.msk.bf16.mxu1 %vm1905_vm12, %v3355_v15 }
0x17e6   : > { %4024 = vmatmul.mubr.msk.bf16.vlgmr.msra.gmra.mrb[60].mxu1 %vm1905_vm12, %v3356_v27 }
0x18b9   : > { %v4025_v49 = vpop.f32.mrb[60].mxu1 }
0x18ba   : > { %v3406_v52 = vpop.f32.mrb[61].mxu1 }
0x18bb   : > { %v3407_v37 = vadd.f32 %v3406_v52, %v3362_v41  ;;  %v4026_v24 = vpop.f32.mrb[62].mxu1 }
0x18bc   : > { %v3409_v39 = vpop.f32.mrb[63].mxu1 }
0x18bd   : > { %v3418_v14 = vadd.f32 %v3407_v37, %v5141_v3 }
0x18bf   : > { %v3420_v38 = vsel %vm518_vm1, %v3418_v14, 0.0  ;;  %v3424_v54 = vmul.f32 %v3418_v14, %v3418_v14 }
0x18c0   : > { %3421 = vadd.xlane.f32.xlu0 %v3420_v38 }
0x18c1   : > { %v3425_v58 = vsel %vm518_vm1, %v3424_v54, 0.0 }
0x18c2   : > { %3426 = vadd.xlane.f32.xlu1 %v3425_v58 }
0x194d   : > { %v3422_v3 = vpop.xlane.xlu0 %3421 }
0x194e   : > { %v3423_v33 = vmul.f32 0.03125, %v3422_v3 }
0x194f   : > { %v3427_v11 = vpop.xlane.xlu1 %3426 }
0x1950   : > { %v3429_v29 = vmul.f32 %v3423_v33, %v3423_v33  ;;  %v3428_v35 = vmul.f32 0.03125, %v3427_v11  ;;  %v3432_v1 = vsub.f32 %v3418_v14, %v3423_v33 }
0x1952   : > { %v3430_v63 = vsub.f32 %v3428_v35, %v3429_v29 }
0x1954   : > { %v3431_v60 = vmax.f32 %v3430_v63, 0.0 }
0x1956   : > { %v3433_v17 = vadd.f32 1e-05, %v3431_v60 }
0x1958   : > { %4284 = vrsqrt.f32 %v3433_v17 }
0x1962   : > { %v4285_v0 = vpop.eup %4284 }
0x1963   : > { %v3435_v2 = vmul.f32 %v4285_v0, %v3432_v1 }
0x1965   : > { %v3436_v9 = vmul.f32 %v3435_v2, %v3419_v61 }
0x1967   : > { %v3440_v6 = vadd.f32 %v3438_v30, %v3436_v9 }
0x1969   : > { %v3441_v12 = vpack.c.bf16 %v3440_v6, %v3440_v6 }
0x196b   : > { %4032 = vmatmul.mubr.msk.bf16.vlgmr.msra.gmra.mrb[60].mxu0 %vm511_vm2, %v3441_v12 }
0x1a3e   : > { %v3496_v13 = vpop.f32.mrb[60].mxu0 }
0x1a3f   : > { %v3497_v7 = vadd.f32 %v3496_v13, %v3446_v10  ;;  %v4033_v31 = vpop.f32.mrb[61].mxu0 }
0x1a40   : > { %v3499_v19 = vpop.f32.mrb[62].mxu0 }
0x1a41   : > { %3502 = vst [vmem:[%s405_s29] sm:$0x1] %v3497_v7  ;;  %v4034_v5 = vpop.f32.mrb[63].mxu0 }
0x1a42   : > { %4299 = shalt.err (!%p4296_p3)
}
0x1a43   : > { %s4300_s18 = scalar_lea.hbm %s5233_s17, 16  ;;  %s4304_s15 = scalar_lea.hbm %s5287_s12, 32 }
0x1a44   : > { %p4301_p4 = scmp.ne.s32.totalorder %s5233_s17, %s4300_s18  ;;  %p4305_p9 = scmp.lt.u32.totalorder %s5233_s17, %s5287_s12 }
0x1a45   : > { %p4306_p10 = scmp.lt.u32.totalorder %s4304_s15, %s4300_s18  ;;  %p4308_p12 = scmp.lt.u32.totalorder %s4300_s18, %s5233_s17 }
0x1a46   : > { %p4302_p7 = pnand %p4301_p4, %p4470_p5 }
0x1a47   : > { %p4307_p11 = por %p4306_p10, %p4305_p9 }
0x1a48   : > { %p4303_p8 = pneg %p4302_p7 }
0x1a49   : > { %p4309_p13 = por %p4308_p12, %p4307_p11 }
0x1a4b   : > { %p4310_p0 = pnand %p4309_p13, %p4303_p8 }
0x1a4d   : > { %4313 = shalt.err (!%p4310_p0)
}
0x1a4e   : > { %4062 = dma.vmem_to_hbm [thread:$0]  (%p4470_p5), %s5235_s23, 16, %s5233_s17, %s3504_s26  }
0x1a4f PF: > { %p4068_p1 = scmp.ge.s32.totalorder %s4348_s24, 2  ;;  %s3528_s25 = sand.u32 1, %s4336_s21  }
0x1a50   : > { %s3529_s30 = scalar_lea.sflag [#allocation3], %s3528_s25 }
0x1a51   : > { %p4065_p2 = pnand %p4068_p1, %p4474_p6 }
0x1a53   : > { %4331 = dma.done.wait (!%p4065_p2), %s3529_s30, 16  }
0x1a54   : > { %4333 = vsyncadd (!%p4065_p2), %s3529_s30, 4294967280  ;;  %s5320_s19 = sld [smem:[#allocation5_spill]]  ;;  %s5321_s23 = sld [smem:[#allocation6_spill]] }
0x1a55   : > { %p22_p3 = scmp.ge.s32.totalorder %s4457_s27, 4   ;;  %s5322_s21 = smov %s4340_s22 }
0x1a56   : > { %s5324_s24 = smov %s4457_s27 }
0x1a57   :  { %24 = sbr.rel (!%p22_p3) target bundleno = 3 (0x3), region = 109 }
0x1a5a   : > { %s5323_s22 = smov %s5320_s19 }
0x1a5e   :  { %3533 = vsyncpa [#allocation3], 1 }
0x1a5f   :  { %3535 = vsyncpa [#allocation3 + $0x1], 1 }

</bundles_post_ra>
